<compile_context>
chip_gen: v5e
topology: v5e:2x2
jax: 0.10.0
libtpu: 0.0.40
codegen_flags: <defaults>
</compile_context>

<pallas_src>
import jax
import jax.numpy as jnp
from jax.experimental import pallas as pl
from jax.experimental.pallas import tpu as pltpu


# ---------------------------------------------------------------------------
# Fused encoder kernel (per T-chunk grid step):
#   1) gx = emb_chunk @ W_ih1^T + b1          (one big MXU matmul, bf16 x bf16)
#   2) tile_T steps of the 2-layer LSTM recurrence, h/c carried across chunks
#      in VMEM scratch; layer-2 uses one fused (2H, 4H) RHS.
# ---------------------------------------------------------------------------
def fused_encoder_kernel(emb_ref, wih1_ref, b1_ref, whh1_ref, w2cat_ref,
                         b2_ref, h_out_ref, c_out_ref, gx_ref, state_ref):
    t = pl.program_id(0)
    n_chunks = pl.num_programs(0)
    B = h_out_ref.shape[1]
    H = h_out_ref.shape[2]
    rows = emb_ref.shape[0]          # tile_T * B
    tile_T = rows // B

    @pl.when(t == 0)
    def _():
        state_ref[...] = jnp.zeros_like(state_ref)

    # ---- hoisted layer-1 input projection for this chunk (single matmul) ----
    gx_ref[...] = (
        jnp.dot(emb_ref[...], wih1_ref[...],
                preferred_element_type=jnp.float32)
        + b1_ref[...])

    # Hoist the layer-2 bias broadcast out of the (unrolled) time loop:
    # JAX does not CSE broadcast_in_dim.
    b2 = jnp.broadcast_to(b2_ref[...], (B, 4 * H))

    def gates_to_state(gates, c):
        # H is a multiple of 128 -> lane-aligned gate slices (pure VPU/EUP).
        i = jax.nn.sigmoid(gates[:, 0 * H:1 * H])
        f = jax.nn.sigmoid(gates[:, 1 * H:2 * H])
        g = jnp.tanh(gates[:, 2 * H:3 * H])
        o = jax.nn.sigmoid(gates[:, 3 * H:4 * H])
        c_new = f * c + i * g
        h_new = o * jnp.tanh(c_new)
        return h_new, c_new

    def step(i, carry):
        h1, c1, h2, c2 = carry
        row = pl.multiple_of(i * B, B)
        # Layer 1: only the recurrent matmul stays in the serial loop.
        gates1 = gx_ref[pl.ds(row, B), :] + jnp.dot(
            h1.astype(jnp.bfloat16), whh1_ref[...],
            preferred_element_type=jnp.float32)
        h1, c1 = gates_to_state(gates1, c1)
        # nn.LSTM inter-layer dropout: identity in eval mode.
        # Layer 2: one fused matmul  [h1, h2] @ [W_ih2^T ; W_hh2^T].
        x2 = jnp.concatenate([h1, h2], axis=-1).astype(jnp.bfloat16)
        gates2 = jnp.dot(x2, w2cat_ref[...],
                         preferred_element_type=jnp.float32) + b2
        h2, c2 = gates_to_state(gates2, c2)
        return h1, c1, h2, c2

    carry0 = (state_ref[0], state_ref[1], state_ref[2], state_ref[3])
    h1, c1, h2, c2 = jax.lax.fori_loop(0, tile_T, step, carry0, unroll=True)

    # Carry state to the next chunk.
    state_ref[0] = h1
    state_ref[1] = c1
    state_ref[2] = h2
    state_ref[3] = c2

    # Encoder.forward only returns (hidden, cell): write once, on the last
    # chunk, into the VMEM-resident output blocks (lane-dense, unmasked).
    @pl.when(t == n_chunks - 1)
    def _():
        h_out_ref[0] = h1
        h_out_ref[1] = h2
        c_out_ref[0] = c1
        c_out_ref[1] = c2


def fused_encoder_lstm(emb2d, wih1_t, b1, whh1_t, w2_cat, b2, *, B, tile_T):
    """emb2d: (T*B, E) bf16; weights bf16; biases f32 -> ((2,B,H), (2,B,H))."""
    TB, E = emb2d.shape
    H = whh1_t.shape[0]
    T = TB // B
    n_chunks = T // tile_T
    rows = tile_T * B
    grid_spec = pltpu.PrefetchScalarGridSpec(
        num_scalar_prefetch=0,
        grid=(n_chunks,),
        in_specs=[
            pl.BlockSpec((rows, E), lambda t: (t, 0)),          # emb chunk
            pl.BlockSpec((E, 4 * H), lambda t: (0, 0)),         # W_ih1^T
            pl.BlockSpec((1, 4 * H), lambda t: (0, 0)),         # b1
            pl.BlockSpec((H, 4 * H), lambda t: (0, 0)),         # W_hh1^T
            pl.BlockSpec((2 * H, 4 * H), lambda t: (0, 0)),     # [Wih2;Whh2]^T
            pl.BlockSpec((1, 4 * H), lambda t: (0, 0)),         # b2
        ],
        out_specs=(
            pl.BlockSpec((2, B, H), lambda t: (0, 0, 0)),
            pl.BlockSpec((2, B, H), lambda t: (0, 0, 0)),
        ),
        scratch_shapes=[
            pltpu.VMEM((rows, 4 * H), jnp.float32),   # per-chunk gx buffer
            pltpu.VMEM((4, B, H), jnp.float32),       # h1, c1, h2, c2 carry
        ],
    )
    return pl.pallas_call(
        fused_encoder_kernel,
        out_shape=(jax.ShapeDtypeStruct((2, B, H), jnp.float32),
                   jax.ShapeDtypeStruct((2, B, H), jnp.float32)),
        grid_spec=grid_spec,
        compiler_params=pltpu.CompilerParams(
            dimension_semantics=("arbitrary",)),
    )(emb2d, wih1_t, b1, whh1_t, w2_cat, b2)


# ---------------------------------------------------------------------------
# Encoder forward
# ---------------------------------------------------------------------------
def encoder_forward(src, params, *, tile_T=4):
    """src: (T, B) int32 token ids. Returns (hidden, cell): each (2, B, H)."""
    # Embedding gather stays in plain JAX (glue).
    # TODO(synk): fold the gather into the kernel (scalar-prefetched ids +
    # pl.Element index_map) to drop the (T,B,E) HBM round trip at prod sizes.
    emb = jnp.take(params["embedding"], src, axis=0)            # (T, B, E) f32
    # nn.Dropout in eval mode -> identity.
    T, B, E = emb.shape
    # Largest chunk size <= tile_T that divides T (robust, no assert).
    tt = min(tile_T, T)
    while T % tt:
        tt -= 1
    # Fused layer-2 RHS: [W_ih2^T ; W_hh2^T] -> (2H, 4H).
    w2_cat = jnp.concatenate([params["wih2_t"], params["whh2_t"]], axis=0)
    hidden, cell = fused_encoder_lstm(
        emb.reshape(T * B, E).astype(jnp.bfloat16),
        params["wih1_t"].astype(jnp.bfloat16),
        params["b1"],
        params["whh1_t"].astype(jnp.bfloat16),
        w2_cat.astype(jnp.bfloat16),
        params["b2"],
        B=B, tile_T=tt)
    return hidden, cell


# ---------------------------------------------------------------------------
# Pure-JAX reference (PyTorch nn.LSTM semantics, zero init state, f32)
# ---------------------------------------------------------------------------
def encoder_forward_ref(src, params):
    emb = jnp.take(params["embedding"], src, axis=0)
    T, B, E = emb.shape
    H = params["whh1_t"].shape[0]
    hp = jax.lax.Precision.HIGHEST

    def cell(xt, h, c, w_x, w_h, b):
        g = (jnp.dot(xt, w_x, precision=hp)
             + jnp.dot(h, w_h, precision=hp) + b)
        i = jax.nn.sigmoid(g[:, 0 * H:1 * H])
        f = jax.nn.sigmoid(g[:, 1 * H:2 * H])
        gg = jnp.tanh(g[:, 2 * H:3 * H])
        o = jax.nn.sigmoid(g[:, 3 * H:4 * H])
        c_new = f * c + i * gg
        h_new = o * jnp.tanh(c_new)
        return h_new, c_new

    def step(carry, xt):
        h1, c1, h2, c2 = carry
        h1, c1 = cell(xt, h1, c1, params["wih1_t"], params["whh1_t"],
                      params["b1"])
        h2, c2 = cell(h1, h2, c2, params["wih2_t"], params["whh2_t"],
                      params["b2"])
        return (h1, c1, h2, c2), None

    z = jnp.zeros((B, H), jnp.float32)
    (h1, c1, h2, c2), _ = jax.lax.scan(step, (z, z, z, z), emb)
    return jnp.stack([h1, h2], 0), jnp.stack([c1, c2], 0)


# ---------------------------------------------------------------------------
# Parameter init (weights pre-transposed, biases pre-summed), kept in f32.
# ---------------------------------------------------------------------------
def init_params(key, input_dim, emb_dim, hid_dim):
    keys = jax.random.split(key, 9)
    scale = 1.0 / jnp.sqrt(hid_dim)
    p = {"embedding": 0.1 * jax.random.normal(
        keys[0], (input_dim, emb_dim), dtype=jnp.float32)}

    def layer(kw1, kw2, kb1, kb2, in_dim):
        w_ih = scale * jax.random.normal(kw1, (4 * hid_dim, in_dim), jnp.float32)
        w_hh = scale * jax.random.normal(kw2, (4 * hid_dim, hid_dim), jnp.float32)
        b_ih = scale * jax.random.normal(kb1, (4 * hid_dim,), jnp.float32)
        b_hh = scale * jax.random.normal(kb2, (4 * hid_dim,), jnp.float32)
        return w_ih.T, w_hh.T, (b_ih + b_hh)[None, :]

    p["wih1_t"], p["whh1_t"], p["b1"] = layer(keys[1], keys[2], keys[3],
                                              keys[4], emb_dim)
    p["wih2_t"], p["whh2_t"], p["b2"] = layer(keys[5], keys[6], keys[7],
                                              keys[8], hid_dim)
    return p


if __name__ == "__main__":
    # Small but lane/sublane-aligned shapes: B=8 (sublane), E=H=128 (lane).
    INPUT_DIM = 50      # vocab size (len(SRC.vocab) stand-in)
    EMB_DIM = 128
    HID_DIM = 128
    N_LAYERS = 2        # fused 2-layer kernel matches the module's n_layers=2
    T, B = 8, 8         # src: (seq_len, batch) int token ids

    key = jax.random.PRNGKey(0)
    k_param, k_src = jax.random.split(key)
    params = init_params(k_param, INPUT_DIM, EMB_DIM, HID_DIM)
    src = jax.random.randint(k_src, (T, B), 0, INPUT_DIM, dtype=jnp.int32)

    fwd = jax.jit(encoder_forward)
    hidden, cell = fwd(src, params)
    hidden = jax.block_until_ready(hidden)
    cell = jax.block_until_ready(cell)

    # Sanity check against a pure-JAX f32 reference (kernel matmuls run in
    # bf16 with f32 accumulation, so tolerance is loosened accordingly).
    hidden_ref, cell_ref = encoder_forward_ref(src, params)
    assert hidden.shape == (N_LAYERS, B, HID_DIM)
    assert cell.shape == (N_LAYERS, B, HID_DIM)
    assert jnp.allclose(hidden, hidden_ref, rtol=2e-2, atol=2e-2)
    assert jnp.allclose(cell, cell_ref, rtol=2e-2, atol=2e-2)

    print("KERNEL_OK")
</pallas_src>

<mosaic_0001>
module attributes {stable_mosaic.version = 11 : i64} {
  func.func @fused_encoder_kernel(%arg0: i32, %arg1: memref<32x128xbf16, #tpu.memory_space<vmem>>, %arg2: memref<128x512xbf16, #tpu.memory_space<vmem>>, %arg3: memref<1x512xf32, #tpu.memory_space<vmem>>, %arg4: memref<128x512xbf16, #tpu.memory_space<vmem>>, %arg5: memref<256x512xbf16, #tpu.memory_space<vmem>>, %arg6: memref<1x512xf32, #tpu.memory_space<vmem>>, %arg7: memref<2x8x128xf32, #tpu.memory_space<vmem>>, %arg8: memref<2x8x128xf32, #tpu.memory_space<vmem>>, %arg9: memref<32x512xf32, #tpu.memory_space<vmem>>, %arg10: memref<4x8x128xf32, #tpu.memory_space<vmem>>) attributes {dimension_semantics = [#tpu.dimension_semantics<arbitrary>], iteration_bounds = array<i64: 2>, scalar_prefetch = 0 : i64, scratch_operands = 2 : i64, tpu.core_type = #tpu.core_type<tc>, window_params = [{transform_indices = @transform_0, window_bounds = array<i64: 32, 128>}, {pipeline_mode = #tpu.pipeline_mode<synchronous>, transform_indices = @transform_1, window_bounds = array<i64: 128, 512>}, {pipeline_mode = #tpu.pipeline_mode<synchronous>, transform_indices = @transform_2, window_bounds = array<i64: 1, 512>}, {pipeline_mode = #tpu.pipeline_mode<synchronous>, transform_indices = @transform_3, window_bounds = array<i64: 128, 512>}, {pipeline_mode = #tpu.pipeline_mode<synchronous>, transform_indices = @transform_4, window_bounds = array<i64: 256, 512>}, {pipeline_mode = #tpu.pipeline_mode<synchronous>, transform_indices = @transform_5, window_bounds = array<i64: 1, 512>}, {pipeline_mode = #tpu.pipeline_mode<synchronous>, transform_indices = @transform_6, window_bounds = array<i64: 2, 8, 128>}, {pipeline_mode = #tpu.pipeline_mode<synchronous>, transform_indices = @transform_7, window_bounds = array<i64: 2, 8, 128>}]} {
    %c0_i32 = arith.constant 0 : i32
    %0 = arith.cmpi eq, %arg0, %c0_i32 : i32
    %1 = arith.extui %0 : i1 to i32
    %c0_i32_0 = arith.constant 0 : i32
    %2 = arith.cmpi ne, %1, %c0_i32_0 : i32
    scf.if %2 {
      %cst_89 = arith.constant 0.000000e+00 : f32
      %288 = vector.broadcast %cst_89 : f32 to vector<4x8x128xf32>
      %c0_90 = arith.constant 0 : index
      %c0_91 = arith.constant 0 : index
      %c0_92 = arith.constant 0 : index
      %289 = vector.load %arg10[%c0_90, %c0_91, %c0_92] : memref<4x8x128xf32, #tpu.memory_space<vmem>>, vector<4x8x128xf32>
      tpu.vector_store %arg10[%c0_90, %c0_91, %c0_92], %288 {strides = array<i32>} : memref<4x8x128xf32, #tpu.memory_space<vmem>>, vector<4x8x128xf32>,
    } else {
    }
    %c0 = arith.constant 0 : index
    %c0_1 = arith.constant 0 : index
    %3 = vector.load %arg1[%c0, %c0_1] : memref<32x128xbf16, #tpu.memory_space<vmem>>, vector<32x128xbf16>
    %c0_2 = arith.constant 0 : index
    %c0_3 = arith.constant 0 : index
    %4 = vector.load %arg2[%c0_2, %c0_3] : memref<128x512xbf16, #tpu.memory_space<vmem>>, vector<128x512xbf16>
    %cst = arith.constant dense<0.000000e+00> : vector<32x512xf32>
    %5 = tpu.matmul %3, %4, %cst {dimension_numbers = #tpu.dot_dimension_numbers<[1], [0], [0], [1], [0, 0, 1, 1], [], []>} : vector<32x128xbf16>, vector<128x512xbf16>, vector<32x512xf32> -> vector<32x512xf32>
    %c0_4 = arith.constant 0 : index
    %c0_5 = arith.constant 0 : index
    %6 = vector.load %arg3[%c0_4, %c0_5] : memref<1x512xf32, #tpu.memory_space<vmem>>, vector<1x512xf32>
    %7 = vector.broadcast %6 : vector<1x512xf32> to vector<32x512xf32>
    %8 = arith.addf %5, %7 : vector<32x512xf32>
    %c0_6 = arith.constant 0 : index
    %c0_7 = arith.constant 0 : index
    %9 = vector.load %arg9[%c0_6, %c0_7] : memref<32x512xf32, #tpu.memory_space<vmem>>, vector<32x512xf32>
    tpu.vector_store %arg9[%c0_6, %c0_7], %8 {strides = array<i32>} : memref<32x512xf32, #tpu.memory_space<vmem>>, vector<32x512xf32>,
    %c0_8 = arith.constant 0 : index
    %c0_9 = arith.constant 0 : index
    %10 = vector.load %arg6[%c0_8, %c0_9] : memref<1x512xf32, #tpu.memory_space<vmem>>, vector<1x512xf32>
    %11 = vector.shape_cast %10 : vector<1x512xf32> to vector<1x512xf32>
    %12 = vector.broadcast %11 : vector<1x512xf32> to vector<8x512xf32>
    %c0_10 = arith.constant 0 : index
    %c0_11 = arith.constant 0 : index
    %c0_12 = arith.constant 0 : index
    %13 = vector.load %arg10[%c0_10, %c0_11, %c0_12] : memref<4x8x128xf32, #tpu.memory_space<vmem>>, vector<1x8x128xf32>
    %14 = vector.shape_cast %13 : vector<1x8x128xf32> to vector<8x128xf32>
    %c1 = arith.constant 1 : index
    %c0_13 = arith.constant 0 : index
    %c0_14 = arith.constant 0 : index
    %15 = vector.load %arg10[%c1, %c0_13, %c0_14] : memref<4x8x128xf32, #tpu.memory_space<vmem>>, vector<1x8x128xf32>
    %16 = vector.shape_cast %15 : vector<1x8x128xf32> to vector<8x128xf32>
    %c2 = arith.constant 2 : index
    %c0_15 = arith.constant 0 : index
    %c0_16 = arith.constant 0 : index
    %17 = vector.load %arg10[%c2, %c0_15, %c0_16] : memref<4x8x128xf32, #tpu.memory_space<vmem>>, vector<1x8x128xf32>
    %18 = vector.shape_cast %17 : vector<1x8x128xf32> to vector<8x128xf32>
    %c3 = arith.constant 3 : index
    %c0_17 = arith.constant 0 : index
    %c0_18 = arith.constant 0 : index
    %19 = vector.load %arg10[%c3, %c0_17, %c0_18] : memref<4x8x128xf32, #tpu.memory_space<vmem>>, vector<1x8x128xf32>
    %20 = vector.shape_cast %19 : vector<1x8x128xf32> to vector<8x128xf32>
    %c0_i32_19 = arith.constant 0 : i32
    %c8_i32 = arith.constant 8 : i32
    %21 = arith.muli %c0_i32_19, %c8_i32 : i32
    %22 = tpu.assume_multiple %21, 8 : i32
    %23 = arith.index_cast %22 : i32 to index
    %c0_20 = arith.constant 0 : index
    %24 = vector.load %arg9[%23, %c0_20] : memref<32x512xf32, #tpu.memory_space<vmem>>, vector<8x512xf32>
    %25 = arith.truncf %14 : vector<8x128xf32> to vector<8x128xbf16>
    %c0_21 = arith.constant 0 : index
    %c0_22 = arith.constant 0 : index
    %26 = vector.load %arg4[%c0_21, %c0_22] : memref<128x512xbf16, #tpu.memory_space<vmem>>, vector<128x512xbf16>
    %cst_23 = arith.constant dense<0.000000e+00> : vector<8x512xf32>
    %27 = tpu.matmul %25, %26, %cst_23 {dimension_numbers = #tpu.dot_dimension_numbers<[1], [0], [0], [1], [0, 0, 1, 1], [], []>} : vector<8x128xbf16>, vector<128x512xbf16>, vector<8x512xf32> -> vector<8x512xf32>
    %28 = arith.addf %24, %27 : vector<8x512xf32>
    %29 = vector.extract_strided_slice %28 {offsets = [0, 0], sizes = [8, 128], strides = [1, 1]} : vector<8x512xf32> to vector<8x128xf32>
    %30 = arith.negf %29 : vector<8x128xf32>
    %31 = math.exp %30 : vector<8x128xf32>
    %cst_24 = arith.constant 1.000000e+00 : f32
    %32 = vector.broadcast %cst_24 : f32 to vector<8x128xf32>
    %33 = arith.addf %32, %31 : vector<8x128xf32>
    %34 = arith.divf %32, %33 : vector<8x128xf32>
    %35 = vector.extract_strided_slice %28 {offsets = [0, 128], sizes = [8, 128], strides = [1, 1]} : vector<8x512xf32> to vector<8x128xf32>
    %36 = arith.negf %35 : vector<8x128xf32>
    %37 = math.exp %36 : vector<8x128xf32>
    %cst_25 = arith.constant 1.000000e+00 : f32
    %38 = vector.broadcast %cst_25 : f32 to vector<8x128xf32>
    %39 = arith.addf %38, %37 : vector<8x128xf32>
    %40 = arith.divf %38, %39 : vector<8x128xf32>
    %41 = vector.extract_strided_slice %28 {offsets = [0, 256], sizes = [8, 128], strides = [1, 1]} : vector<8x512xf32> to vector<8x128xf32>
    %42 = math.tanh %41 : vector<8x128xf32>
    %43 = vector.extract_strided_slice %28 {offsets = [0, 384], sizes = [8, 128], strides = [1, 1]} : vector<8x512xf32> to vector<8x128xf32>
    %44 = arith.negf %43 : vector<8x128xf32>
    %45 = math.exp %44 : vector<8x128xf32>
    %cst_26 = arith.constant 1.000000e+00 : f32
    %46 = vector.broadcast %cst_26 : f32 to vector<8x128xf32>
    %47 = arith.addf %46, %45 : vector<8x128xf32>
    %48 = arith.divf %46, %47 : vector<8x128xf32>
    %49 = arith.mulf %40, %16 : vector<8x128xf32>
    %50 = arith.mulf %34, %42 : vector<8x128xf32>
    %51 = arith.addf %49, %50 : vector<8x128xf32>
    %52 = math.tanh %51 : vector<8x128xf32>
    %53 = arith.mulf %48, %52 : vector<8x128xf32>
    %54 = tpu.concatenate %53, %18 in 1 : vector<8x128xf32>, vector<8x128xf32> -> vector<8x256xf32>
    %55 = arith.truncf %54 : vector<8x256xf32> to vector<8x256xbf16>
    %c0_27 = arith.constant 0 : index
    %c0_28 = arith.constant 0 : index
    %56 = vector.load %arg5[%c0_27, %c0_28] : memref<256x512xbf16, #tpu.memory_space<vmem>>, vector<256x512xbf16>
    %cst_29 = arith.constant dense<0.000000e+00> : vector<8x512xf32>
    %57 = tpu.matmul %55, %56, %cst_29 {dimension_numbers = #tpu.dot_dimension_numbers<[1], [0], [0], [1], [0, 0, 1, 1], [], []>} : vector<8x256xbf16>, vector<256x512xbf16>, vector<8x512xf32> -> vector<8x512xf32>
    %58 = arith.addf %57, %12 : vector<8x512xf32>
    %59 = vector.extract_strided_slice %58 {offsets = [0, 0], sizes = [8, 128], strides = [1, 1]} : vector<8x512xf32> to vector<8x128xf32>
    %60 = arith.negf %59 : vector<8x128xf32>
    %61 = math.exp %60 : vector<8x128xf32>
    %cst_30 = arith.constant 1.000000e+00 : f32
    %62 = vector.broadcast %cst_30 : f32 to vector<8x128xf32>
    %63 = arith.addf %62, %61 : vector<8x128xf32>
    %64 = arith.divf %62, %63 : vector<8x128xf32>
    %65 = vector.extract_strided_slice %58 {offsets = [0, 128], sizes = [8, 128], strides = [1, 1]} : vector<8x512xf32> to vector<8x128xf32>
    %66 = arith.negf %65 : vector<8x128xf32>
    %67 = math.exp %66 : vector<8x128xf32>
    %cst_31 = arith.constant 1.000000e+00 : f32
    %68 = vector.broadcast %cst_31 : f32 to vector<8x128xf32>
    %69 = arith.addf %68, %67 : vector<8x128xf32>
    %70 = arith.divf %68, %69 : vector<8x128xf32>
    %71 = vector.extract_strided_slice %58 {offsets = [0, 256], sizes = [8, 128], strides = [1, 1]} : vector<8x512xf32> to vector<8x128xf32>
    %72 = math.tanh %71 : vector<8x128xf32>
    %73 = vector.extract_strided_slice %58 {offsets = [0, 384], sizes = [8, 128], strides = [1, 1]} : vector<8x512xf32> to vector<8x128xf32>
    %74 = arith.negf %73 : vector<8x128xf32>
    %75 = math.exp %74 : vector<8x128xf32>
    %cst_32 = arith.constant 1.000000e+00 : f32
    %76 = vector.broadcast %cst_32 : f32 to vector<8x128xf32>
    %77 = arith.addf %76, %75 : vector<8x128xf32>
    %78 = arith.divf %76, %77 : vector<8x128xf32>
    %79 = arith.mulf %70, %20 : vector<8x128xf32>
    %80 = arith.mulf %64, %72 : vector<8x128xf32>
    %81 = arith.addf %79, %80 : vector<8x128xf32>
    %82 = math.tanh %81 : vector<8x128xf32>
    %83 = arith.mulf %78, %82 : vector<8x128xf32>
    %c1_i32 = arith.constant 1 : i32
    %c8_i32_33 = arith.constant 8 : i32
    %84 = arith.muli %c1_i32, %c8_i32_33 : i32
    %85 = tpu.assume_multiple %84, 8 : i32
    %86 = arith.index_cast %85 : i32 to index
    %c0_34 = arith.constant 0 : index
    %87 = vector.load %arg9[%86, %c0_34] : memref<32x512xf32, #tpu.memory_space<vmem>>, vector<8x512xf32>
    %88 = arith.truncf %53 : vector<8x128xf32> to vector<8x128xbf16>
    %c0_35 = arith.constant 0 : index
    %c0_36 = arith.constant 0 : index
    %89 = vector.load %arg4[%c0_35, %c0_36] : memref<128x512xbf16, #tpu.memory_space<vmem>>, vector<128x512xbf16>
    %cst_37 = arith.constant dense<0.000000e+00> : vector<8x512xf32>
    %90 = tpu.matmul %88, %89, %cst_37 {dimension_numbers = #tpu.dot_dimension_numbers<[1], [0], [0], [1], [0, 0, 1, 1], [], []>} : vector<8x128xbf16>, vector<128x512xbf16>, vector<8x512xf32> -> vector<8x512xf32>
    %91 = arith.addf %87, %90 : vector<8x512xf32>
    %92 = vector.extract_strided_slice %91 {offsets = [0, 0], sizes = [8, 128], strides = [1, 1]} : vector<8x512xf32> to vector<8x128xf32>
    %93 = arith.negf %92 : vector<8x128xf32>
    %94 = math.exp %93 : vector<8x128xf32>
    %cst_38 = arith.constant 1.000000e+00 : f32
    %95 = vector.broadcast %cst_38 : f32 to vector<8x128xf32>
    %96 = arith.addf %95, %94 : vector<8x128xf32>
    %97 = arith.divf %95, %96 : vector<8x128xf32>
    %98 = vector.extract_strided_slice %91 {offsets = [0, 128], sizes = [8, 128], strides = [1, 1]} : vector<8x512xf32> to vector<8x128xf32>
    %99 = arith.negf %98 : vector<8x128xf32>
    %100 = math.exp %99 : vector<8x128xf32>
    %cst_39 = arith.constant 1.000000e+00 : f32
    %101 = vector.broadcast %cst_39 : f32 to vector<8x128xf32>
    %102 = arith.addf %101, %100 : vector<8x128xf32>
    %103 = arith.divf %101, %102 : vector<8x128xf32>
    %104 = vector.extract_strided_slice %91 {offsets = [0, 256], sizes = [8, 128], strides = [1, 1]} : vector<8x512xf32> to vector<8x128xf32>
    %105 = math.tanh %104 : vector<8x128xf32>
    %106 = vector.extract_strided_slice %91 {offsets = [0, 384], sizes = [8, 128], strides = [1, 1]} : vector<8x512xf32> to vector<8x128xf32>
    %107 = arith.negf %106 : vector<8x128xf32>
    %108 = math.exp %107 : vector<8x128xf32>
    %cst_40 = arith.constant 1.000000e+00 : f32
    %109 = vector.broadcast %cst_40 : f32 to vector<8x128xf32>
    %110 = arith.addf %109, %108 : vector<8x128xf32>
    %111 = arith.divf %109, %110 : vector<8x128xf32>
    %112 = arith.mulf %103, %51 : vector<8x128xf32>
    %113 = arith.mulf %97, %105 : vector<8x128xf32>
    %114 = arith.addf %112, %113 : vector<8x128xf32>
    %115 = math.tanh %114 : vector<8x128xf32>
    %116 = arith.mulf %111, %115 : vector<8x128xf32>
    %117 = tpu.concatenate %116, %83 in 1 : vector<8x128xf32>, vector<8x128xf32> -> vector<8x256xf32>
    %118 = arith.truncf %117 : vector<8x256xf32> to vector<8x256xbf16>
    %c0_41 = arith.constant 0 : index
    %c0_42 = arith.constant 0 : index
    %119 = vector.load %arg5[%c0_41, %c0_42] : memref<256x512xbf16, #tpu.memory_space<vmem>>, vector<256x512xbf16>
    %cst_43 = arith.constant dense<0.000000e+00> : vector<8x512xf32>
    %120 = tpu.matmul %118, %119, %cst_43 {dimension_numbers = #tpu.dot_dimension_numbers<[1], [0], [0], [1], [0, 0, 1, 1], [], []>} : vector<8x256xbf16>, vector<256x512xbf16>, vector<8x512xf32> -> vector<8x512xf32>
    %121 = arith.addf %120, %12 : vector<8x512xf32>
    %122 = vector.extract_strided_slice %121 {offsets = [0, 0], sizes = [8, 128], strides = [1, 1]} : vector<8x512xf32> to vector<8x128xf32>
    %123 = arith.negf %122 : vector<8x128xf32>
    %124 = math.exp %123 : vector<8x128xf32>
    %cst_44 = arith.constant 1.000000e+00 : f32
    %125 = vector.broadcast %cst_44 : f32 to vector<8x128xf32>
    %126 = arith.addf %125, %124 : vector<8x128xf32>
    %127 = arith.divf %125, %126 : vector<8x128xf32>
    %128 = vector.extract_strided_slice %121 {offsets = [0, 128], sizes = [8, 128], strides = [1, 1]} : vector<8x512xf32> to vector<8x128xf32>
    %129 = arith.negf %128 : vector<8x128xf32>
    %130 = math.exp %129 : vector<8x128xf32>
    %cst_45 = arith.constant 1.000000e+00 : f32
    %131 = vector.broadcast %cst_45 : f32 to vector<8x128xf32>
    %132 = arith.addf %131, %130 : vector<8x128xf32>
    %133 = arith.divf %131, %132 : vector<8x128xf32>
    %134 = vector.extract_strided_slice %121 {offsets = [0, 256], sizes = [8, 128], strides = [1, 1]} : vector<8x512xf32> to vector<8x128xf32>
    %135 = math.tanh %134 : vector<8x128xf32>
    %136 = vector.extract_strided_slice %121 {offsets = [0, 384], sizes = [8, 128], strides = [1, 1]} : vector<8x512xf32> to vector<8x128xf32>
    %137 = arith.negf %136 : vector<8x128xf32>
    %138 = math.exp %137 : vector<8x128xf32>
    %cst_46 = arith.constant 1.000000e+00 : f32
    %139 = vector.broadcast %cst_46 : f32 to vector<8x128xf32>
    %140 = arith.addf %139, %138 : vector<8x128xf32>
    %141 = arith.divf %139, %140 : vector<8x128xf32>
    %142 = arith.mulf %133, %81 : vector<8x128xf32>
    %143 = arith.mulf %127, %135 : vector<8x128xf32>
    %144 = arith.addf %142, %143 : vector<8x128xf32>
    %145 = math.tanh %144 : vector<8x128xf32>
    %146 = arith.mulf %141, %145 : vector<8x128xf32>
    %c2_i32 = arith.constant 2 : i32
    %c8_i32_47 = arith.constant 8 : i32
    %147 = arith.muli %c2_i32, %c8_i32_47 : i32
    %148 = tpu.assume_multiple %147, 8 : i32
    %149 = arith.index_cast %148 : i32 to index
    %c0_48 = arith.constant 0 : index
    %150 = vector.load %arg9[%149, %c0_48] : memref<32x512xf32, #tpu.memory_space<vmem>>, vector<8x512xf32>
    %151 = arith.truncf %116 : vector<8x128xf32> to vector<8x128xbf16>
    %c0_49 = arith.constant 0 : index
    %c0_50 = arith.constant 0 : index
    %152 = vector.load %arg4[%c0_49, %c0_50] : memref<128x512xbf16, #tpu.memory_space<vmem>>, vector<128x512xbf16>
    %cst_51 = arith.constant dense<0.000000e+00> : vector<8x512xf32>
    %153 = tpu.matmul %151, %152, %cst_51 {dimension_numbers = #tpu.dot_dimension_numbers<[1], [0], [0], [1], [0, 0, 1, 1], [], []>} : vector<8x128xbf16>, vector<128x512xbf16>, vector<8x512xf32> -> vector<8x512xf32>
    %154 = arith.addf %150, %153 : vector<8x512xf32>
    %155 = vector.extract_strided_slice %154 {offsets = [0, 0], sizes = [8, 128], strides = [1, 1]} : vector<8x512xf32> to vector<8x128xf32>
    %156 = arith.negf %155 : vector<8x128xf32>
    %157 = math.exp %156 : vector<8x128xf32>
    %cst_52 = arith.constant 1.000000e+00 : f32
    %158 = vector.broadcast %cst_52 : f32 to vector<8x128xf32>
    %159 = arith.addf %158, %157 : vector<8x128xf32>
    %160 = arith.divf %158, %159 : vector<8x128xf32>
    %161 = vector.extract_strided_slice %154 {offsets = [0, 128], sizes = [8, 128], strides = [1, 1]} : vector<8x512xf32> to vector<8x128xf32>
    %162 = arith.negf %161 : vector<8x128xf32>
    %163 = math.exp %162 : vector<8x128xf32>
    %cst_53 = arith.constant 1.000000e+00 : f32
    %164 = vector.broadcast %cst_53 : f32 to vector<8x128xf32>
    %165 = arith.addf %164, %163 : vector<8x128xf32>
    %166 = arith.divf %164, %165 : vector<8x128xf32>
    %167 = vector.extract_strided_slice %154 {offsets = [0, 256], sizes = [8, 128], strides = [1, 1]} : vector<8x512xf32> to vector<8x128xf32>
    %168 = math.tanh %167 : vector<8x128xf32>
    %169 = vector.extract_strided_slice %154 {offsets = [0, 384], sizes = [8, 128], strides = [1, 1]} : vector<8x512xf32> to vector<8x128xf32>
    %170 = arith.negf %169 : vector<8x128xf32>
    %171 = math.exp %170 : vector<8x128xf32>
    %cst_54 = arith.constant 1.000000e+00 : f32
    %172 = vector.broadcast %cst_54 : f32 to vector<8x128xf32>
    %173 = arith.addf %172, %171 : vector<8x128xf32>
    %174 = arith.divf %172, %173 : vector<8x128xf32>
    %175 = arith.mulf %166, %114 : vector<8x128xf32>
    %176 = arith.mulf %160, %168 : vector<8x128xf32>
    %177 = arith.addf %175, %176 : vector<8x128xf32>
    %178 = math.tanh %177 : vector<8x128xf32>
    %179 = arith.mulf %174, %178 : vector<8x128xf32>
    %180 = tpu.concatenate %179, %146 in 1 : vector<8x128xf32>, vector<8x128xf32> -> vector<8x256xf32>
    %181 = arith.truncf %180 : vector<8x256xf32> to vector<8x256xbf16>
    %c0_55 = arith.constant 0 : index
    %c0_56 = arith.constant 0 : index
    %182 = vector.load %arg5[%c0_55, %c0_56] : memref<256x512xbf16, #tpu.memory_space<vmem>>, vector<256x512xbf16>
    %cst_57 = arith.constant dense<0.000000e+00> : vector<8x512xf32>
    %183 = tpu.matmul %181, %182, %cst_57 {dimension_numbers = #tpu.dot_dimension_numbers<[1], [0], [0], [1], [0, 0, 1, 1], [], []>} : vector<8x256xbf16>, vector<256x512xbf16>, vector<8x512xf32> -> vector<8x512xf32>
    %184 = arith.addf %183, %12 : vector<8x512xf32>
    %185 = vector.extract_strided_slice %184 {offsets = [0, 0], sizes = [8, 128], strides = [1, 1]} : vector<8x512xf32> to vector<8x128xf32>
    %186 = arith.negf %185 : vector<8x128xf32>
    %187 = math.exp %186 : vector<8x128xf32>
    %cst_58 = arith.constant 1.000000e+00 : f32
    %188 = vector.broadcast %cst_58 : f32 to vector<8x128xf32>
    %189 = arith.addf %188, %187 : vector<8x128xf32>
    %190 = arith.divf %188, %189 : vector<8x128xf32>
    %191 = vector.extract_strided_slice %184 {offsets = [0, 128], sizes = [8, 128], strides = [1, 1]} : vector<8x512xf32> to vector<8x128xf32>
    %192 = arith.negf %191 : vector<8x128xf32>
    %193 = math.exp %192 : vector<8x128xf32>
    %cst_59 = arith.constant 1.000000e+00 : f32
    %194 = vector.broadcast %cst_59 : f32 to vector<8x128xf32>
    %195 = arith.addf %194, %193 : vector<8x128xf32>
    %196 = arith.divf %194, %195 : vector<8x128xf32>
    %197 = vector.extract_strided_slice %184 {offsets = [0, 256], sizes = [8, 128], strides = [1, 1]} : vector<8x512xf32> to vector<8x128xf32>
    %198 = math.tanh %197 : vector<8x128xf32>
    %199 = vector.extract_strided_slice %184 {offsets = [0, 384], sizes = [8, 128], strides = [1, 1]} : vector<8x512xf32> to vector<8x128xf32>
    %200 = arith.negf %199 : vector<8x128xf32>
    %201 = math.exp %200 : vector<8x128xf32>
    %cst_60 = arith.constant 1.000000e+00 : f32
    %202 = vector.broadcast %cst_60 : f32 to vector<8x128xf32>
    %203 = arith.addf %202, %201 : vector<8x128xf32>
    %204 = arith.divf %202, %203 : vector<8x128xf32>
    %205 = arith.mulf %196, %144 : vector<8x128xf32>
    %206 = arith.mulf %190, %198 : vector<8x128xf32>
    %207 = arith.addf %205, %206 : vector<8x128xf32>
    %208 = math.tanh %207 : vector<8x128xf32>
    %209 = arith.mulf %204, %208 : vector<8x128xf32>
    %c3_i32 = arith.constant 3 : i32
    %c8_i32_61 = arith.constant 8 : i32
    %210 = arith.muli %c3_i32, %c8_i32_61 : i32
    %211 = tpu.assume_multiple %210, 8 : i32
    %212 = arith.index_cast %211 : i32 to index
    %c0_62 = arith.constant 0 : index
    %213 = vector.load %arg9[%212, %c0_62] : memref<32x512xf32, #tpu.memory_space<vmem>>, vector<8x512xf32>
    %214 = arith.truncf %179 : vector<8x128xf32> to vector<8x128xbf16>
    %c0_63 = arith.constant 0 : index
    %c0_64 = arith.constant 0 : index
    %215 = vector.load %arg4[%c0_63, %c0_64] : memref<128x512xbf16, #tpu.memory_space<vmem>>, vector<128x512xbf16>
    %cst_65 = arith.constant dense<0.000000e+00> : vector<8x512xf32>
    %216 = tpu.matmul %214, %215, %cst_65 {dimension_numbers = #tpu.dot_dimension_numbers<[1], [0], [0], [1], [0, 0, 1, 1], [], []>} : vector<8x128xbf16>, vector<128x512xbf16>, vector<8x512xf32> -> vector<8x512xf32>
    %217 = arith.addf %213, %216 : vector<8x512xf32>
    %218 = vector.extract_strided_slice %217 {offsets = [0, 0], sizes = [8, 128], strides = [1, 1]} : vector<8x512xf32> to vector<8x128xf32>
    %219 = arith.negf %218 : vector<8x128xf32>
    %220 = math.exp %219 : vector<8x128xf32>
    %cst_66 = arith.constant 1.000000e+00 : f32
    %221 = vector.broadcast %cst_66 : f32 to vector<8x128xf32>
    %222 = arith.addf %221, %220 : vector<8x128xf32>
    %223 = arith.divf %221, %222 : vector<8x128xf32>
    %224 = vector.extract_strided_slice %217 {offsets = [0, 128], sizes = [8, 128], strides = [1, 1]} : vector<8x512xf32> to vector<8x128xf32>
    %225 = arith.negf %224 : vector<8x128xf32>
    %226 = math.exp %225 : vector<8x128xf32>
    %cst_67 = arith.constant 1.000000e+00 : f32
    %227 = vector.broadcast %cst_67 : f32 to vector<8x128xf32>
    %228 = arith.addf %227, %226 : vector<8x128xf32>
    %229 = arith.divf %227, %228 : vector<8x128xf32>
    %230 = vector.extract_strided_slice %217 {offsets = [0, 256], sizes = [8, 128], strides = [1, 1]} : vector<8x512xf32> to vector<8x128xf32>
    %231 = math.tanh %230 : vector<8x128xf32>
    %232 = vector.extract_strided_slice %217 {offsets = [0, 384], sizes = [8, 128], strides = [1, 1]} : vector<8x512xf32> to vector<8x128xf32>
    %233 = arith.negf %232 : vector<8x128xf32>
    %234 = math.exp %233 : vector<8x128xf32>
    %cst_68 = arith.constant 1.000000e+00 : f32
    %235 = vector.broadcast %cst_68 : f32 to vector<8x128xf32>
    %236 = arith.addf %235, %234 : vector<8x128xf32>
    %237 = arith.divf %235, %236 : vector<8x128xf32>
    %238 = arith.mulf %229, %177 : vector<8x128xf32>
    %239 = arith.mulf %223, %231 : vector<8x128xf32>
    %240 = arith.addf %238, %239 : vector<8x128xf32>
    %241 = math.tanh %240 : vector<8x128xf32>
    %242 = arith.mulf %237, %241 : vector<8x128xf32>
    %243 = tpu.concatenate %242, %209 in 1 : vector<8x128xf32>, vector<8x128xf32> -> vector<8x256xf32>
    %244 = arith.truncf %243 : vector<8x256xf32> to vector<8x256xbf16>
    %c0_69 = arith.constant 0 : index
    %c0_70 = arith.constant 0 : index
    %245 = vector.load %arg5[%c0_69, %c0_70] : memref<256x512xbf16, #tpu.memory_space<vmem>>, vector<256x512xbf16>
    %cst_71 = arith.constant dense<0.000000e+00> : vector<8x512xf32>
    %246 = tpu.matmul %244, %245, %cst_71 {dimension_numbers = #tpu.dot_dimension_numbers<[1], [0], [0], [1], [0, 0, 1, 1], [], []>} : vector<8x256xbf16>, vector<256x512xbf16>, vector<8x512xf32> -> vector<8x512xf32>
    %247 = arith.addf %246, %12 : vector<8x512xf32>
    %248 = vector.extract_strided_slice %247 {offsets = [0, 0], sizes = [8, 128], strides = [1, 1]} : vector<8x512xf32> to vector<8x128xf32>
    %249 = arith.negf %248 : vector<8x128xf32>
    %250 = math.exp %249 : vector<8x128xf32>
    %cst_72 = arith.constant 1.000000e+00 : f32
    %251 = vector.broadcast %cst_72 : f32 to vector<8x128xf32>
    %252 = arith.addf %251, %250 : vector<8x128xf32>
    %253 = arith.divf %251, %252 : vector<8x128xf32>
    %254 = vector.extract_strided_slice %247 {offsets = [0, 128], sizes = [8, 128], strides = [1, 1]} : vector<8x512xf32> to vector<8x128xf32>
    %255 = arith.negf %254 : vector<8x128xf32>
    %256 = math.exp %255 : vector<8x128xf32>
    %cst_73 = arith.constant 1.000000e+00 : f32
    %257 = vector.broadcast %cst_73 : f32 to vector<8x128xf32>
    %258 = arith.addf %257, %256 : vector<8x128xf32>
    %259 = arith.divf %257, %258 : vector<8x128xf32>
    %260 = vector.extract_strided_slice %247 {offsets = [0, 256], sizes = [8, 128], strides = [1, 1]} : vector<8x512xf32> to vector<8x128xf32>
    %261 = math.tanh %260 : vector<8x128xf32>
    %262 = vector.extract_strided_slice %247 {offsets = [0, 384], sizes = [8, 128], strides = [1, 1]} : vector<8x512xf32> to vector<8x128xf32>
    %263 = arith.negf %262 : vector<8x128xf32>
    %264 = math.exp %263 : vector<8x128xf32>
    %cst_74 = arith.constant 1.000000e+00 : f32
    %265 = vector.broadcast %cst_74 : f32 to vector<8x128xf32>
    %266 = arith.addf %265, %264 : vector<8x128xf32>
    %267 = arith.divf %265, %266 : vector<8x128xf32>
    %268 = arith.mulf %259, %207 : vector<8x128xf32>
    %269 = arith.mulf %253, %261 : vector<8x128xf32>
    %270 = arith.addf %268, %269 : vector<8x128xf32>
    %271 = math.tanh %270 : vector<8x128xf32>
    %272 = arith.mulf %267, %271 : vector<8x128xf32>
    %c4_i32 = arith.constant 4 : i32
    %c0_75 = arith.constant 0 : index
    %c0_76 = arith.constant 0 : index
    %c0_77 = arith.constant 0 : index
    %273 = vector.load %arg10[%c0_75, %c0_76, %c0_77] : memref<4x8x128xf32, #tpu.memory_space<vmem>>, vector<1x8x128xf32>
    %274 = vector.shape_cast %273 : vector<1x8x128xf32> to vector<8x128xf32>
    %275 = vector.shape_cast %242 : vector<8x128xf32> to vector<1x8x128xf32>
    tpu.vector_store %arg10[%c0_75, %c0_76, %c0_77], %275 {strides = array<i32>} : memref<4x8x128xf32, #tpu.memory_space<vmem>>, vector<1x8x128xf32>,
    %c1_78 = arith.constant 1 : index
    %c0_79 = arith.constant 0 : index
    %c0_80 = arith.constant 0 : index
    %276 = vector.load %arg10[%c1_78, %c0_79, %c0_80] : memref<4x8x128xf32, #tpu.memory_space<vmem>>, vector<1x8x128xf32>
    %277 = vector.shape_cast %276 : vector<1x8x128xf32> to vector<8x128xf32>
    %278 = vector.shape_cast %240 : vector<8x128xf32> to vector<1x8x128xf32>
    tpu.vector_store %arg10[%c1_78, %c0_79, %c0_80], %278 {strides = array<i32>} : memref<4x8x128xf32, #tpu.memory_space<vmem>>, vector<1x8x128xf32>,
    %c2_81 = arith.constant 2 : index
    %c0_82 = arith.constant 0 : index
    %c0_83 = arith.constant 0 : index
    %279 = vector.load %arg10[%c2_81, %c0_82, %c0_83] : memref<4x8x128xf32, #tpu.memory_space<vmem>>, vector<1x8x128xf32>
    %280 = vector.shape_cast %279 : vector<1x8x128xf32> to vector<8x128xf32>
    %281 = vector.shape_cast %272 : vector<8x128xf32> to vector<1x8x128xf32>
    tpu.vector_store %arg10[%c2_81, %c0_82, %c0_83], %281 {strides = array<i32>} : memref<4x8x128xf32, #tpu.memory_space<vmem>>, vector<1x8x128xf32>,
    %c3_84 = arith.constant 3 : index
    %c0_85 = arith.constant 0 : index
    %c0_86 = arith.constant 0 : index
    %282 = vector.load %arg10[%c3_84, %c0_85, %c0_86] : memref<4x8x128xf32, #tpu.memory_space<vmem>>, vector<1x8x128xf32>
    %283 = vector.shape_cast %282 : vector<1x8x128xf32> to vector<8x128xf32>
    %284 = vector.shape_cast %270 : vector<8x128xf32> to vector<1x8x128xf32>
    tpu.vector_store %arg10[%c3_84, %c0_85, %c0_86], %284 {strides = array<i32>} : memref<4x8x128xf32, #tpu.memory_space<vmem>>, vector<1x8x128xf32>,
    %c1_i32_87 = arith.constant 1 : i32
    %285 = arith.cmpi eq, %arg0, %c1_i32_87 : i32
    %286 = arith.extui %285 : i1 to i32
    %c0_i32_88 = arith.constant 0 : i32
    %287 = arith.cmpi ne, %286, %c0_i32_88 : i32
    scf.if %287 {
      %c0_89 = arith.constant 0 : index
      %c0_90 = arith.constant 0 : index
      %c0_91 = arith.constant 0 : index
      %288 = vector.load %arg7[%c0_89, %c0_90, %c0_91] : memref<2x8x128xf32, #tpu.memory_space<vmem>>, vector<1x8x128xf32>
      %289 = vector.shape_cast %288 : vector<1x8x128xf32> to vector<8x128xf32>
      %290 = vector.shape_cast %242 : vector<8x128xf32> to vector<1x8x128xf32>
      tpu.vector_store %arg7[%c0_89, %c0_90, %c0_91], %290 {strides = array<i32>} : memref<2x8x128xf32, #tpu.memory_space<vmem>>, vector<1x8x128xf32>,
      %c1_92 = arith.constant 1 : index
      %c0_93 = arith.constant 0 : index
      %c0_94 = arith.constant 0 : index
      %291 = vector.load %arg7[%c1_92, %c0_93, %c0_94] : memref<2x8x128xf32, #tpu.memory_space<vmem>>, vector<1x8x128xf32>
      %292 = vector.shape_cast %291 : vector<1x8x128xf32> to vector<8x128xf32>
      %293 = vector.shape_cast %272 : vector<8x128xf32> to vector<1x8x128xf32>
      tpu.vector_store %arg7[%c1_92, %c0_93, %c0_94], %293 {strides = array<i32>} : memref<2x8x128xf32, #tpu.memory_space<vmem>>, vector<1x8x128xf32>,
      %c0_95 = arith.constant 0 : index
      %c0_96 = arith.constant 0 : index
      %c0_97 = arith.constant 0 : index
      %294 = vector.load %arg8[%c0_95, %c0_96, %c0_97] : memref<2x8x128xf32, #tpu.memory_space<vmem>>, vector<1x8x128xf32>
      %295 = vector.shape_cast %294 : vector<1x8x128xf32> to vector<8x128xf32>
      %296 = vector.shape_cast %240 : vector<8x128xf32> to vector<1x8x128xf32>
      tpu.vector_store %arg8[%c0_95, %c0_96, %c0_97], %296 {strides = array<i32>} : memref<2x8x128xf32, #tpu.memory_space<vmem>>, vector<1x8x128xf32>,
      %c1_98 = arith.constant 1 : index
      %c0_99 = arith.constant 0 : index
      %c0_100 = arith.constant 0 : index
      %297 = vector.load %arg8[%c1_98, %c0_99, %c0_100] : memref<2x8x128xf32, #tpu.memory_space<vmem>>, vector<1x8x128xf32>
      %298 = vector.shape_cast %297 : vector<1x8x128xf32> to vector<8x128xf32>
      %299 = vector.shape_cast %270 : vector<8x128xf32> to vector<1x8x128xf32>
      tpu.vector_store %arg8[%c1_98, %c0_99, %c0_100], %299 {strides = array<i32>} : memref<2x8x128xf32, #tpu.memory_space<vmem>>, vector<1x8x128xf32>,
    } else {
    }
    return
  }
  func.func @transform_0(%arg0: i32) -> (i32, i32) {
    %c0_i32 = arith.constant 0 : i32
    %c0_i32_0 = arith.constant 0 : i32
    return %arg0, %c0_i32 : i32, i32
  }
  func.func @transform_1(%arg0: i32) -> (i32, i32) {
    %c0_i32 = arith.constant 0 : i32
    %c0_i32_0 = arith.constant 0 : i32
    %c0_i32_1 = arith.constant 0 : i32
    return %c0_i32, %c0_i32_0 : i32, i32
  }
  func.func @transform_2(%arg0: i32) -> (i32, i32) {
    %c0_i32 = arith.constant 0 : i32
    %c0_i32_0 = arith.constant 0 : i32
    %c0_i32_1 = arith.constant 0 : i32
    return %c0_i32, %c0_i32_0 : i32, i32
  }
  func.func @transform_3(%arg0: i32) -> (i32, i32) {
    %c0_i32 = arith.constant 0 : i32
    %c0_i32_0 = arith.constant 0 : i32
    %c0_i32_1 = arith.constant 0 : i32
    return %c0_i32, %c0_i32_0 : i32, i32
  }
  func.func @transform_4(%arg0: i32) -> (i32, i32) {
    %c0_i32 = arith.constant 0 : i32
    %c0_i32_0 = arith.constant 0 : i32
    %c0_i32_1 = arith.constant 0 : i32
    return %c0_i32, %c0_i32_0 : i32, i32
  }
  func.func @transform_5(%arg0: i32) -> (i32, i32) {
    %c0_i32 = arith.constant 0 : i32
    %c0_i32_0 = arith.constant 0 : i32
    %c0_i32_1 = arith.constant 0 : i32
    return %c0_i32, %c0_i32_0 : i32, i32
  }
  func.func @transform_6(%arg0: i32) -> (i32, i32, i32) {
    %c0_i32 = arith.constant 0 : i32
    %c0_i32_0 = arith.constant 0 : i32
    %c0_i32_1 = arith.constant 0 : i32
    %c0_i32_2 = arith.constant 0 : i32
    return %c0_i32, %c0_i32_0, %c0_i32_1 : i32, i32, i32
  }
  func.func @transform_7(%arg0: i32) -> (i32, i32, i32) {
    %c0_i32 = arith.constant 0 : i32
    %c0_i32_0 = arith.constant 0 : i32
    %c0_i32_1 = arith.constant 0 : i32
    %c0_i32_2 = arith.constant 0 : i32
    return %c0_i32, %c0_i32_0, %c0_i32_1 : i32, i32, i32
  }
}

</mosaic_0001>

<bundles_post_ra>
// kernel: encoder_forward.1
= control target key start
LH: loop header
LB: loop body
LE: loop exit
PB: predicated region body
PF: predicated region fallthrough
CT: control target
= control target key end

     0   :  { %13 = vsyncpa [#allocation5], 0  ;;  %s5066_s0 = inlined_call_operand.vmem [shape: bf16[64,128], index: 0, kind: input, shape index: {}]   ;;  %s5067_s1 = inlined_call_operand.vmem [shape: bf16[128,512], index: 1, kind: input, shape index: {}]   ;;  %s5068_s2 = inlined_call_operand.vmem [shape: f32[1,512], index: 2, kind: input, shape index: {}]   ;;  %s5069_s3 = inlined_call_operand.vmem [shape: bf16[128,512], index: 3, kind: input, shape index: {}]   ;;  %s5070_s4 = inlined_call_operand.vmem [shape: bf16[256,512], index: 4, kind: input, shape index: {}]   ;;  %s5071_s5 = inlined_call_operand.vmem [shape: f32[1,512], index: 5, kind: input, shape index: {}]   ;;  %s5072_s6 = inlined_call_operand.hbm [shape: f32[2,8,128], index: 6, kind: output, shape index: {0}]   ;;  %s5073_s7 = inlined_call_operand.hbm [shape: f32[2,8,128], index: 7, kind: output, shape index: {1}]  }
   0x1   :  { %14 = vsyncpa [#allocation7], 0  ;;  %s3409_s24 = smov 0  }
   0x2 LB: > { %s3415_s25 = sadd.s32 4294967295, %s3362_s24   ;;  %p2454_p0 = scmp.ge.s32.totalorder %s3362_s24, 1  ;;  %s3362_s24 = sphi %s3409_s24, %s20_s24  }
   0x3   : > { %p233_p1 = scmp.lt.s32.totalorder %s3362_s24, 3 }
   0x5   : > { %p234_p2 = pnand %p2454_p0, %p233_p1 }
   0x7   : > { %237 = sbr.rel (%p234_p2) target bundleno = 1074 (0x432), region = 44 }
   0xc   : > { %s2455_s26 = sshll.u32 %s3415_s25, 2  ;;  %p2457_p4 = scmp.ne.s32.totalorder %s3415_s25, 0 }
   0xd   : > { %p261_p3 = scmp.lt.s32.totalorder %s2455_s26, 7 }
   0xe   : > { %269 = sbr.rel (%p2457_p4) target bundleno = 24 (0x18), region = 48 }
   0xf   : > { %s5569_s26 = smov (!%p261_p3, %s2455_s26), 7 }
  0x10   : > { %s2456_s27 = sshll.u32 %s5569_s26, 2 }
  0x11   : > { %s3423_s30 = scalar_lea.vmem %s5066_s0, %s2456_s27 }
  0x13   : > { %v3364_v0 = vmov 0.0  }
  0x14   : > { %270 = vst [vmem:[#allocation3 + $0x10] sm:$0xff] %v3364_v0 }
  0x15   : > { %271 = vst [vmem:[#allocation3] sm:$0xff] %v3364_v0 }
  0x16   : > { %272 = vst [vmem:[#allocation3 + $0x18] sm:$0xff] %v3364_v0 }
  0x17   : > { %273 = vst [vmem:[#allocation3 + $0x8] sm:$0xff] %v3364_v0 }
  0x18 PF: > { %v2580_v1 = vld [vmem:[%s5067_s1 + $0xe0] sm:$0xf]  ;;  %v3041_v2 = vld [vmem:[%s5067_s1 + $0xec] sm:$0xf0]  ;;  %v3039_v3 = vld [vmem:[%s5067_s1 + $0xe4] sm:$0xf] }
  0x19   : > { %v2581_v4 = vor.u32 %v3041_v2, %v2580_v1  ;;  %v2582_v5 = vld [vmem:[%s5067_s1 + $0xf0] sm:$0xf0]  ;;  %v2588_v6 = vld [vmem:[%s5067_s1 + $0xe8] sm:$0xf]  ;;  %v3042_v7 = vld [vmem:[%s5067_s1 + $0xf4] sm:$0xf0] }
  0x1a   : > { %v2585_v8 = vor.u32 %v3039_v3, %v2582_v5  ;;  %v2589_v9 = vor.u32 %v3042_v7, %v2588_v6  ;;  %v3040_v10 = vld [vmem:[%s5067_s1 + $0xec] sm:$0xf]  ;;  %v2590_v11 = vld [vmem:[%s5067_s1 + $0xf8] sm:$0xf0]  ;;  %v2564_v12 = vld [vmem:[%s5067_s1 + $0xc0] sm:$0xf] }
  0x1b   : > { %492 = vmatpush.bf16.msra.mxu0 %v2581_v4  ;;  %v2593_v13 = vor.u32 %v3040_v10, %v2590_v11  ;;  %v3037_v14 = vld [vmem:[%s5067_s1 + $0xcc] sm:$0xf0]  ;;  %v3035_v15 = vld [vmem:[%s5067_s1 + $0xc4] sm:$0xf]  ;;  %v2566_v16 = vld [vmem:[%s5067_s1 + $0xd0] sm:$0xf0] }
  0x1c   : > { %511 = vmatpush.bf16.msra.mxu1 %v2585_v8  ;;  %530 = vmatpush.bf16.msra.mxu2 %v2589_v9  ;;  %v2565_v17 = vor.u32 %v3037_v14, %v2564_v12  ;;  %v2569_v18 = vor.u32 %v3035_v15, %v2566_v16  ;;  %v2572_v19 = vld [vmem:[%s5067_s1 + $0xc8] sm:$0xf]  ;;  %v3038_v20 = vld [vmem:[%s5067_s1 + $0xd4] sm:$0xf0]  ;;  %v3036_v21 = vld [vmem:[%s5067_s1 + $0xcc] sm:$0xf] }
  0x1d   : > { %549 = vmatpush.bf16.msra.mxu3 %v2593_v13  ;;  %v2573_v22 = vor.u32 %v3038_v20, %v2572_v19  ;;  %v2574_v23 = vld [vmem:[%s5067_s1 + $0xd8] sm:$0xf0]  ;;  %v2548_v24 = vld [vmem:[%s5067_s1 + $0xa0] sm:$0xf]  ;;  %v3033_v25 = vld [vmem:[%s5067_s1 + $0xac] sm:$0xf0] }
  0x1e   : > { %v2577_v26 = vor.u32 %v3036_v21, %v2574_v23  ;;  %v3031_v27 = vld [vmem:[%s5067_s1 + $0xa4] sm:$0xf]  ;;  %v2550_v28 = vld [vmem:[%s5067_s1 + $0xb0] sm:$0xf0]  ;;  %v2556_v29 = vld [vmem:[%s5067_s1 + $0xa8] sm:$0xf]  ;;  %v2549_v30 = vor.u32 %v3033_v25, %v2548_v24 }
  0x1f   : > { %493 = vmatpush.bf16.msra.mxu0 %v2565_v17  ;;  %v3034_v31 = vld [vmem:[%s5067_s1 + $0xb4] sm:$0xf0]  ;;  %v3032_v32 = vld [vmem:[%s5067_s1 + $0xac] sm:$0xf]  ;;  %v2558_v33 = vld [vmem:[%s5067_s1 + $0xb8] sm:$0xf0]  ;;  %v2553_v34 = vor.u32 %v3031_v27, %v2550_v28 }
  0x20   : > { %512 = vmatpush.bf16.msra.mxu1 %v2569_v18  ;;  %531 = vmatpush.bf16.msra.mxu2 %v2573_v22  ;;  %v2557_v35 = vor.u32 %v3034_v31, %v2556_v29  ;;  %v2532_v36 = vld [vmem:[%s5067_s1 + $0x80] sm:$0xf]  ;;  %v3029_v37 = vld [vmem:[%s5067_s1 + $0x8c] sm:$0xf0]  ;;  %v3027_v38 = vld [vmem:[%s5067_s1 + $0x84] sm:$0xf]  ;;  %v2561_v39 = vor.u32 %v3032_v32, %v2558_v33 }
  0x21   : > { %550 = vmatpush.bf16.msra.mxu3 %v2577_v26  ;;  %v2534_v40 = vld [vmem:[%s5067_s1 + $0x90] sm:$0xf0]  ;;  %v2540_v41 = vld [vmem:[%s5067_s1 + $0x88] sm:$0xf]  ;;  %v3030_v42 = vld [vmem:[%s5067_s1 + $0x94] sm:$0xf0]  ;;  %v2533_v45 = vor.u32 %v3029_v37, %v2532_v36 }
  0x22   : > { %v3028_v43 = vld [vmem:[%s5067_s1 + $0x8c] sm:$0xf]  ;;  %v2542_v44 = vld [vmem:[%s5067_s1 + $0x98] sm:$0xf0]  ;;  %v2537_v46 = vor.u32 %v3027_v38, %v2534_v40  ;;  %v2541_v47 = vor.u32 %v3030_v42, %v2540_v41  ;;  %v2516_v48 = vld [vmem:[%s5067_s1 + $0x60] sm:$0xf] }
  0x23   : > { %494 = vmatpush.bf16.msra.mxu0 %v2549_v30  ;;  %v3025_v49 = vld [vmem:[%s5067_s1 + $0x6c] sm:$0xf0]  ;;  %v3023_v50 = vld [vmem:[%s5067_s1 + $0x64] sm:$0xf]  ;;  %v2545_v51 = vor.u32 %v3028_v43, %v2542_v44  ;;  %v2518_v52 = vld [vmem:[%s5067_s1 + $0x70] sm:$0xf0] }
  0x24   : > { %513 = vmatpush.bf16.msra.mxu1 %v2553_v34  ;;  %532 = vmatpush.bf16.msra.mxu2 %v2557_v35  ;;  %v2524_v53 = vld [vmem:[%s5067_s1 + $0x68] sm:$0xf]  ;;  %v3026_v54 = vld [vmem:[%s5067_s1 + $0x74] sm:$0xf0]  ;;  %v3024_v55 = vld [vmem:[%s5067_s1 + $0x6c] sm:$0xf]  ;;  %v2517_v57 = vor.u32 %v3025_v49, %v2516_v48  ;;  %v2521_v58 = vor.u32 %v3023_v50, %v2518_v52 }
  0x25   : > { %551 = vmatpush.bf16.msra.mxu3 %v2561_v39  ;;  %v2526_v56 = vld [vmem:[%s5067_s1 + $0x78] sm:$0xf0]  ;;  %v2525_v59 = vor.u32 %v3026_v54, %v2524_v53  ;;  %v2500_v60 = vld [vmem:[%s5067_s1 + $0x40] sm:$0xf]  ;;  %v3021_v61 = vld [vmem:[%s5067_s1 + $0x4c] sm:$0xf0] }
  0x26   : > { %v3019_v62 = vld [vmem:[%s5067_s1 + $0x44] sm:$0xf]  ;;  %v2529_v63 = vor.u32 %v3024_v55, %v2526_v56  ;;  %v2502_v0 = vld [vmem:[%s5067_s1 + $0x50] sm:$0xf0]  ;;  %v2508_v1 = vld [vmem:[%s5067_s1 + $0x48] sm:$0xf]  ;;  %v2501_v5 = vor.u32 %v3021_v61, %v2500_v60 }
  0x27   : > { %495 = vmatpush.bf16.msra.mxu0 %v2533_v45  ;;  %v3022_v2 = vld [vmem:[%s5067_s1 + $0x54] sm:$0xf0]  ;;  %v3020_v3 = vld [vmem:[%s5067_s1 + $0x4c] sm:$0xf]  ;;  %v2510_v4 = vld [vmem:[%s5067_s1 + $0x58] sm:$0xf0]  ;;  %v2505_v6 = vor.u32 %v3019_v62, %v2502_v0 }
  0x28   : > { %514 = vmatpush.bf16.msra.mxu1 %v2537_v46  ;;  %533 = vmatpush.bf16.msra.mxu2 %v2541_v47  ;;  %v2509_v7 = vor.u32 %v3022_v2, %v2508_v1  ;;  %v2484_v8 = vld [vmem:[%s5067_s1 + $0x20] sm:$0xf]  ;;  %v3017_v9 = vld [vmem:[%s5067_s1 + $0x2c] sm:$0xf0]  ;;  %v3015_v10 = vld [vmem:[%s5067_s1 + $0x24] sm:$0xf]  ;;  %v2513_v11 = vor.u32 %v3020_v3, %v2510_v4 }
  0x29   : > { %552 = vmatpush.bf16.msra.mxu3 %v2545_v51  ;;  %v2486_v12 = vld [vmem:[%s5067_s1 + $0x30] sm:$0xf0]  ;;  %v2492_v13 = vld [vmem:[%s5067_s1 + $0x28] sm:$0xf]  ;;  %v3018_v14 = vld [vmem:[%s5067_s1 + $0x34] sm:$0xf0]  ;;  %v2485_v17 = vor.u32 %v3017_v9, %v2484_v8 }
  0x2a   : > { %v3016_v15 = vld [vmem:[%s5067_s1 + $0x2c] sm:$0xf]  ;;  %v2494_v16 = vld [vmem:[%s5067_s1 + $0x38] sm:$0xf0]  ;;  %v2468_v18 = vld [vmem:[%s5067_s1] sm:$0xf]  ;;  %v2489_v19 = vor.u32 %v3015_v10, %v2486_v12  ;;  %v2493_v20 = vor.u32 %v3018_v14, %v2492_v13 }
  0x2b   : > { %496 = vmatpush.bf16.msra.mxu0 %v2517_v57  ;;  %v3013_v21 = vld [vmem:[%s5067_s1 + $0xc] sm:$0xf0]  ;;  %v3011_v22 = vld [vmem:[%s5067_s1 + $0x4] sm:$0xf]  ;;  %v2470_v23 = vld [vmem:[%s5067_s1 + $0x10] sm:$0xf0]  ;;  %v2497_v24 = vor.u32 %v3016_v15, %v2494_v16 }
  0x2c   : > { %515 = vmatpush.bf16.msra.mxu1 %v2521_v58  ;;  %534 = vmatpush.bf16.msra.mxu2 %v2525_v59  ;;  %v2476_v25 = vld [vmem:[%s5067_s1 + $0x8] sm:$0xf]  ;;  %v3014_v26 = vld [vmem:[%s5067_s1 + $0x14] sm:$0xf0]  ;;  %v3012_v27 = vld [vmem:[%s5067_s1 + $0xc] sm:$0xf]  ;;  %v2469_v31 = vor.u32 %v3013_v21, %v2468_v18  ;;  %v2473_v34 = vor.u32 %v3011_v22, %v2470_v23 }
  0x2d   : > { %553 = vmatpush.bf16.msra.mxu3 %v2529_v63  ;;  %v2478_v28 = vld [vmem:[%s5067_s1 + $0x18] sm:$0xf0]  ;;  %v2708_v29 = vld [vmem:[%s5069_s3 + $0xe0] sm:$0xf]  ;;  %v3073_v30 = vld [vmem:[%s5069_s3 + $0xec] sm:$0xf0]  ;;  %v2477_v35 = vor.u32 %v3014_v26, %v2476_v25 }
  0x2e   : > { %v3071_v32 = vld [vmem:[%s5069_s3 + $0xe4] sm:$0xf]  ;;  %v2710_v33 = vld [vmem:[%s5069_s3 + $0xf0] sm:$0xf0]  ;;  %v2481_v37 = vor.u32 %v3012_v27, %v2478_v28  ;;  %v3631_v38 = vor.u32 %v3073_v30, %v2708_v29  ;;  %v2716_v39 = vld [vmem:[%s5069_s3 + $0xe8] sm:$0xf] }
  0x2f   : > { %497 = vmatpush.bf16.msra.mxu0 %v2501_v5  ;;  %v3009_v36 = vld [vmem:[%s3423_s30] sm:$0xff]  ;;  %v3074_v40 = vld [vmem:[%s5069_s3 + $0xf4] sm:$0xf0]  ;;  %v3072_v41 = vld [vmem:[%s5069_s3 + $0xec] sm:$0xf]  ;;  %v3642_v42 = vor.u32 %v3071_v32, %v2710_v33  ;;  %p3002_p5 = scmp.ne.s32.totalorder %s3415_s25, 1 }
  0x30   : > { %516 = vmatpush.bf16.msra.mxu1 %v2505_v6  ;;  %535 = vmatpush.bf16.msra.mxu2 %v2509_v7  ;;  %v2718_v43 = vld [vmem:[%s5069_s3 + $0xf8] sm:$0xf0]  ;;  %v2692_v44 = vld [vmem:[%s5069_s3 + $0xc0] sm:$0xf]  ;;  %v3069_v45 = vld [vmem:[%s5069_s3 + $0xcc] sm:$0xf0]  ;;  %v3659_v48 = vor.u32 %v3074_v40, %v2716_v39 }
  0x31   : > { %554 = vmatpush.bf16.msra.mxu3 %v2513_v11  ;;  %5268 = vst [vmem:[#allocation10_spill] sm:$0xff] %v3642_v42  ;;  %v3067_v46 = vld [vmem:[%s5069_s3 + $0xc4] sm:$0xf]  ;;  %v2694_v47 = vld [vmem:[%s5069_s3 + $0xd0] sm:$0xf0]  ;;  %v3662_v49 = vor.u32 %v3072_v41, %v2718_v43  ;;  %v3664_v50 = vor.u32 %v3069_v45, %v2692_v44  ;;  %v3010_v21 = vld [vmem:[%s3423_s30 + $0x8] sm:$0xff] }
  0x32   : > { %v2700_v51 = vld [vmem:[%s5069_s3 + $0xc8] sm:$0xf]  ;;  %v3070_v52 = vld [vmem:[%s5069_s3 + $0xd4] sm:$0xf0]  ;;  %v3068_v53 = vld [vmem:[%s5069_s3 + $0xcc] sm:$0xf]  ;;  %v3676_v54 = vor.u32 %v3067_v46, %v2694_v47 }
  0x33   : > { %498 = vmatpush.bf16.msra.mxu0 %v2485_v17  ;;  %5269 = vst [vmem:[#allocation11_spill] sm:$0xff] %v3662_v49  ;;  %v2702_v55 = vld [vmem:[%s5069_s3 + $0xd8] sm:$0xf0]  ;;  %v2676_v56 = vld [vmem:[%s5069_s3 + $0xa0] sm:$0xf]  ;;  %v3694_v60 = vor.u32 %v3070_v52, %v2700_v51 }
  0x34   : > { %517 = vmatpush.bf16.msra.mxu1 %v2489_v19  ;;  %536 = vmatpush.bf16.msra.mxu2 %v2493_v20  ;;  %5270 = vst [vmem:[#allocation12_spill] sm:$0xff] %v3676_v54  ;;  %v3065_v57 = vld [vmem:[%s5069_s3 + $0xac] sm:$0xf0]  ;;  %v3063_v58 = vld [vmem:[%s5069_s3 + $0xa4] sm:$0xf]  ;;  %v3698_v61 = vor.u32 %v3068_v53, %v2702_v55 }
  0x35   : > { %555 = vmatpush.bf16.msra.mxu3 %v2497_v24  ;;  %v2678_v59 = vld [vmem:[%s5069_s3 + $0xb0] sm:$0xf0]  ;;  %v3700_v62 = vor.u32 %v3065_v57, %v2676_v56  ;;  %v2684_v63 = vld [vmem:[%s5069_s3 + $0xa8] sm:$0xf]  ;;  %v3066_v0 = vld [vmem:[%s5069_s3 + $0xb4] sm:$0xf0] }
  0x36   : > { %5271 = vst [vmem:[#allocation13_spill] sm:$0xff] %v3698_v61  ;;  %v3064_v1 = vld [vmem:[%s5069_s3 + $0xac] sm:$0xf]  ;;  %v3712_v2 = vor.u32 %v3063_v58, %v2678_v59  ;;  %v2686_v3 = vld [vmem:[%s5069_s3 + $0xb8] sm:$0xf0]  ;;  %v3730_v8 = vor.u32 %v3066_v0, %v2684_v63 }
  0x37   : > { %499 = vmatpush.bf16.msra.mxu0 %v2469_v31  ;;  %v2660_v4 = vld [vmem:[%s5069_s3 + $0x80] sm:$0xf]  ;;  %v3061_v5 = vld [vmem:[%s5069_s3 + $0x8c] sm:$0xf0]  ;;  %v3059_v6 = vld [vmem:[%s5069_s3 + $0x84] sm:$0xf]  ;;  %v3734_v9 = vor.u32 %v3064_v1, %v2686_v3 }
  0x38   : > { %518 = vmatpush.bf16.msra.mxu1 %v2473_v34  ;;  %537 = vmatpush.bf16.msra.mxu2 %v2477_v35  ;;  %5272 = vst [vmem:[#allocation14_spill] sm:$0xff] %v3712_v2  ;;  %v2662_v7 = vld [vmem:[%s5069_s3 + $0x90] sm:$0xf0]  ;;  %v3736_v10 = vor.u32 %v3061_v5, %v2660_v4  ;;  %v2668_v11 = vld [vmem:[%s5069_s3 + $0x88] sm:$0xf] }
  0x39   : > { %556 = vmatpush.bf16.msra.mxu3 %v2481_v37  ;;  %5273 = vst [vmem:[#allocation15_spill] sm:$0xff] %v3734_v9  ;;  %v3062_v12 = vld [vmem:[%s5069_s3 + $0x94] sm:$0xf0]  ;;  %v3060_v13 = vld [vmem:[%s5069_s3 + $0x8c] sm:$0xf]  ;;  %v3748_v14 = vor.u32 %v3059_v6, %v2662_v7 }
  0x3a   : > { %500 = vmatmul.bf16.vlgmr.msra.gmra.mxu0 %v3009_v36  ;;  %5274 = vst [vmem:[#allocation16_spill] sm:$0xff] %v3736_v10  ;;  %v2670_v15 = vld [vmem:[%s5069_s3 + $0x98] sm:$0xf0]  ;;  %v2644_v16 = vld [vmem:[%s5069_s3 + $0x60] sm:$0xf]  ;;  %v3766_v20 = vor.u32 %v3062_v12, %v2668_v11 }
  0x3b   : > { %801 = vmatpush.bf16.msrb.mxu0 %v3631_v38  ;;  %519 = vmatmul.bf16.vlgmr.msra.gmra.mxu1 %v3009_v36  ;;  %5275 = vst [vmem:[#allocation17_spill] sm:$0xff] %v3748_v14  ;;  %v3057_v17 = vld [vmem:[%s5069_s3 + $0x6c] sm:$0xf0]  ;;  %v3055_v18 = vld [vmem:[%s5069_s3 + $0x64] sm:$0xf]  ;;  %v3771_v22 = vor.u32 %v3060_v13, %v2670_v15 }
  0x3c   : > { %814 = vmatpush.bf16.msrb.mxu1 %v3642_v42  ;;  %538 = vmatmul.bf16.vlgmr.msra.gmra.mxu2 %v3009_v36  ;;  %v2646_v19 = vld [vmem:[%s5069_s3 + $0x70] sm:$0xf0]  ;;  %5276 = vst [vmem:[#allocation18_spill] sm:$0xff] %v3766_v20  ;;  %v3773_v23 = vor.u32 %v3057_v17, %v2644_v16  ;;  %v2652_v24 = vld [vmem:[%s5069_s3 + $0x68] sm:$0xf] }
  0x3d   : > { %557 = vmatmul.bf16.vlgmr.msra.gmra.mxu3 %v3009_v36  ;;  %827 = vmatpush.bf16.msrb.mxu2 %v3659_v48  ;;  %5277 = vst [vmem:[#allocation19_spill] sm:$0xff] %v3771_v22  ;;  %v3058_v25 = vld [vmem:[%s5069_s3 + $0x74] sm:$0xf0]  ;;  %v3056_v26 = vld [vmem:[%s5069_s3 + $0x6c] sm:$0xf]  ;;  %v3785_v27 = vor.u32 %v3055_v18, %v2646_v19  ;;  %v594_v17 = vld [vmem:[#allocation3 + $0x10] sm:$0xff] }
  0x3e   : > { %840 = vmatpush.bf16.msrb.mxu3 %v3662_v49  ;;  %5278 = vst [vmem:[#allocation20_spill] sm:$0xff] %v3773_v23  ;;  %v2654_v28 = vld [vmem:[%s5069_s3 + $0x78] sm:$0xf0]  ;;  %v2628_v29 = vld [vmem:[%s5069_s3 + $0x40] sm:$0xf]  ;;  %v3803_v33 = vor.u32 %v3058_v25, %v2652_v24 }
  0x3f   : > { %802 = vmatpush.bf16.msrb.mxu0 %v3664_v50  ;;  %5279 = vst [vmem:[#allocation21_spill] sm:$0xff] %v3785_v27  ;;  %v3053_v30 = vld [vmem:[%s5069_s3 + $0x4c] sm:$0xf0]  ;;  %v3051_v31 = vld [vmem:[%s5069_s3 + $0x44] sm:$0xf]  ;;  %v3807_v34 = vor.u32 %v3056_v26, %v2654_v28 }
  0x40   : > { %815 = vmatpush.bf16.msrb.mxu1 %v3676_v54  ;;  %v2630_v32 = vld [vmem:[%s5069_s3 + $0x50] sm:$0xf0]  ;;  %5280 = vst [vmem:[#allocation22_spill] sm:$0xff] %v3803_v33  ;;  %v3809_v35 = vor.u32 %v3053_v30, %v2628_v29  ;;  %v2636_v36 = vld [vmem:[%s5069_s3 + $0x48] sm:$0xf]  ;;  %v608_v29 = vpack.c.bf16 %v594_v17, %v594_v17 }
  0x41   : > { %828 = vmatpush.bf16.msrb.mxu2 %v3694_v60  ;;  %5281 = vst [vmem:[#allocation23_spill] sm:$0xff] %v3807_v34  ;;  %v3054_v37 = vld [vmem:[%s5069_s3 + $0x54] sm:$0xf0]  ;;  %v3052_v39 = vld [vmem:[%s5069_s3 + $0x4c] sm:$0xf]  ;;  %v3821_v40 = vor.u32 %v3051_v31, %v2630_v32 }
  0x42   : > { %841 = vmatpush.bf16.msrb.mxu3 %v3698_v61  ;;  %5282 = vst [vmem:[#allocation24_spill] sm:$0xff] %v3809_v35  ;;  %v2638_v41 = vld [vmem:[%s5069_s3 + $0x58] sm:$0xf0]  ;;  %v2612_v43 = vld [vmem:[%s5069_s3 + $0x20] sm:$0xf]  ;;  %v3839_v47 = vor.u32 %v3054_v37, %v2636_v36 }
  0x43   : > { %803 = vmatpush.bf16.msrb.mxu0 %v3700_v62  ;;  %5283 = vst [vmem:[#allocation25_spill] sm:$0xff] %v3821_v40  ;;  %v3049_v44 = vld [vmem:[%s5069_s3 + $0x2c] sm:$0xf0]  ;;  %v3047_v45 = vld [vmem:[%s5069_s3 + $0x24] sm:$0xf]  ;;  %v3843_v51 = vor.u32 %v3052_v39, %v2638_v41 }
  0x44   : > { %816 = vmatpush.bf16.msrb.mxu1 %v3712_v2  ;;  %v2614_v46 = vld [vmem:[%s5069_s3 + $0x30] sm:$0xf0]  ;;  %5284 = vst [vmem:[#allocation26_spill] sm:$0xff] %v3839_v47  ;;  %v3845_v52 = vor.u32 %v3049_v44, %v2612_v43  ;;  %v2620_v53 = vld [vmem:[%s5069_s3 + $0x28] sm:$0xf] }
  0x45   : > { %829 = vmatpush.bf16.msrb.mxu2 %v3730_v8  ;;  %5285 = vst [vmem:[#allocation27_spill] sm:$0xff] %v3843_v51  ;;  %v3050_v55 = vld [vmem:[%s5069_s3 + $0x34] sm:$0xf0]  ;;  %v3048_v56 = vld [vmem:[%s5069_s3 + $0x2c] sm:$0xf]  ;;  %v3857_v57 = vor.u32 %v3047_v45, %v2614_v46 }
  0x46   : > { %842 = vmatpush.bf16.msrb.mxu3 %v3734_v9  ;;  %5286 = vst [vmem:[#allocation28_spill] sm:$0xff] %v3845_v52  ;;  %v2622_v58 = vld [vmem:[%s5069_s3 + $0x38] sm:$0xf0]  ;;  %v2596_v59 = vld [vmem:[%s5069_s3] sm:$0xf]  ;;  %v3875_v3 = vor.u32 %v3050_v55, %v2620_v53 }
  0x47   : > { %804 = vmatpush.bf16.msrb.mxu0 %v3736_v10  ;;  %5287 = vst [vmem:[#allocation29_spill] sm:$0xff] %v3857_v57  ;;  %v3045_v63 = vld [vmem:[%s5069_s3 + $0xc] sm:$0xf0]  ;;  %v3043_v0 = vld [vmem:[%s5069_s3 + $0x4] sm:$0xf]  ;;  %v3885_v6 = vor.u32 %v3048_v56, %v2622_v58 }
  0x48   : > { %817 = vmatpush.bf16.msrb.mxu1 %v3748_v14  ;;  %v2598_v1 = vld [vmem:[%s5069_s3 + $0x10] sm:$0xf0]  ;;  %5288 = vst [vmem:[#allocation30_spill] sm:$0xff] %v3875_v3  ;;  %v2967_v4 = vld [vmem:[%s5070_s4 + $0x1e0] sm:$0xf]  ;;  %v3887_v7 = vor.u32 %v3045_v63, %v2596_v59 }
  0x49   : > { %830 = vmatpush.bf16.msrb.mxu2 %v3766_v20  ;;  %v3137_v5 = vld [vmem:[%s5070_s4 + $0x1ec] sm:$0xf0]  ;;  %5289 = vst [vmem:[#allocation31_spill] sm:$0xff] %v3885_v6  ;;  %v2604_v11 = vld [vmem:[%s5069_s3 + $0x8] sm:$0xf]  ;;  %v3896_v13 = vor.u32 %v3043_v0, %v2598_v1 }
  0x4a   : > { %843 = vmatpush.bf16.msrb.mxu3 %v3771_v22  ;;  %505 = vmatmul.bf16.gmra.mxu0 %v3010_v21  ;;  %5290 = vst [vmem:[#allocation32_spill] sm:$0xff] %v3887_v7  ;;  %v3046_v12 = vld [vmem:[%s5069_s3 + $0x14] sm:$0xf0]  ;;  %v3044_v15 = vld [vmem:[%s5069_s3 + $0xc] sm:$0xf]  ;;  %v3904_v18 = vor.u32 %v3137_v5, %v2967_v4 }
  0x4b   : > { %805 = vmatpush.bf16.msrb.mxu0 %v3773_v23  ;;  %524 = vmatmul.bf16.gmra.mxu1 %v3010_v21  ;;  %5291 = vst [vmem:[#allocation33_spill] sm:$0xff] %v3896_v13  ;;  %v2606_v16 = vld [vmem:[%s5069_s3 + $0x18] sm:$0xf0]  ;;  %v3135_v19 = vld [vmem:[%s5070_s4 + $0x1e4] sm:$0xf]  ;;  %v3913_v24 = vor.u32 %v3046_v12, %v2604_v11 }
  0x4c   : > { %818 = vmatpush.bf16.msrb.mxu1 %v3785_v27  ;;  %543 = vmatmul.bf16.gmra.mxu2 %v3010_v21  ;;  %5292 = vst [vmem:[#allocation34_spill] sm:$0xff] %v3904_v18  ;;  %v3917_v25 = vor.u32 %v3044_v15, %v2606_v16  ;;  %v2951_v26 = vld [vmem:[%s5070_s4 + $0x1c0] sm:$0xf]  ;;  %v3133_v28 = vld [vmem:[%s5070_s4 + $0x1cc] sm:$0xf0] }
  0x4d   : > { %562 = vmatmul.bf16.gmra.mxu3 %v3010_v21  ;;  %831 = vmatpush.bf16.msrb.mxu2 %v3803_v33  ;;  %v2969_v21 = vld [vmem:[%s5070_s4 + $0x1f0] sm:$0xf0]  ;;  %5293 = vst [vmem:[#allocation35_spill] sm:$0xff] %v3913_v24  ;;  %v3131_v31 = vld [vmem:[%s5070_s4 + $0x1c4] sm:$0xf]  ;;  %v3936_v36 = vor.u32 %v3133_v28, %v2951_v26 }
  0x4e   : > { %844 = vmatpush.bf16.msrb.mxu3 %v3807_v34  ;;  %5294 = vst [vmem:[#allocation36_spill] sm:$0xff] %v3917_v25  ;;  %v3926_v30 = vor.u32 %v3135_v19, %v2969_v21  ;;  %v2953_v32 = vld [vmem:[%s5070_s4 + $0x1d0] sm:$0xf0]  ;;  %v2935_v37 = vld [vmem:[%s5070_s4 + $0x1a0] sm:$0xf] }
  0x4f   : > { %806 = vmatpush.bf16.msrb.mxu0 %v3809_v35  ;;  %5296 = vst [vmem:[#allocation38_spill] sm:$0xff] %v3936_v36  ;;  %v3129_v39 = vld [vmem:[%s5070_s4 + $0x1ac] sm:$0xf0]  ;;  %v3946_v41 = vor.u32 %v3131_v31, %v2953_v32  ;;  %v3127_v43 = vld [vmem:[%s5070_s4 + $0x1a4] sm:$0xf] }
  0x50   : > { %819 = vmatpush.bf16.msrb.mxu1 %v3821_v40  ;;  %5295 = vst [vmem:[#allocation37_spill] sm:$0xff] %v3926_v30  ;;  %v2937_v44 = vld [vmem:[%s5070_s4 + $0x1b0] sm:$0xf0]  ;;  %v3955_v45 = vor.u32 %v3129_v39, %v2935_v37  ;;  %v2919_v53 = vld [vmem:[%s5070_s4 + $0x180] sm:$0xf] }
  0x51   : > { %832 = vmatpush.bf16.msrb.mxu2 %v3839_v47  ;;  %5297 = vst [vmem:[#allocation39_spill] sm:$0xff] %v3946_v41  ;;  %v3958_v46 = vor.u32 %v3127_v43, %v2937_v44  ;;  %v3125_v55 = vld [vmem:[%s5070_s4 + $0x18c] sm:$0xf0]  ;;  %v3123_v56 = vld [vmem:[%s5070_s4 + $0x184] sm:$0xf] }
  0x52   : > { %845 = vmatpush.bf16.msrb.mxu3 %v3843_v51  ;;  %5298 = vst [vmem:[#allocation40_spill] sm:$0xff] %v3955_v45  ;;  %v3971_v58 = vor.u32 %v3125_v55, %v2919_v53  ;;  %v2921_v59 = vld [vmem:[%s5070_s4 + $0x190] sm:$0xf0]  ;;  %v2903_v0 = vld [vmem:[%s5070_s4 + $0x160] sm:$0xf] }
  0x53   : > { %807 = vmatpush.bf16.msrb.mxu0 %v3845_v52  ;;  %5299 = vst [vmem:[#allocation41_spill] sm:$0xff] %v3958_v46  ;;  %v3976_v63 = vor.u32 %v3123_v56, %v2921_v59  ;;  %v3121_v1 = vld [vmem:[%s5070_s4 + $0x16c] sm:$0xf0]  ;;  %v3119_v4 = vld [vmem:[%s5070_s4 + $0x164] sm:$0xf] }
  0x54   : > { %820 = vmatpush.bf16.msrb.mxu1 %v3857_v57  ;;  %v3988_v5 = vor.u32 %v3121_v1, %v2903_v0  ;;  %v2905_v11 = vld [vmem:[%s5070_s4 + $0x170] sm:$0xf0]  ;;  %v2887_v15 = vld [vmem:[%s5070_s4 + $0x140] sm:$0xf]  ;;  %v3117_v16 = vld [vmem:[%s5070_s4 + $0x14c] sm:$0xf0] }
  0x55   : > { %833 = vmatpush.bf16.msrb.mxu2 %v3875_v3  ;;  %5300 = vst [vmem:[#allocation42_spill] sm:$0xff] %v3976_v63  ;;  %v3994_v12 = vor.u32 %v3119_v4, %v2905_v11  ;;  %v4004_v17 = vor.u32 %v3117_v16, %v2887_v15  ;;  %v3115_v19 = vld [vmem:[%s5070_s4 + $0x144] sm:$0xf]  ;;  %v2889_v21 = vld [vmem:[%s5070_s4 + $0x150] sm:$0xf0] }
  0x56   : > { %846 = vmatpush.bf16.msrb.mxu3 %v3885_v6  ;;  %5301 = vst [vmem:[#allocation43_spill] sm:$0xff] %v3988_v5  ;;  %v4012_v26 = vor.u32 %v3115_v19, %v2889_v21  ;;  %v2871_v28 = vld [vmem:[%s5070_s4 + $0x120] sm:$0xf]  ;;  %v3111_v31 = vld [vmem:[%s5070_s4 + $0x124] sm:$0xf] }
  0x57   : > { %808 = vmatpush.bf16.msrb.mxu0 %v3887_v7  ;;  %5302 = vst [vmem:[#allocation44_spill] sm:$0xff] %v3994_v12  ;;  %v2873_v37 = vld [vmem:[%s5070_s4 + $0x130] sm:$0xf0]  ;;  %v2855_v43 = vld [vmem:[%s5070_s4 + $0x100] sm:$0xf] }
  0x58   : > { %821 = vmatpush.bf16.msrb.mxu1 %v3896_v13  ;;  %5303 = vst [vmem:[#allocation45_spill] sm:$0xff] %v4004_v17  ;;  %v4030_v39 = vor.u32 %v3111_v31, %v2873_v37  ;;  %v3109_v44 = vld [vmem:[%s5070_s4 + $0x10c] sm:$0xf0]  ;;  %v3107_v53 = vld [vmem:[%s5070_s4 + $0x104] sm:$0xf] }
  0x59   : > { %834 = vmatpush.bf16.msrb.mxu2 %v3913_v24  ;;  %5304 = vst [vmem:[#allocation46_spill] sm:$0xff] %v4012_v26  ;;  %v4043_v55 = vor.u32 %v3109_v44, %v2855_v43  ;;  %v2857_v56 = vld [vmem:[%s5070_s4 + $0x110] sm:$0xf0]  ;;  %v2975_v59 = vld [vmem:[%s5070_s4 + $0x1e8] sm:$0xf] }
  0x5a   : > { %847 = vmatpush.bf16.msrb.mxu3 %v3917_v25  ;;  %809 = vmatmul.bf16.vlgmr.msrb.gmra.mxu0 %v608_v29  ;;  %5306 = vst [vmem:[#allocation48_spill] sm:$0xff] %v4030_v39  ;;  %v3138_v0 = vld [vmem:[%s5070_s4 + $0x1f4] sm:$0xf0]  ;;  %v4054_v1 = vor.u32 %v3107_v53, %v2857_v56  ;;  %v3136_v11 = vld [vmem:[%s5070_s4 + $0x1ec] sm:$0xf] }
  0x5b   : > { %822 = vmatmul.bf16.vlgmr.msrb.gmra.mxu1 %v608_v29  ;;  %5307 = vst [vmem:[#allocation49_spill] sm:$0xff] %v4043_v55  ;;  %v4056_v4 = vor.u32 %v3138_v0, %v2975_v59  ;;  %v2977_v15 = vld [vmem:[%s5070_s4 + $0x1f8] sm:$0xf0]  ;;  %v2839_v16 = vld [vmem:[%s5070_s4 + $0xe0] sm:$0xf] }
  0x5c   : > { %1319 = vmatpush.bf16.msra.mxu1 %v3904_v18  ;;  %835 = vmatmul.bf16.vlgmr.msrb.gmra.mxu2 %v608_v29  ;;  %5308 = vst [vmem:[#allocation50_spill] sm:$0xff] %v4054_v1  ;;  %v4068_v19 = vor.u32 %v3136_v11, %v2977_v15  ;;  %v3105_v21 = vld [vmem:[%s5070_s4 + $0xec] sm:$0xf0]  ;;  %v2959_v43 = vld [vmem:[%s5070_s4 + $0x1c8] sm:$0xf] }
  0x5d   : > { %848 = vmatmul.bf16.vlgmr.msrb.gmra.mxu3 %v608_v29  ;;  %v3113_v29 = vld [vmem:[%s5070_s4 + $0x12c] sm:$0xf0]  ;;  %5309 = vst [vmem:[#allocation51_spill] sm:$0xff] %v4056_v4  ;;  %v4081_v31 = vor.u32 %v3105_v21, %v2839_v16  ;;  %v3134_v44 = vld [vmem:[%s5070_s4 + $0x1d4] sm:$0xf0] }
  0x5e   : > { %1345 = vmatpush.bf16.msra.mxu3 %v3926_v30  ;;  %v4024_v32 = vor.u32 %v3113_v29, %v2871_v28  ;;  %5310 = vst [vmem:[#allocation52_spill] sm:$0xff] %v4068_v19  ;;  %v3103_v28 = vld [vmem:[%s5070_s4 + $0xe4] sm:$0xf]  ;;  %v2841_v29 = vld [vmem:[%s5070_s4 + $0xf0] sm:$0xf0]  ;;  %v4097_v56 = vor.u32 %v3134_v44, %v2959_v43 }
  0x5f   : > { %5311 = vst [vmem:[#allocation53_spill] sm:$0xff] %v4081_v31  ;;  %v4083_v37 = vor.u32 %v3103_v28, %v2841_v29  ;;  %v3132_v53 = vld [vmem:[%s5070_s4 + $0x1cc] sm:$0xf]  ;;  %1306 = vmatpush.bf16.msra.mxu0 %v4081_v31  ;;  %v2961_v59 = vld [vmem:[%s5070_s4 + $0x1d8] sm:$0xf0] }
  0x60   : > { %1320 = vmatpush.bf16.msra.mxu1 %v3936_v36  ;;  %5305 = vst [vmem:[#allocation47_spill] sm:$0xff] %v4024_v32  ;;  %v4102_v0 = vor.u32 %v3132_v53, %v2961_v59  ;;  %v2823_v11 = vld [vmem:[%s5070_s4 + $0xc0] sm:$0xf]  ;;  %v3101_v15 = vld [vmem:[%s5070_s4 + $0xcc] sm:$0xf0] }
  0x61   : > { %5312 = vst [vmem:[#allocation54_spill] sm:$0xff] %v4083_v37  ;;  %1332 = vmatpush.bf16.msra.mxu2 %v4083_v37  ;;  %v3099_v16 = vld [vmem:[%s5070_s4 + $0xc4] sm:$0xf]  ;;  %v4115_v21 = vor.u32 %v3101_v15, %v2823_v11  ;;  %v2825_v28 = vld [vmem:[%s5070_s4 + $0xd0] sm:$0xf0] }
  0x62   : > { %1346 = vmatpush.bf16.msra.mxu3 %v3946_v41  ;;  %5313 = vst [vmem:[#allocation55_spill] sm:$0xff] %v4097_v56  ;;  %v2943_v29 = vld [vmem:[%s5070_s4 + $0x1a8] sm:$0xf]  ;;  %v3130_v43 = vld [vmem:[%s5070_s4 + $0x1b4] sm:$0xf0]  ;;  %v4126_v44 = vor.u32 %v3099_v16, %v2825_v28 }
  0x63   : > { %5314 = vst [vmem:[#allocation56_spill] sm:$0xff] %v4102_v0  ;;  %v4128_v53 = vor.u32 %v3130_v43, %v2943_v29  ;;  %v3128_v59 = vld [vmem:[%s5070_s4 + $0x1ac] sm:$0xf]  ;;  %v2945_v11 = vld [vmem:[%s5070_s4 + $0x1b8] sm:$0xf0]  ;;  %1307 = vmatpush.bf16.msra.mxu0 %v4115_v21 }
  0x64   : > { %1321 = vmatpush.bf16.msra.mxu1 %v3955_v45  ;;  %5315 = vst [vmem:[#allocation57_spill] sm:$0xff] %v4115_v21  ;;  %v2807_v15 = vld [vmem:[%s5070_s4 + $0xa0] sm:$0xf]  ;;  %v4140_v37 = vor.u32 %v3128_v59, %v2945_v11  ;;  %v3097_v16 = vld [vmem:[%s5070_s4 + $0xac] sm:$0xf0] }
  0x65   : > { %5316 = vst [vmem:[#allocation58_spill] sm:$0xff] %v4126_v44  ;;  %v3095_v28 = vld [vmem:[%s5070_s4 + $0xa4] sm:$0xf]  ;;  %v2809_v29 = vld [vmem:[%s5070_s4 + $0xb0] sm:$0xf0]  ;;  %1333 = vmatpush.bf16.msra.mxu2 %v4126_v44  ;;  %v4153_v43 = vor.u32 %v3097_v16, %v2807_v15 }
  0x66   : > { %1347 = vmatpush.bf16.msra.mxu3 %v3958_v46  ;;  %5317 = vst [vmem:[#allocation59_spill] sm:$0xff] %v4128_v53  ;;  %v4155_v59 = vor.u32 %v3095_v28, %v2809_v29  ;;  %v2927_v11 = vld [vmem:[%s5070_s4 + $0x188] sm:$0xf]  ;;  %v3126_v21 = vld [vmem:[%s5070_s4 + $0x194] sm:$0xf0] }
  0x67   : > { %5318 = vst [vmem:[#allocation60_spill] sm:$0xff] %v4140_v37  ;;  %v3124_v44 = vld [vmem:[%s5070_s4 + $0x18c] sm:$0xf]  ;;  %v4167_v31 = vor.u32 %v3126_v21, %v2927_v11  ;;  %v2929_v15 = vld [vmem:[%s5070_s4 + $0x198] sm:$0xf0]  ;;  %1308 = vmatpush.bf16.msra.mxu0 %v4153_v43 }
  0x68   : > { %1322 = vmatpush.bf16.msra.mxu1 %v3971_v58  ;;  %5319 = vst [vmem:[#allocation61_spill] sm:$0xff] %v4153_v43  ;;  %v4173_v16 = vor.u32 %v3124_v44, %v2929_v15  ;;  %v2791_v29 = vld [vmem:[%s5070_s4 + $0x80] sm:$0xf]  ;;  %v3093_v21 = vld [vmem:[%s5070_s4 + $0x8c] sm:$0xf0] }
  0x69   : > { %5320 = vst [vmem:[#allocation62_spill] sm:$0xff] %v4155_v59  ;;  %1334 = vmatpush.bf16.msra.mxu2 %v4155_v59  ;;  %v3091_v11 = vld [vmem:[%s5070_s4 + $0x84] sm:$0xf]  ;;  %v4191_v15 = vor.u32 %v3093_v21, %v2791_v29  ;;  %v2793_v59 = vld [vmem:[%s5070_s4 + $0x90] sm:$0xf0] }
  0x6a   : > { %1348 = vmatpush.bf16.msra.mxu3 %v3976_v63  ;;  %5321 = vst [vmem:[#allocation63_spill] sm:$0xff] %v4167_v31  ;;  %v2911_v43 = vld [vmem:[%s5070_s4 + $0x168] sm:$0xf]  ;;  %v3122_v24 = vld [vmem:[%s5070_s4 + $0x174] sm:$0xf0]  ;;  %v4202_v7 = vor.u32 %v3091_v11, %v2793_v59 }
  0x6b   : > { %5322 = vst [vmem:[#allocation64_spill] sm:$0xff] %v4173_v16  ;;  %v4204_v3 = vor.u32 %v3122_v24, %v2911_v43  ;;  %v3120_v29 = vld [vmem:[%s5070_s4 + $0x16c] sm:$0xf]  ;;  %v2913_v21 = vld [vmem:[%s5070_s4 + $0x178] sm:$0xf0]  ;;  %1309 = vmatpush.bf16.msra.mxu0 %v4191_v15 }
  0x6c   : > { %1323 = vmatpush.bf16.msra.mxu1 %v3988_v5  ;;  %5323 = vst [vmem:[#allocation65_spill] sm:$0xff] %v4191_v15  ;;  %v4213_v52 = vor.u32 %v3120_v29, %v2913_v21  ;;  %v2775_v24 = vld [vmem:[%s5070_s4 + $0x60] sm:$0xf]  ;;  %v3089_v43 = vld [vmem:[%s5070_s4 + $0x6c] sm:$0xf0] }
  0x6d   : > { %5324 = vst [vmem:[#allocation66_spill] sm:$0xff] %v4202_v7  ;;  %1335 = vmatpush.bf16.msra.mxu2 %v4202_v7  ;;  %v3087_v59 = vld [vmem:[%s5070_s4 + $0x64] sm:$0xf]  ;;  %v4227_v11 = vor.u32 %v3089_v43, %v2775_v24  ;;  %v2777_v29 = vld [vmem:[%s5070_s4 + $0x70] sm:$0xf0] }
  0x6e   : > { %1349 = vmatpush.bf16.msra.mxu3 %v3994_v12  ;;  %5325 = vst [vmem:[#allocation67_spill] sm:$0xff] %v4204_v3  ;;  %v4232_v21 = vor.u32 %v3087_v59, %v2777_v29  ;;  %v2895_v7 = vld [vmem:[%s5070_s4 + $0x148] sm:$0xf]  ;;  %v3118_v15 = vld [vmem:[%s5070_s4 + $0x154] sm:$0xf0] }
  0x6f   : > { %5326 = vst [vmem:[#allocation68_spill] sm:$0xff] %v4213_v52  ;;  %v3116_v47 = vld [vmem:[%s5070_s4 + $0x14c] sm:$0xf]  ;;  %1310 = vmatpush.bf16.msra.mxu0 %v4227_v11  ;;  %v4246_v43 = vor.u32 %v3118_v15, %v2895_v7  ;;  %v2897_v59 = vld [vmem:[%s5070_s4 + $0x158] sm:$0xf0] }
  0x70   : > { %1324 = vmatpush.bf16.msra.mxu1 %v4004_v17  ;;  %5327 = vst [vmem:[#allocation69_spill] sm:$0xff] %v4227_v11  ;;  %v2759_v7 = vld [vmem:[%s5070_s4 + $0x40] sm:$0xf]  ;;  %v3085_v15 = vld [vmem:[%s5070_s4 + $0x4c] sm:$0xf0] }
  0x71   : > { %5328 = vst [vmem:[#allocation70_spill] sm:$0xff] %v4232_v21  ;;  %1336 = vmatpush.bf16.msra.mxu2 %v4232_v21  ;;  %v3114_v21 = vld [vmem:[%s5070_s4 + $0x134] sm:$0xf0]  ;;  %v310_v11 = vld [vmem:[%s5068_s2] sm:$0xf] }
  0x72   : > { %1350 = vmatpush.bf16.msra.mxu3 %v4012_v26  ;;  %5329 = vst [vmem:[#allocation71_spill] sm:$0xff] %v4246_v43 }
  0x74   : > { %1325 = vmatpush.bf16.msra.mxu1 %v4024_v32 }
  0x76   : > { %1351 = vmatpush.bf16.msra.mxu3 %v4030_v39 }
  0x78   : > { %1326 = vmatpush.bf16.msra.mxu1 %v4043_v55 }
  0x7a   : > { %1352 = vmatpush.bf16.msra.mxu3 %v4054_v1 }
  0x7c   : > { %1371 = vmatpush.bf16.msrb.mxu1 %v4056_v4 }
  0x7e   : > { %1397 = vmatpush.bf16.msrb.mxu3 %v4068_v19 }
  0x80   : > { %1372 = vmatpush.bf16.msrb.mxu1 %v4097_v56 }
  0x82   : > { %1398 = vmatpush.bf16.msrb.mxu3 %v4102_v0 }
  0x84   : > { %1373 = vmatpush.bf16.msrb.mxu1 %v4128_v53 }
  0x86   : > { %1399 = vmatpush.bf16.msrb.mxu3 %v4140_v37  ;;  %v2727_v37 = vld [vmem:[%s5070_s4] sm:$0xf] }
  0x88   : > { %1374 = vmatpush.bf16.msrb.mxu1 %v4167_v31  ;;  %v4335_v31 = vperm.slane %v310_v11, 1 }
  0x8a   : > { %1400 = vmatpush.bf16.msrb.mxu3 %v4173_v16  ;;  %5341 = vst [vmem:[#allocation83_spill] sm:$0xff] %v4335_v31 }
  0x8c   : > { %1375 = vmatpush.bf16.msrb.mxu1 %v4204_v3 }
  0x8e   : > { %1401 = vmatpush.bf16.msrb.mxu3 %v4213_v52  ;;  %v4256_v52 = vor.u32 %v3116_v47, %v2897_v59  ;;  %v4271_v47 = vor.u32 %v3085_v15, %v2759_v7  ;;  %v2761_v59 = vld [vmem:[%s5070_s4 + $0x50] sm:$0xf0]  ;;  %v3112_v15 = vld [vmem:[%s5070_s4 + $0x12c] sm:$0xf] }
  0x90   : > { %5331 = vst [vmem:[#allocation73_spill] sm:$0xff] %v4256_v52  ;;  %1376 = vmatpush.bf16.msrb.mxu1 %v4246_v43  ;;  %1311 = vmatpush.bf16.msra.mxu0 %v4271_v47 }
  0x91   : > { %5333 = vst [vmem:[#allocation75_spill] sm:$0xff] %v4271_v47  ;;  %v2863_v47 = vld [vmem:[%s5070_s4 + $0x108] sm:$0xf] }
  0x92   : > { %1402 = vmatpush.bf16.msrb.mxu3 %v4256_v52  ;;  %v2881_v52 = vld [vmem:[%s5070_s4 + $0x138] sm:$0xf0] }
  0x93   : > { %v4296_v33 = vor.u32 %v3112_v15, %v2881_v52  ;;  %v2745_v15 = vld [vmem:[%s5070_s4 + $0x30] sm:$0xf0] }
  0x95   : > { %5336 = vst [vmem:[#allocation78_spill] sm:$0xff] %v4296_v33 }
  0x96   : > { %1403 = vmatpush.bf16.msrb.mxu3 %v4296_v33  ;;  %v2865_v33 = vld [vmem:[%s5070_s4 + $0x118] sm:$0xf0] }
  0xb7   : > { %v4175_v28 = vpop.f32.mrf.mxu0 }
  0xb8   : > { %v4188_v44 = vpop.f32.mrf.mxu1 }
  0xbf   : > { %v4243_v24 = vpop.f32.mrf.mxu2  ;;  %v4253_v35 = vpop.f32.mrf.mxu0 }
  0xc0   : > { %v4251_v29 = vpop.f32.mrf.mxu3  ;;  %5330 = vst [vmem:[#allocation72_spill] sm:$0xff] %v4253_v35  ;;  %v4258_v3 = vpop.f32.mrf.mxu1  ;;  %v3083_v35 = vld [vmem:[%s5070_s4 + $0x44] sm:$0xf] }
  0xc1   : > { %5332 = vst [vmem:[#allocation74_spill] sm:$0xff] %v4258_v3  ;;  %v2879_v3 = vld [vmem:[%s5070_s4 + $0x128] sm:$0xf]  ;;  %v4285_v43 = vor.u32 %v3083_v35, %v2761_v59  ;;  %v2743_v35 = vld [vmem:[%s5070_s4 + $0x20] sm:$0xf]  ;;  %v4309_v59 = vperm.slane %v310_v11, 0 }
  0xc2   : > { %v4287_v7 = vor.u32 %v3114_v21, %v2879_v3  ;;  %v3081_v3 = vld [vmem:[%s5070_s4 + $0x2c] sm:$0xf0]  ;;  %v3079_v21 = vld [vmem:[%s5070_s4 + $0x24] sm:$0xf] }
  0xc3   : > { %5334 = vst [vmem:[#allocation76_spill] sm:$0xff] %v4285_v43  ;;  %1337 = vmatpush.bf16.msra.mxu2 %v4285_v43  ;;  %v4312_v52 = vor.u32 %v3081_v3, %v2743_v35  ;;  %v598_v43 = vld [vmem:[#allocation3 + $0x18] sm:$0xff]  ;;  %v4322_v23 = vor.u32 %v3079_v21, %v2745_v15  ;;  %v3108_v3 = vld [vmem:[%s5070_s4 + $0x10c] sm:$0xf] }
  0xc4   : > { %5335 = vst [vmem:[#allocation77_spill] sm:$0xff] %v4287_v7  ;;  %1377 = vmatpush.bf16.msrb.mxu1 %v4287_v7  ;;  %v4324_v16 = vpack.c.bf16 %v598_v43, %v598_v43  ;;  %v3110_v35 = vld [vmem:[%s5070_s4 + $0x114] sm:$0xf0]  ;;  %v4342_v15 = vor.u32 %v3108_v3, %v2865_v33  ;;  %v3075_v33 = vld [vmem:[%s5070_s4 + $0x4] sm:$0xf] }
  0xc5   : > { %5337 = vst [vmem:[#allocation79_spill] sm:$0xff] %v4309_v59  ;;  %1312 = vmatpush.bf16.msra.mxu0 %v4312_v52  ;;  %v4340_v43 = vor.u32 %v3110_v35, %v2863_v47  ;;  %v2729_v3 = vld [vmem:[%s5070_s4 + $0x10] sm:$0xf0] }
  0xc6   : > { %5338 = vst [vmem:[#allocation80_spill] sm:$0xff] %v4312_v52  ;;  %1327 = vmatmul.bf16.vlgmr.msra.gmra.mxu1 %v4324_v16  ;;  %1353 = vmatmul.bf16.vlgmr.msra.gmra.mxu3 %v4324_v16  ;;  %v4390_v52 = vperm.slane %v310_v11, 2 }
  0xc7   : > { %v4320_v7 = vpop.f32.mrf.mxu2  ;;  %5340 = vst [vmem:[#allocation82_spill] sm:$0xff] %v4322_v23  ;;  %v506_v21 = vpop.f32.mrf.mxu0  ;;  %1338 = vmatpush.bf16.msra.mxu2 %v4322_v23  ;;  %1404 = vmatpush.bf16.msrb.mxu3 %v4342_v15 }
  0xc8   : > { %5339 = vst [vmem:[#allocation81_spill] sm:$0xff] %v4320_v7  ;;  %v4337_v20 = vpop.f32.mrf.mxu3  ;;  %v4345_v7 = vadd.f32 %v506_v21, %v4309_v59  ;;  %v525_v10 = vpop.f32.mrf.mxu1  ;;  %1378 = vmatpush.bf16.msrb.mxu1 %v4340_v43  ;;  %v2847_v21 = vld [vmem:[%s5070_s4 + $0xe8] sm:$0xf] }
  0xc9   : > { %5342 = vst [vmem:[#allocation84_spill] sm:$0xff] %v4337_v20  ;;  %v3077_v20 = vld [vmem:[%s5070_s4 + $0xc] sm:$0xf0]  ;;  %v4359_v47 = vadd.f32 %v525_v10, %v4335_v31  ;;  %v4376_v10 = vor.u32 %v3075_v33, %v2729_v3  ;;  %v3102_v33 = vld [vmem:[%s5070_s4 + $0xd4] sm:$0xf0]  ;;  %v4404_v3 = vperm.slane %v310_v11, 3 }
  0xca   : > { %5343 = vst [vmem:[#allocation85_spill] sm:$0xff] %v4340_v43  ;;  %v4363_v35 = vor.u32 %v3077_v20, %v2727_v37  ;;  %v3104_v37 = vld [vmem:[%s5070_s4 + $0xec] sm:$0xf] }
  0xcb   : > { %5344 = vst [vmem:[#allocation86_spill] sm:$0xff] %v4342_v15  ;;  %1519 = vmatpush.bf16.msra.mxu3 %v3662_v49  ;;  %1339 = vmatpush.bf16.msra.mxu2 %v4376_v10  ;;  %v2833_v49 = vld [vmem:[%s5070_s4 + $0xd8] sm:$0xf0] }
  0xcc   : > { %5345 = vst [vmem:[#allocation87_spill] sm:$0xff] %v4345_v7  ;;  %v3106_v7 = vld [vmem:[%s5070_s4 + $0xf4] sm:$0xf0]  ;;  %1493 = vmatpush.bf16.msra.mxu1 %v3642_v42  ;;  %1313 = vmatpush.bf16.msra.mxu0 %v4363_v35 }
  0xcd   : > { %5346 = vst [vmem:[#allocation88_spill] sm:$0xff] %v4359_v47  ;;  %v4378_v20 = vor.u32 %v3106_v7, %v2847_v21  ;;  %v2849_v47 = vld [vmem:[%s5070_s4 + $0xf8] sm:$0xf0]  ;;  %v2831_v7 = vld [vmem:[%s5070_s4 + $0xc8] sm:$0xf] }
  0xce   : > { %5347 = vst [vmem:[#allocation89_spill] sm:$0xff] %v4363_v35  ;;  %v4388_v23 = vor.u32 %v3104_v37, %v2849_v47  ;;  %v3100_v47 = vld [vmem:[%s5070_s4 + $0xcc] sm:$0xf]  ;;  %v4407_v37 = vor.u32 %v3102_v33, %v2831_v7  ;;  %v2815_v7 = vld [vmem:[%s5070_s4 + $0xa8] sm:$0xf] }
  0xcf   : > { %5348 = vst [vmem:[#allocation90_spill] sm:$0xff] %v4376_v10  ;;  %v544_v21 = vpop.f32.mrf.mxu2  ;;  %1520 = vmatpush.bf16.msra.mxu3 %v3698_v61  ;;  %v4418_v10 = vor.u32 %v3100_v47, %v2833_v49  ;;  %v3098_v33 = vld [vmem:[%s5070_s4 + $0xb4] sm:$0xf0]  ;;  %v2817_v47 = vld [vmem:[%s5070_s4 + $0xb8] sm:$0xf0] }
  0xd0   : > { %5349 = vst [vmem:[#allocation91_spill] sm:$0xff] %v4378_v20  ;;  %1358 = vmatpush.bf16.msrb.mxu0 %v4378_v20  ;;  %1384 = vmatpush.bf16.msrb.mxu2 %v4388_v23  ;;  %v4413_v42 = vadd.f32 %v544_v21, %v4390_v52  ;;  %v4415_v20 = vpop.f32.mrf.mxu0  ;;  %v4434_v49 = vor.u32 %v3098_v33, %v2815_v7  ;;  %v2799_v7 = vld [vmem:[%s5070_s4 + $0x88] sm:$0xf]  ;;  %v3094_v33 = vld [vmem:[%s5070_s4 + $0x94] sm:$0xf0] }
  0xd1   : > { %5350 = vst [vmem:[#allocation92_spill] sm:$0xff] %v4388_v23  ;;  %1494 = vmatpush.bf16.msra.mxu1 %v3676_v54  ;;  %v563_v23 = vpop.f32.mrf.mxu3  ;;  %v4423_v54 = vpop.f32.mrf.mxu1 }
  0xd2   : > { %5351 = vst [vmem:[#allocation93_spill] sm:$0xff] %v4390_v52  ;;  %v4421_v11 = vadd.f32 %v563_v23, %v4404_v3  ;;  %v3096_v23 = vld [vmem:[%s5070_s4 + $0xac] sm:$0xf] }
  0xd3   : > { %5352 = vst [vmem:[#allocation94_spill] sm:$0xff] %v4404_v3  ;;  %1521 = vmatpush.bf16.msra.mxu3 %v3734_v9  ;;  %v4443_v21 = vor.u32 %v3096_v23, %v2817_v47  ;;  %v502_v23 = vadd.f32 %v4175_v28, %v4309_v59 }
  0xd4   : > { %5353 = vst [vmem:[#allocation95_spill] sm:$0xff] %v4407_v37  ;;  %1359 = vmatpush.bf16.msrb.mxu0 %v4407_v37  ;;  %1385 = vmatpush.bf16.msrb.mxu2 %v4418_v10 }
  0xd5   : > { %5354 = vst [vmem:[#allocation96_spill] sm:$0xff] %v4413_v42  ;;  %1495 = vmatpush.bf16.msra.mxu1 %v3712_v2  ;;  %v2801_v42 = vld [vmem:[%s5070_s4 + $0x98] sm:$0xf0] }
  0xd6   : > { %5355 = vst [vmem:[#allocation97_spill] sm:$0xff] %v4415_v20  ;;  %v3092_v20 = vld [vmem:[%s5070_s4 + $0x8c] sm:$0xf]  ;;  %1379 = vmatmul.bf16.vlgmr.msrb.gmra.mxu1 %v4324_v16  ;;  %1405 = vmatmul.bf16.vlgmr.msrb.gmra.mxu3 %v4324_v16  ;;  %v2785_v16 = vld [vmem:[%s5070_s4 + $0x78] sm:$0xf0] }
  0xd7   : > { %5356 = vst [vmem:[#allocation98_spill] sm:$0xff] %v4418_v10  ;;  %v4458_v47 = vpop.f32.mrf.mxu2  ;;  %1522 = vmatpush.bf16.msra.mxu3 %v3771_v22  ;;  %v4471_v61 = vor.u32 %v3092_v20, %v2801_v42  ;;  %v3090_v42 = vld [vmem:[%s5070_s4 + $0x74] sm:$0xf0] }
  0xd8   : > { %5357 = vst [vmem:[#allocation99_spill] sm:$0xff] %v4421_v11  ;;  %1360 = vmatpush.bf16.msrb.mxu0 %v4434_v49  ;;  %1386 = vmatpush.bf16.msrb.mxu2 %v4443_v21  ;;  %v521_v11 = vadd.f32 %v4188_v44, %v4335_v31  ;;  %v810_v2 = vpop.f32.mrf.mxu0  ;;  %v2783_v44 = vld [vmem:[%s5070_s4 + $0x68] sm:$0xf] }
  0xd9   : > { %5358 = vst [vmem:[#allocation100_spill] sm:$0xff] %v4423_v54  ;;  %1496 = vmatpush.bf16.msra.mxu1 %v3748_v14  ;;  %v4461_v54 = vor.u32 %v3094_v33, %v2799_v7  ;;  %v4468_v9 = vpop.f32.mrf.mxu3  ;;  %v853_v28 = vadd.f32 %v810_v2, %v502_v23  ;;  %v3088_v2 = vld [vmem:[%s5070_s4 + $0x6c] sm:$0xf] }
  0xda   : > { %5359 = vst [vmem:[#allocation101_spill] sm:$0xff] %v4434_v49  ;;  %v4493_v23 = vor.u32 %v3088_v2, %v2785_v16 }
  0xdb   : > { %5360 = vst [vmem:[#allocation102_spill] sm:$0xff] %v4443_v21  ;;  %v2722_v20 = vmul.f32 -1.442695, %v853_v28  ;;  %1523 = vmatpush.bf16.msra.mxu3 %v3807_v34  ;;  %v3086_v28 = vld [vmem:[%s5070_s4 + $0x54] sm:$0xf0] }
  0xdc   : > { %5361 = vst [vmem:[#allocation103_spill] sm:$0xff] %v4458_v47  ;;  %v823_v47 = vpop.f32.mrf.mxu1  ;;  %1361 = vmatpush.bf16.msrb.mxu0 %v4461_v54  ;;  %1387 = vmatpush.bf16.msrb.mxu2 %v4471_v61 }
  0xdd   : > { %5362 = vst [vmem:[#allocation104_spill] sm:$0xff] %v4461_v54  ;;  %v854_v7 = vadd.f32 %v823_v47, %v521_v11  ;;  %1497 = vmatpush.bf16.msra.mxu1 %v3785_v27  ;;  %v4487_v11 = vor.u32 %v3090_v42, %v2783_v44  ;;  %3164 = vpow2.f32 %v2722_v20  ;;  %v2767_v47 = vld [vmem:[%s5070_s4 + $0x48] sm:$0xf]  ;;  %v559_v44 = vadd.f32 %v4251_v29, %v4404_v3  ;;  %v2769_v20 = vld [vmem:[%s5070_s4 + $0x58] sm:$0xf0] }
  0xde   : > { %5363 = vst [vmem:[#allocation105_spill] sm:$0xff] %v4468_v9  ;;  %v4509_v2 = vor.u32 %v3086_v28, %v2767_v47  ;;  %v2751_v29 = vld [vmem:[%s5070_s4 + $0x28] sm:$0xf]  ;;  %v3082_v47 = vld [vmem:[%s5070_s4 + $0x34] sm:$0xf0] }
  0xdf   : > { %5364 = vst [vmem:[#allocation106_spill] sm:$0xff] %v4471_v61  ;;  %v2723_v33 = vmul.f32 -1.442695, %v854_v7  ;;  %v3084_v7 = vld [vmem:[%s5070_s4 + $0x4c] sm:$0xf]  ;;  %v836_v42 = vpop.f32.mrf.mxu2  ;;  %1524 = vmatpush.bf16.msra.mxu3 %v3843_v51 }
  0xe0   : > { %5365 = vst [vmem:[#allocation107_spill] sm:$0xff] %v4487_v11  ;;  %1362 = vmatpush.bf16.msrb.mxu0 %v4487_v11  ;;  %1388 = vmatpush.bf16.msrb.mxu2 %v4493_v23  ;;  %v4515_v9 = vor.u32 %v3084_v7, %v2769_v20  ;;  %v3080_v28 = vld [vmem:[%s5070_s4 + $0x2c] sm:$0xf] }
  0xe1   : > { %5366 = vst [vmem:[#allocation108_spill] sm:$0xff] %v4493_v23  ;;  %3166 = vpow2.f32 %v2723_v33  ;;  %1498 = vmatpush.bf16.msra.mxu1 %v3821_v40  ;;  %v849_v16 = vpop.f32.mrf.mxu3  ;;  %v812_v33 = vpop.f32.mrf.mxu0 }
  0xe2   : > { %5367 = vst [vmem:[#allocation109_spill] sm:$0xff] %v4509_v2  ;;  %v856_v34 = vadd.f32 %v849_v16, %v559_v44  ;;  %v2753_v44 = vld [vmem:[%s5070_s4 + $0x38] sm:$0xf0] }
  0xe3   : > { %5368 = vst [vmem:[#allocation110_spill] sm:$0xff] %v4515_v9  ;;  %v3165_v7 = vpop.eup %3164  ;;  %1525 = vmatpush.bf16.msra.mxu3 %v3885_v6  ;;  %v4535_v51 = vor.u32 %v3080_v28, %v2753_v44  ;;  %v2737_v44 = vld [vmem:[%s5070_s4 + $0x18] sm:$0xf0] }
  0xe4   : > { %v825_v27 = vpop.f32.mrf.mxu1  ;;  %1363 = vmatpush.bf16.msrb.mxu0 %v4509_v2  ;;  %1389 = vmatpush.bf16.msrb.mxu2 %v4515_v9  ;;  %v2724_v20 = vmul.f32 -1.442695, %v856_v34  ;;  %v860_v33 = vadd.f32 1.0, %v3165_v7  ;;  %v2735_v34 = vld [vmem:[%s5070_s4 + $0x8] sm:$0xf] }
  0xe5   : > { %1499 = vmatpush.bf16.msra.mxu1 %v3857_v57  ;;  %v4529_v27 = vor.u32 %v3082_v47, %v2751_v29  ;;  %5370 = vst [vmem:[#allocation112_spill] sm:$0xff] %v4535_v51  ;;  %v3078_v47 = vld [vmem:[%s5070_s4 + $0x14] sm:$0xf0] }
  0xe6   : > { %3168 = vpow2.f32 %v2724_v20  ;;  %v4550_v7 = vor.u32 %v3078_v47, %v2735_v34  ;;  %v3076_v20 = vld [vmem:[%s5070_s4 + $0xc] sm:$0xf]  ;;  %vm866_vm2 = vweird.f32 %v860_v33 }
  0xe7   : > { %5369 = vst [vmem:[#allocation111_spill] sm:$0xff] %v4529_v27  ;;  %v3167_v16 = vpop.eup %3166  ;;  %3170 = vrcp.f32 %v860_v33  ;;  %v838_v29 = vpop.f32.mrf.mxu2  ;;  %1526 = vmatpush.bf16.msra.mxu3 %v3917_v25 }
  0xe8   : > { %v4537_v40 = vadd.f32 1.0, %v3167_v16  ;;  %1364 = vmatpush.bf16.msrb.mxu0 %v4529_v27  ;;  %1390 = vmatpush.bf16.msrb.mxu2 %v4535_v51  ;;  %5371 = vst [vmem:[#allocation113_spill] sm:$0xff] %v4550_v7  ;;  %v4559_v16 = vor.u32 %v3076_v20, %v2737_v44  ;;  %v540_v29 = vadd.f32 %v4243_v24, %v4390_v52  ;;  %v872_v24 = vand.u32 2147483648, %v860_v33 }
  0xe9   : > { %1500 = vmatpush.bf16.msra.mxu1 %v3896_v13  ;;  %v851_v28 = vpop.f32.mrf.mxu3 }
  0xea   : > { %3172 = vrcp.f32 %v4537_v40  ;;  %5372 = vst [vmem:[#allocation114_spill] sm:$0xff] %v4559_v16  ;;  %v855_v28 = vadd.f32 %v836_v42, %v540_v29  ;;  %v870_v42 = vand.u32 2147483647, %v860_v33  ;;  %vm885_vm3 = vweird.f32 %v4537_v40 }
  0xeb   : > { %1640 = vmatpush.bf16.msrb.mxu3 %v3926_v30 }
  0xec   : > { %1365 = vmatpush.bf16.msrb.mxu0 %v4550_v7  ;;  %v3169_v34 = vpop.eup %3168  ;;  %1391 = vmatpush.bf16.msrb.mxu2 %v4559_v16  ;;  %vm871_vm6 = vcmp.eq.f32.partialorder %v870_v42, 8.507059e+37 }
  0xed   : > { %1614 = vmatpush.bf16.msrb.mxu1 %v3904_v18  ;;  %v3171_v47 = vpop.eup %3170  ;;  %v899_v25 = vadd.f32 1.0, %v3169_v34  ;;  %v891_v18 = vand.u32 2147483648, %v4537_v40  ;;  %v889_v34 = vand.u32 2147483647, %v4537_v40 }
  0xee   : > { %v862_v6 = vmul.f32 %v3171_v47, %v860_v33  ;;  %vm867_vm0 = vweird.f32 %v3171_v47 }
  0xef   : > { %1641 = vmatpush.bf16.msrb.mxu3 %v3946_v41  ;;  %3174 = vrcp.f32 %v899_v25  ;;  %vm868_vm4 = vmor %vm866_vm2, %vm867_vm0  ;;  %vm890_vm7 = vcmp.eq.f32.partialorder %v889_v34, 8.507059e+37  ;;  %vm905_vm9 = vweird.f32 %v899_v25  ;;  %v5376_v34 = vld [vmem:[#allocation63_spill] sm:$0xff] }
  0xf0   : > { %v3173_v13 = vpop.eup %3172  ;;  %v863_v44 = vsub.f32 1.0, %v862_v6  ;;  %3176 = vtanh.f32 %v855_v28  ;;  %v873_v6 = vor.u32 1.1754944e-38, %v872_v24 }
  0xf1   : > { %1615 = vmatpush.bf16.msrb.mxu1 %v3936_v36  ;;  %v881_v20 = vmul.f32 %v3173_v13, %v4537_v40  ;;  %vm886_vm1 = vweird.f32 %v3173_v13 }
  0xf2   : > { %v864_v57 = vmul.f32 %v3171_v47, %v863_v44  ;;  %vm887_vm5 = vmor %vm885_vm3, %vm886_vm1  ;;  %v596_v44 = vld [vmem:[#allocation3] sm:$0xff] }
  0xf3   : > { %v882_v30 = vsub.f32 1.0, %v881_v20  ;;  %1642 = vmatpush.bf16.msrb.mxu3 %v3958_v46  ;;  %v892_v20 = vor.u32 1.1754944e-38, %v891_v18 }
  0xf4   : > { %v865_v41 = vadd.f32 %v3171_v47, %v864_v57 }
  0xf5   : > { %1616 = vmatpush.bf16.msrb.mxu1 %v3955_v45  ;;  %v883_v29 = vmul.f32 %v3173_v13, %v882_v30  ;;  %v3175_v36 = vpop.eup %3174 }
  0xf6   : > { %v869_v45 = vsel %vm868_vm4, %v3171_v47, %v865_v41  ;;  %v901_v46 = vmul.f32 %v3175_v36, %v899_v25  ;;  %v3177_v30 = vpop.eup %3176  ;;  %vm906_vm8 = vweird.f32 %v3175_v36  ;;  %v911_v47 = vand.u32 2147483648, %v899_v25 }
  0xf7   : > { %v884_v28 = vadd.f32 %v3173_v13, %v883_v29  ;;  %1643 = vmatpush.bf16.msrb.mxu3 %v3976_v63  ;;  %v874_v22 = vsel %vm871_vm6, %v873_v6, %v869_v45  ;;  %vm907_vm10 = vmor %vm905_vm9, %vm906_vm8  ;;  %v5375_v29 = vld [vmem:[#allocation18_spill] sm:$0xff]  ;;  %v5377_v6 = vld [vmem:[#allocation64_spill] sm:$0xff] }
  0xf8   : > { %v916_v14 = vmul.f32 %v3177_v30, %v874_v22  ;;  %v902_v40 = vsub.f32 1.0, %v901_v46  ;;  %v912_v45 = vor.u32 1.1754944e-38, %v911_v47  ;;  %v5381_v30 = vld [vmem:[#allocation68_spill] sm:$0xff]  ;;  %v5387_v47 = vld [vmem:[#allocation30_spill] sm:$0xff] }
  0xf9   : > { %1617 = vmatpush.bf16.msrb.mxu1 %v3971_v58  ;;  %v888_v57 = vsel %vm887_vm5, %v3173_v13, %v884_v28  ;;  %v909_v13 = vand.u32 2147483647, %v899_v25  ;;  %v5373_v25 = vld [vmem:[#allocation60_spill] sm:$0xff] }
  0xfa   : > { %v893_v33 = vsel %vm890_vm7, %v892_v20, %v888_v57  ;;  %v903_v24 = vmul.f32 %v3175_v36, %v902_v40  ;;  %v5378_v28 = vld [vmem:[#allocation20_spill] sm:$0xff]  ;;  %v5379_v20 = vld [vmem:[#allocation22_spill] sm:$0xff]  ;;  %v5384_v40 = vld [vmem:[#allocation71_spill] sm:$0xff] }
  0xfb   : > { %v915_v52 = vmul.f32 %v893_v33, %v596_v44  ;;  %1644 = vmatpush.bf16.msrb.mxu3 %v3994_v12  ;;  %vm910_vm11 = vcmp.eq.f32.partialorder %v909_v13, 8.507059e+37  ;;  %v5380_v44 = vld [vmem:[#allocation67_spill] sm:$0xff]  ;;  %v5382_v57 = vld [vmem:[#allocation24_spill] sm:$0xff]  ;;  %v5383_v33 = vld [vmem:[#allocation26_spill] sm:$0xff] }
  0xfc   : > { %v904_v41 = vadd.f32 %v3175_v36, %v903_v24  ;;  %v5385_v24 = vld [vmem:[#allocation73_spill] sm:$0xff] }
  0xfd   : > { %1618 = vmatpush.bf16.msrb.mxu1 %v3988_v5  ;;  %v4578_v18 = vadd.f32 %v916_v14, %v915_v52  ;;  %v5388_v13 = vld [vmem:[#allocation77_spill] sm:$0xff] }
  0xfe   : > { %v908_v22 = vsel %vm907_vm10, %v3175_v36, %v904_v41  ;;  %v5374_v36 = vld [vmem:[#allocation16_spill] sm:$0xff] }
  0xff   : > { %3178 = vtanh.f32 %v4578_v18  ;;  %1645 = vmatpush.bf16.msrb.mxu3 %v4012_v26  ;;  %v913_v46 = vsel %vm910_vm11, %v912_v45, %v908_v22  ;;  %v5386_v41 = vld [vmem:[#allocation28_spill] sm:$0xff]  ;;  %v5389_v22 = vld [vmem:[#allocation78_spill] sm:$0xff] }
 0x100   : > { %v5390_v45 = vld [vmem:[#allocation32_spill] sm:$0xff] }
 0x101   : > { %1619 = vmatpush.bf16.msrb.mxu1 %v4004_v17 }
 0x103   : > { %1646 = vmatpush.bf16.msrb.mxu3 %v4030_v39 }
 0x105   : > { %1620 = vmatpush.bf16.msrb.mxu1 %v4024_v32  ;;  %v3179_v14 = vpop.eup %3178 }
 0x106   : > { %v919_v52 = vmul.f32 %v3179_v14, %v913_v46  ;;  %v5391_v14 = vld [vmem:[#allocation35_spill] sm:$0xff]  ;;  %v5392_v46 = vld [vmem:[#allocation53_spill] sm:$0xff] }
 0x107   : > { %1647 = vmatpush.bf16.msrb.mxu3 %v4054_v1 }
 0x108   : > { %v920_v42 = vpack.c.bf16 %v919_v52, %v919_v52  ;;  %v5393_v52 = vld [vmem:[#allocation54_spill] sm:$0xff] }
 0x109   : > { %1621 = vmatpush.bf16.msrb.mxu1 %v4043_v55 }
 0x10a   : > { %1314 = vmatmul.bf16.vlgmr.msra.gmra.mxu0 %v920_v42  ;;  %1340 = vmatmul.bf16.vlgmr.msra.gmra.mxu2 %v920_v42 }
 0x10b   : > { %1501 = vmatmul.bf16.vlgmr.msra.gmra.mxu1 %v920_v42  ;;  %1527 = vmatmul.bf16.vlgmr.msra.gmra.mxu3 %v920_v42 }
 0x10c   : > { %1480 = vmatpush.bf16.msra.mxu0 %v3631_v38  ;;  %1506 = vmatpush.bf16.msra.mxu2 %v3659_v48 }
 0x10d   : > { %1666 = vmatpush.bf16.msra.mxu1 %v4056_v4  ;;  %1692 = vmatpush.bf16.msra.mxu3 %v4068_v19 }
 0x110   : > { %1481 = vmatpush.bf16.msra.mxu0 %v3664_v50  ;;  %1507 = vmatpush.bf16.msra.mxu2 %v3694_v60 }
 0x111   : > { %1667 = vmatpush.bf16.msra.mxu1 %v4097_v56  ;;  %1693 = vmatpush.bf16.msra.mxu3 %v4102_v0  ;;  %v5407_v0 = vld [vmem:[#allocation91_spill] sm:$0xff]  ;;  %v5408_v56 = vld [vmem:[#allocation92_spill] sm:$0xff] }
 0x114   : > { %1482 = vmatpush.bf16.msra.mxu0 %v3700_v62  ;;  %1508 = vmatpush.bf16.msra.mxu2 %v3730_v8 }
 0x115   : > { %1668 = vmatpush.bf16.msra.mxu1 %v4128_v53  ;;  %1694 = vmatpush.bf16.msra.mxu3 %v5373_v25  ;;  %v5405_v25 = vld [vmem:[#allocation82_spill] sm:$0xff] }
 0x116   : > { %v5406_v53 = vld [vmem:[#allocation90_spill] sm:$0xff] }
 0x118   : > { %1483 = vmatpush.bf16.msra.mxu0 %v5374_v36  ;;  %1509 = vmatpush.bf16.msra.mxu2 %v5375_v29 }
 0x119   : > { %1669 = vmatpush.bf16.msra.mxu1 %v5376_v34  ;;  %1695 = vmatpush.bf16.msra.mxu3 %v5377_v6  ;;  %v5400_v6 = vld [vmem:[#allocation69_spill] sm:$0xff]  ;;  %v5401_v34 = vld [vmem:[#allocation70_spill] sm:$0xff] }
 0x11a   : > { %1366 = vmatmul.bf16.vlgmr.msrb.gmra.mxu0 %v920_v42  ;;  %1392 = vmatmul.bf16.vlgmr.msrb.gmra.mxu2 %v920_v42 }
 0x11c   : > { %1484 = vmatpush.bf16.msra.mxu0 %v5378_v28  ;;  %1510 = vmatpush.bf16.msra.mxu2 %v5379_v20 }
 0x11d   : > { %1670 = vmatpush.bf16.msra.mxu1 %v5380_v44  ;;  %1696 = vmatpush.bf16.msra.mxu3 %v5381_v30  ;;  %v5398_v30 = vld [vmem:[#allocation65_spill] sm:$0xff]  ;;  %v5399_v44 = vld [vmem:[#allocation66_spill] sm:$0xff] }
 0x120   : > { %1485 = vmatpush.bf16.msra.mxu0 %v5382_v57  ;;  %1511 = vmatpush.bf16.msra.mxu2 %v5383_v33 }
 0x121   : > { %1671 = vmatpush.bf16.msra.mxu1 %v5384_v40  ;;  %1697 = vmatpush.bf16.msra.mxu3 %v5385_v24  ;;  %v5394_v24 = vld [vmem:[#allocation57_spill] sm:$0xff]  ;;  %v5395_v40 = vld [vmem:[#allocation58_spill] sm:$0xff] }
 0x124   : > { %1486 = vmatpush.bf16.msra.mxu0 %v5386_v41  ;;  %1512 = vmatpush.bf16.msra.mxu2 %v5387_v47 }
 0x125   : > { %1672 = vmatpush.bf16.msra.mxu1 %v5388_v13  ;;  %1698 = vmatpush.bf16.msra.mxu3 %v5389_v22  ;;  %v5396_v13 = vld [vmem:[#allocation61_spill] sm:$0xff]  ;;  %v5397_v22 = vld [vmem:[#allocation62_spill] sm:$0xff] }
 0x128   : > { %1487 = vmatpush.bf16.msra.mxu0 %v5390_v45  ;;  %1513 = vmatpush.bf16.msra.mxu2 %v5391_v14 }
 0x129   : > { %1673 = vmatpush.bf16.msra.mxu1 %v4340_v43  ;;  %1699 = vmatpush.bf16.msra.mxu3 %v4342_v15  ;;  %v5402_v43 = vld [vmem:[#allocation75_spill] sm:$0xff]  ;;  %v5403_v15 = vld [vmem:[#allocation76_spill] sm:$0xff] }
 0x12b   : > { %1488 = vmatmul.bf16.vlgmr.msra.gmra.mxu0 %v920_v42  ;;  %1514 = vmatmul.bf16.vlgmr.msra.gmra.mxu2 %v920_v42  ;;  %v5404_v42 = vld [vmem:[#allocation80_spill] sm:$0xff] }
 0x12c   : > { %1601 = vmatpush.bf16.msrb.mxu0 %v5392_v46  ;;  %1627 = vmatpush.bf16.msrb.mxu2 %v5393_v52 }
 0x130   : > { %1602 = vmatpush.bf16.msrb.mxu0 %v5394_v24  ;;  %1628 = vmatpush.bf16.msrb.mxu2 %v5395_v40 }
 0x134   : > { %1603 = vmatpush.bf16.msrb.mxu0 %v5396_v13  ;;  %1629 = vmatpush.bf16.msrb.mxu2 %v5397_v22 }
 0x138   : > { %1604 = vmatpush.bf16.msrb.mxu0 %v5398_v30  ;;  %1630 = vmatpush.bf16.msrb.mxu2 %v5399_v44 }
 0x13c   : > { %1605 = vmatpush.bf16.msrb.mxu0 %v5400_v6  ;;  %1631 = vmatpush.bf16.msrb.mxu2 %v5401_v34 }
 0x140   : > { %1606 = vmatpush.bf16.msrb.mxu0 %v5402_v43  ;;  %1632 = vmatpush.bf16.msrb.mxu2 %v5403_v15 }
 0x143   : > { %v1328_v44 = vpop.f32.mrf.mxu1 }
 0x144   : > { %1607 = vmatpush.bf16.msrb.mxu0 %v5404_v42  ;;  %1633 = vmatpush.bf16.msrb.mxu2 %v5405_v25 }
 0x148   : > { %1608 = vmatpush.bf16.msrb.mxu0 %v4363_v35  ;;  %1634 = vmatpush.bf16.msrb.mxu2 %v5406_v53 }
 0x149   : > { %v1354_v42 = vpop.f32.mrf.mxu3 }
 0x14b   : > { %v1330_v15 = vpop.f32.mrf.mxu1 }
 0x14c   : > { %1653 = vmatpush.bf16.msra.mxu0 %v5407_v0  ;;  %1679 = vmatpush.bf16.msra.mxu2 %v5408_v56 }
 0x150   : > { %1654 = vmatpush.bf16.msra.mxu0 %v4407_v37  ;;  %1680 = vmatpush.bf16.msra.mxu2 %v4418_v10 }
 0x151   : > { %v1356_v56 = vpop.f32.mrf.mxu3 }
 0x152   : > { %v584_v56 = vld [vmem:[%s5071_s5] sm:$0xf] }
 0x153   : > { %v1380_v0 = vpop.f32.mrf.mxu1 }
 0x154   : > { %1655 = vmatpush.bf16.msra.mxu0 %v4434_v49  ;;  %1681 = vmatpush.bf16.msra.mxu2 %v4443_v21  ;;  %v5411_v49 = vld [vmem:[#allocation74_spill] sm:$0xff] }
 0x155   : > { %v523_v10 = vadd.f32 %v5411_v49, %v4335_v31  ;;  %v5413_v49 = vld [vmem:[#allocation84_spill] sm:$0xff] }
 0x158   : > { %1656 = vmatpush.bf16.msra.mxu0 %v4461_v54  ;;  %1682 = vmatpush.bf16.msra.mxu2 %v4471_v61  ;;  %v4657_v54 = vperm.slane %v584_v56, 1 }
 0x159   : > { %v1406_v21 = vpop.f32.mrf.mxu3 }
 0x15a   : > { %5410 = vst [vmem:[#allocation18_spill] sm:$0xff] %v4657_v54 }
 0x15b   : > { %v1382_v15 = vpop.f32.mrf.mxu1 }
 0x15c   : > { %1657 = vmatpush.bf16.msra.mxu0 %v4487_v11  ;;  %1683 = vmatpush.bf16.msra.mxu2 %v4493_v23  ;;  %v4654_v23 = vperm.slane %v584_v56, 0 }
 0x15e   : > { %5409 = vst [vmem:[#allocation16_spill] sm:$0xff] %v4654_v23 }
 0x160   : > { %1658 = vmatpush.bf16.msra.mxu0 %v4509_v2  ;;  %1684 = vmatpush.bf16.msra.mxu2 %v4515_v9 }
 0x161   : > { %v1408_v61 = vpop.f32.mrf.mxu3 }
 0x164   : > { %1659 = vmatpush.bf16.msra.mxu0 %v4529_v27  ;;  %1685 = vmatpush.bf16.msra.mxu2 %v4535_v51 }
 0x168   : > { %1660 = vmatpush.bf16.msra.mxu0 %v4550_v7  ;;  %1686 = vmatpush.bf16.msra.mxu2 %v4559_v16 }
 0x187   : > { %v1315_v2 = vpop.f32.mrf.mxu0 }
 0x188   : > { %v1316_v9 = vadd.f32 %v1315_v2, %v4654_v23  ;;  %v1502_v11 = vpop.f32.mrf.mxu1 }
 0x189   : > { %v1533_v35 = vadd.f32 %v1502_v11, %v523_v10  ;;  %v4667_v10 = vperm.slane %v584_v56, 3 }
 0x18a   : > { %v1329_v27 = vadd.f32 %v1328_v44, %v1316_v9  ;;  %v4662_v44 = vperm.slane %v584_v56, 2 }
 0x18b   : > { %5414 = vst [vmem:[#allocation22_spill] sm:$0xff] %v4667_v10 }
 0x18c   : > { %v2981_v51 = vmul.f32 -1.442695, %v1329_v27  ;;  %5412 = vst [vmem:[#allocation20_spill] sm:$0xff] %v4662_v44  ;;  %v2985_v27 = vmul.f32 -1.442695, %v1533_v35 }
 0x18d   : > { %v1341_v15 = vpop.f32.mrf.mxu2 }
 0x18e   : > { %3180 = vpow2.f32 %v2981_v51  ;;  %v1342_v7 = vadd.f32 %v1341_v15, %v4657_v54  ;;  %v1528_v16 = vpop.f32.mrf.mxu3 }
 0x18f   : > { %v1317_v61 = vpop.f32.mrf.mxu0 }
 0x190   : > { %v1355_v37 = vadd.f32 %v1354_v42, %v1342_v7  ;;  %v1504_v53 = vpop.f32.mrf.mxu1  ;;  %v561_v7 = vadd.f32 %v5413_v49, %v4404_v3 }
 0x192   : > { %v2982_v25 = vmul.f32 -1.442695, %v1355_v37 }
 0x194   : > { %v3181_v43 = vpop.eup %3180  ;;  %3182 = vpow2.f32 %v2982_v25 }
 0x195   : > { %v1413_v2 = vadd.f32 1.0, %v3181_v43  ;;  %v1343_v9 = vpop.f32.mrf.mxu2  ;;  %v1535_v43 = vadd.f32 %v1528_v16, %v561_v7 }
 0x196   : > { %v1530_v23 = vpop.f32.mrf.mxu3 }
 0x197   : > { %3184 = vrcp.f32 %v1413_v2  ;;  %v1367_v51 = vpop.f32.mrf.mxu0  ;;  %v1423_v49 = vand.u32 2147483647, %v1413_v2  ;;  %vm1419_vm13 = vweird.f32 %v1413_v2 }
 0x198   : > { %v1368_v15 = vadd.f32 %v1367_v51, %v4662_v44  ;;  %3186 = vpow2.f32 %v2985_v27  ;;  %v2986_v51 = vmul.f32 -1.442695, %v1535_v43  ;;  %v1425_v44 = vand.u32 2147483648, %v1413_v2 }
 0x199   : > { %vm1424_vm15 = vcmp.eq.f32.partialorder %v1423_v49, 8.507059e+37  ;;  %v600_v49 = vld [vmem:[#allocation3 + $0x8] sm:$0xff] }
 0x19a   : > { %v3183_v61 = vpop.eup %3182  ;;  %v1381_v11 = vadd.f32 %v1380_v0, %v1368_v15  ;;  %v1426_v15 = vor.u32 1.1754944e-38, %v1425_v44 }
 0x19b   : > { %v1432_v53 = vadd.f32 1.0, %v3183_v61 }
 0x19d   : > { %v3185_v37 = vpop.eup %3184  ;;  %3188 = vrcp.f32 %v1432_v53  ;;  %v1393_v25 = vpop.f32.mrf.mxu2  ;;  %vm1438_vm1 = vweird.f32 %v1432_v53 }
 0x19e   : > { %v1415_v42 = vmul.f32 %v3185_v37, %v1413_v2  ;;  %v3187_v23 = vpop.eup %3186  ;;  %v1394_v31 = vadd.f32 %v1393_v25, %v4667_v10  ;;  %3190 = vtanh.f32 %v1381_v11  ;;  %vm1420_vm12 = vweird.f32 %v3185_v37  ;;  %v5415_v11 = vld [vmem:[#allocation72_spill] sm:$0xff] }
 0x19f   : > { %v1369_v35 = vpop.f32.mrf.mxu0  ;;  %v4670_v3 = vadd.f32 1.0, %v3187_v23  ;;  %3192 = vpow2.f32 %v2986_v51  ;;  %vm1421_vm14 = vmor %vm1419_vm13, %vm1420_vm12  ;;  %v1442_v2 = vand.u32 2147483647, %v1432_v53 }
 0x1a0   : > { %v1416_v9 = vsub.f32 1.0, %v1415_v42  ;;  %v1407_v61 = vadd.f32 %v1406_v21, %v1394_v31  ;;  %v504_v35 = vadd.f32 %v5415_v11, %v4309_v59  ;;  %v1444_v31 = vand.u32 2147483648, %v1432_v53 }
 0x1a1   : > { %vm1443_vm3 = vcmp.eq.f32.partialorder %v1442_v2, 8.507059e+37  ;;  %vm1564_vm9 = vweird.f32 %v4670_v3 }
 0x1a2   : > { %v1417_v27 = vmul.f32 %v3185_v37, %v1416_v9  ;;  %v2983_v0 = vmul.f32 -1.442695, %v1407_v61 }
 0x1a3   : > { %v3189_v56 = vpop.eup %3188 }
 0x1a4   : > { %v1434_v54 = vmul.f32 %v3189_v56, %v1432_v53  ;;  %v1418_v16 = vadd.f32 %v3185_v37, %v1417_v27  ;;  %3194 = vpow2.f32 %v2983_v0  ;;  %v3191_v43 = vpop.eup %3190  ;;  %vm1439_vm0 = vweird.f32 %v3189_v56 }
 0x1a5   : > { %v1395_v7 = vpop.f32.mrf.mxu2  ;;  %3196 = vrcp.f32 %v4670_v3  ;;  %vm1440_vm2 = vmor %vm1438_vm1, %vm1439_vm0 }
 0x1a6   : > { %v1435_v42 = vsub.f32 1.0, %v1434_v54  ;;  %v1422_v25 = vsel %vm1421_vm14, %v3185_v37, %v1418_v16  ;;  %v3193_v54 = vpop.eup %3192  ;;  %v1445_v37 = vor.u32 1.1754944e-38, %v1444_v31 }
 0x1a7   : > { %v1427_v21 = vsel %vm1424_vm15, %v1426_v15, %v1422_v25  ;;  %v4681_v31 = vadd.f32 1.0, %v3193_v54 }
 0x1a8   : > { %v1436_v23 = vmul.f32 %v3189_v56, %v1435_v42  ;;  %v1469_v9 = vmul.f32 %v3191_v43, %v1427_v21  ;;  %v1489_v51 = vpop.f32.mrf.mxu0 }
 0x1a9   : > { %v1532_v27 = vadd.f32 %v1489_v51, %v504_v35  ;;  %vm1584_vm1 = vweird.f32 %v4681_v31 }
 0x1aa   : > { %v1437_v44 = vadd.f32 %v3189_v56, %v1436_v23  ;;  %v3195_v16 = vpop.eup %3194 }
 0x1ab   : > { %v2984_v61 = vmul.f32 -1.442695, %v1532_v27  ;;  %v4675_v7 = vpop.eup %3196  ;;  %v1452_v15 = vadd.f32 1.0, %v3195_v16 }
 0x1ac   : > { %v1441_v0 = vsel %vm1440_vm2, %v3189_v56, %v1437_v44  ;;  %v1560_v35 = vmul.f32 %v4675_v7, %v4670_v3  ;;  %vm1565_vm6 = vweird.f32 %v4675_v7 }
 0x1ad   : > { %v1446_v11 = vsel %vm1443_vm3, %v1445_v37, %v1441_v0  ;;  %3198 = vpow2.f32 %v2984_v61  ;;  %v5418_v61 = vld [vmem:[#allocation81_spill] sm:$0xff]  ;;  %v1462_v0 = vand.u32 2147483647, %v1452_v15  ;;  %vm1458_vm5 = vweird.f32 %v1452_v15  ;;  %vm4697_vm10 = vmor %vm1564_vm9, %vm1565_vm6 }
 0x1ae   : > { %v1468_v42 = vmul.f32 %v1446_v11, %v600_v49  ;;  %v1515_v25 = vpop.f32.mrf.mxu2  ;;  %3200 = vrcp.f32 %v1452_v15  ;;  %v1561_v2 = vsub.f32 1.0, %v1560_v35  ;;  %v5417_v49 = vld [vmem:[#allocation93_spill] sm:$0xff] }
 0x1af   : > { %3202 = vrcp.f32 %v4681_v31  ;;  %v542_v16 = vadd.f32 %v5418_v61, %v5417_v49  ;;  %vm1463_vm8 = vcmp.eq.f32.partialorder %v1462_v0, 8.507059e+37 }
 0x1b0   : > { %v4677_v43 = vadd.f32 %v1469_v9, %v1468_v42  ;;  %v1491_v53 = vpop.f32.mrf.mxu0  ;;  %v1562_v37 = vmul.f32 %v4675_v7, %v1561_v2  ;;  %v1464_v9 = vand.u32 2147483648, %v1452_v15 }
 0x1b1   : > { %v1534_v53 = vadd.f32 %v1515_v25, %v542_v16 }
 0x1b2   : > { %5416 = vst [vmem:[#allocation24_spill] sm:$0xff] %v4677_v43  ;;  %v1563_v2 = vadd.f32 %v4675_v7, %v1562_v37 }
 0x1b3   : > { %v3199_v21 = vpop.eup %3198 }
 0x1b4   : > { %v1539_v23 = vadd.f32 1.0, %v3199_v21  ;;  %v3201_v56 = vpop.eup %3200 }
 0x1b5   : > { %v1454_v51 = vmul.f32 %v3201_v56, %v1452_v15  ;;  %vm1459_vm4 = vweird.f32 %v3201_v56  ;;  %v4688_v11 = vpop.eup %3202  ;;  %v1568_v15 = vand.u32 2147483647, %v4670_v3 }
 0x1b6   : > { %3204 = vrcp.f32 %v1539_v23  ;;  %v1517_v27 = vpop.f32.mrf.mxu2  ;;  %vm1460_vm7 = vmor %vm1458_vm5, %vm1459_vm4  ;;  %v1551_v37 = vand.u32 2147483648, %v1539_v23  ;;  %vm1545_vm12 = vweird.f32 %v1539_v23  ;;  %vm1585_vm0 = vweird.f32 %v4688_v11 }
 0x1b7   : > { %v1455_v44 = vsub.f32 1.0, %v1454_v51  ;;  %3206 = vtanh.f32 %v4677_v43  ;;  %v1465_v51 = vor.u32 1.1754944e-38, %v1464_v9  ;;  %v1570_v27 = vand.u32 2147483648, %v4670_v3  ;;  %vm1586_vm2 = vmor %vm1584_vm1, %vm1585_vm0 }
 0x1b8   : > { %3208 = vtanh.f32 %v1534_v53  ;;  %v1549_v43 = vand.u32 2147483647, %v1539_v23  ;;  %vm1569_vm13 = vcmp.eq.f32.partialorder %v1568_v15, 8.507059e+37  ;;  %v1552_v3 = vor.u32 1.1754944e-38, %v1551_v37  ;;  %v5424_v15 = vld [vmem:[#allocation13_spill] sm:$0xff] }
 0x1b9   : > { %v1456_v54 = vmul.f32 %v3201_v56, %v1455_v44  ;;  %v1580_v44 = vmul.f32 %v4688_v11, %v4681_v31  ;;  %v1571_v0 = vor.u32 1.1754944e-38, %v1570_v27 }
 0x1ba   : > { %vm1550_vm15 = vcmp.eq.f32.partialorder %v1549_v43, 8.507059e+37  ;;  %v1590_v43 = vand.u32 2147483648, %v4681_v31 }
 0x1bb   : > { %v1457_v35 = vadd.f32 %v3201_v56, %v1456_v54 }
 0x1bc   : > { %v3205_v42 = vpop.eup %3204  ;;  %v1591_v37 = vor.u32 1.1754944e-38, %v1590_v43  ;;  %v5439_v43 = vld [vmem:[#allocation38_spill] sm:$0xff] }
 0x1bd   : > { %v1541_v21 = vmul.f32 %v3205_v42, %v1539_v23  ;;  %v1461_v61 = vsel %vm1460_vm7, %v3201_v56, %v1457_v35  ;;  %v3207_v49 = vpop.eup %3206  ;;  %vm1546_vm11 = vweird.f32 %v3205_v42  ;;  %v1567_v56 = vsel %vm4697_vm10, %v4675_v7, %v1563_v2 }
 0x1be   : > { %v1466_v16 = vsel %vm1463_vm8, %v1465_v51, %v1461_v61  ;;  %v1581_v35 = vsub.f32 1.0, %v1580_v44  ;;  %vm1547_vm14 = vmor %vm1545_vm12, %vm1546_vm11  ;;  %v1572_v51 = vsel %vm1569_vm13, %v1571_v0, %v1567_v56  ;;  %v5422_v61 = vld [vmem:[#allocation11_spill] sm:$0xff]  ;;  %v5423_v44 = vld [vmem:[#allocation12_spill] sm:$0xff] }
 0x1bf   : > { %v1542_v25 = vsub.f32 1.0, %v1541_v21  ;;  %v1472_v9 = vmul.f32 %v3207_v49, %v1466_v16  ;;  %v5421_v49 = vld [vmem:[#allocation10_spill] sm:$0xff]  ;;  %v1594_v27 = vmul.f32 %v1572_v51, %v4578_v18  ;;  %v5426_v16 = vld [vmem:[#allocation15_spill] sm:$0xff]  ;;  %v5427_v0 = vld [vmem:[#allocation17_spill] sm:$0xff] }
 0x1c0   : > { %v1582_v7 = vmul.f32 %v4688_v11, %v1581_v35  ;;  %v5425_v18 = vld [vmem:[#allocation14_spill] sm:$0xff]  ;;  %v5428_v35 = vld [vmem:[#allocation19_spill] sm:$0xff] }
 0x1c1   : > { %v1543_v59 = vmul.f32 %v3205_v42, %v1542_v25  ;;  %v1600_v21 = vpack.c.bf16 %v1472_v9, %v1472_v9  ;;  %v3209_v25 = vpop.eup %3208 }
 0x1c3   : > { %v1544_v10 = vadd.f32 %v3205_v42, %v1543_v59  ;;  %1622 = vmatmul.bf16.vlgmr.msrb.gmra.mxu1 %v1600_v21  ;;  %1648 = vmatmul.bf16.vlgmr.msrb.gmra.mxu3 %v1600_v21 }
 0x1c4   : > { %1788 = vmatpush.bf16.msrb.mxu1 %v5421_v49  ;;  %1814 = vmatpush.bf16.msrb.mxu3 %v5422_v61 }
 0x1c5   : > { %v1548_v53 = vsel %vm1547_vm14, %v3205_v42, %v1544_v10  ;;  %v1583_v10 = vadd.f32 %v4688_v11, %v1582_v7  ;;  %v1588_v42 = vand.u32 2147483647, %v4681_v31  ;;  %v5429_v31 = vld [vmem:[#allocation21_spill] sm:$0xff] }
 0x1c6   : > { %v1553_v2 = vsel %vm1550_vm15, %v1552_v3, %v1548_v53  ;;  %v5430_v53 = vld [vmem:[#allocation23_spill] sm:$0xff]  ;;  %v5433_v7 = vld [vmem:[#allocation29_spill] sm:$0xff] }
 0x1c7   : > { %v1595_v59 = vmul.f32 %v3209_v25, %v1553_v2  ;;  %v1587_v54 = vsel %vm1586_vm2, %v4688_v11, %v1583_v10  ;;  %vm1589_vm3 = vcmp.eq.f32.partialorder %v1588_v42, 8.507059e+37  ;;  %v5431_v11 = vld [vmem:[#allocation25_spill] sm:$0xff]  ;;  %v5432_v25 = vld [vmem:[#allocation27_spill] sm:$0xff] }
 0x1c8   : > { %1789 = vmatpush.bf16.msrb.mxu1 %v5423_v44  ;;  %1815 = vmatpush.bf16.msrb.mxu3 %v5424_v15  ;;  %v1592_v56 = vsel %vm1589_vm3, %v1591_v37, %v1587_v54  ;;  %v5435_v2 = vld [vmem:[#allocation33_spill] sm:$0xff]  ;;  %v5440_v42 = vld [vmem:[#allocation39_spill] sm:$0xff]  ;;  %v5441_v54 = vld [vmem:[#allocation40_spill] sm:$0xff] }
 0x1c9   : > { %v4708_v23 = vadd.f32 %v1595_v59, %v1594_v27  ;;  %v5436_v27 = vld [vmem:[#allocation36_spill] sm:$0xff]  ;;  %v5437_v59 = vld [vmem:[#allocation34_spill] sm:$0xff]  ;;  %v5438_v10 = vld [vmem:[#allocation37_spill] sm:$0xff] }
 0x1ca   : > { %v5442_v37 = vld [vmem:[#allocation41_spill] sm:$0xff] }
 0x1cb   : > { %3210 = vtanh.f32 %v4708_v23 }
 0x1cc   : > { %1790 = vmatpush.bf16.msrb.mxu1 %v5425_v18  ;;  %1816 = vmatpush.bf16.msrb.mxu3 %v5426_v16 }
 0x1d0   : > { %1791 = vmatpush.bf16.msrb.mxu1 %v5427_v0  ;;  %1817 = vmatpush.bf16.msrb.mxu3 %v5428_v35 }
 0x1d1   : > { %v3211_v9 = vpop.eup %3210 }
 0x1d2   : > { %v1598_v3 = vmul.f32 %v3211_v9, %v1592_v56  ;;  %v5443_v9 = vld [vmem:[#allocation66_spill] sm:$0xff]  ;;  %v5444_v56 = vld [vmem:[#allocation55_spill] sm:$0xff] }
 0x1d3   : > { %1674 = vmatmul.bf16.vlgmr.msra.gmra.mxu1 %v1600_v21  ;;  %1700 = vmatmul.bf16.vlgmr.msra.gmra.mxu3 %v1600_v21  ;;  %v5434_v21 = vld [vmem:[#allocation31_spill] sm:$0xff] }
 0x1d4   : > { %v1599_v51 = vpack.c.bf16 %v1598_v3, %v1598_v3  ;;  %1792 = vmatpush.bf16.msrb.mxu1 %v5429_v31  ;;  %1818 = vmatpush.bf16.msrb.mxu3 %v5430_v53  ;;  %v5445_v3 = vld [vmem:[#allocation56_spill] sm:$0xff] }
 0x1d6   : > { %1609 = vmatmul.bf16.vlgmr.msrb.gmra.mxu0 %v1599_v51  ;;  %1635 = vmatmul.bf16.vlgmr.msrb.gmra.mxu2 %v1599_v51 }
 0x1d7   : > { %1775 = vmatpush.bf16.msrb.mxu0 %v3631_v38  ;;  %1801 = vmatpush.bf16.msrb.mxu2 %v3659_v48 }
 0x1d8   : > { %1793 = vmatpush.bf16.msrb.mxu1 %v5431_v11  ;;  %1819 = vmatpush.bf16.msrb.mxu3 %v5432_v25 }
 0x1db   : > { %1776 = vmatpush.bf16.msrb.mxu0 %v3664_v50  ;;  %1802 = vmatpush.bf16.msrb.mxu2 %v3694_v60 }
 0x1dc   : > { %1794 = vmatpush.bf16.msrb.mxu1 %v5433_v7  ;;  %1820 = vmatpush.bf16.msrb.mxu3 %v5434_v21 }
 0x1df   : > { %1777 = vmatpush.bf16.msrb.mxu0 %v3700_v62  ;;  %1803 = vmatpush.bf16.msrb.mxu2 %v3730_v8 }
 0x1e0   : > { %1795 = vmatpush.bf16.msrb.mxu1 %v5435_v2  ;;  %1821 = vmatpush.bf16.msrb.mxu3 %v5436_v27 }
 0x1e3   : > { %1778 = vmatpush.bf16.msrb.mxu0 %v5374_v36  ;;  %1804 = vmatpush.bf16.msrb.mxu2 %v5375_v29 }
 0x1e4   : > { %1909 = vmatpush.bf16.msra.mxu1 %v5437_v59  ;;  %1935 = vmatpush.bf16.msra.mxu3 %v5438_v10 }
 0x1e5   : > { %1796 = vmatmul.bf16.vlgmr.msrb.gmra.mxu1 %v1599_v51  ;;  %1822 = vmatmul.bf16.vlgmr.msrb.gmra.mxu3 %v1599_v51 }
 0x1e6   : > { %1661 = vmatmul.bf16.vlgmr.msra.gmra.mxu0 %v1599_v51  ;;  %1687 = vmatmul.bf16.vlgmr.msra.gmra.mxu2 %v1599_v51 }
 0x1e7   : > { %1779 = vmatpush.bf16.msrb.mxu0 %v5378_v28  ;;  %1805 = vmatpush.bf16.msrb.mxu2 %v5379_v20 }
 0x1e8   : > { %1910 = vmatpush.bf16.msra.mxu1 %v5439_v43  ;;  %1936 = vmatpush.bf16.msra.mxu3 %v5440_v42 }
 0x1eb   : > { %1780 = vmatpush.bf16.msrb.mxu0 %v5382_v57  ;;  %1806 = vmatpush.bf16.msrb.mxu2 %v5383_v33 }
 0x1ec   : > { %1911 = vmatpush.bf16.msra.mxu1 %v5441_v54  ;;  %1937 = vmatpush.bf16.msra.mxu3 %v5442_v37 }
 0x1ef   : > { %1781 = vmatpush.bf16.msrb.mxu0 %v5386_v41  ;;  %1807 = vmatpush.bf16.msrb.mxu2 %v5387_v47 }
 0x1f0   : > { %1912 = vmatpush.bf16.msra.mxu1 %v3971_v58  ;;  %1938 = vmatpush.bf16.msra.mxu3 %v3976_v63 }
 0x1f3   : > { %1782 = vmatpush.bf16.msrb.mxu0 %v5390_v45  ;;  %1808 = vmatpush.bf16.msrb.mxu2 %v5391_v14  ;;  %v5482_v14 = vld [vmem:[#allocation88_spill] sm:$0xff] }
 0x1f4   : > { %1913 = vmatpush.bf16.msra.mxu1 %v3988_v5  ;;  %1939 = vmatpush.bf16.msra.mxu3 %v3994_v12 }
 0x1f6   : > { %1783 = vmatmul.bf16.vlgmr.msrb.gmra.mxu0 %v1599_v51  ;;  %1809 = vmatmul.bf16.vlgmr.msrb.gmra.mxu2 %v1599_v51  ;;  %v5446_v51 = vld [vmem:[#allocation59_spill] sm:$0xff] }
 0x1f7   : > { %1896 = vmatpush.bf16.msra.mxu0 %v5392_v46  ;;  %1922 = vmatpush.bf16.msra.mxu2 %v5393_v52 }
 0x1f8   : > { %1914 = vmatpush.bf16.msra.mxu1 %v4004_v17  ;;  %1940 = vmatpush.bf16.msra.mxu3 %v4012_v26 }
 0x1fb   : > { %1897 = vmatpush.bf16.msra.mxu0 %v5394_v24  ;;  %1923 = vmatpush.bf16.msra.mxu2 %v5395_v40 }
 0x1fc   : > { %1915 = vmatpush.bf16.msra.mxu1 %v4024_v32  ;;  %1941 = vmatpush.bf16.msra.mxu3 %v4030_v39  ;;  %v5480_v39 = vld [vmem:[#allocation16_spill] sm:$0xff] }
 0x1ff   : > { %1898 = vmatpush.bf16.msra.mxu0 %v5396_v13  ;;  %1924 = vmatpush.bf16.msra.mxu2 %v5397_v22 }
 0x200   : > { %1916 = vmatpush.bf16.msra.mxu1 %v4043_v55  ;;  %1942 = vmatpush.bf16.msra.mxu3 %v4054_v1  ;;  %v5447_v55 = vld [vmem:[#allocation60_spill] sm:$0xff]  ;;  %v5448_v1 = vld [vmem:[#allocation75_spill] sm:$0xff] }
 0x203   : > { %1899 = vmatpush.bf16.msra.mxu0 %v5398_v30  ;;  %1925 = vmatpush.bf16.msra.mxu2 %v5443_v9  ;;  %v5451_v30 = vld [vmem:[#allocation64_spill] sm:$0xff] }
 0x204   : > { %1961 = vmatpush.bf16.msrb.mxu1 %v4056_v4  ;;  %1987 = vmatpush.bf16.msrb.mxu3 %v4068_v19  ;;  %v5449_v4 = vld [vmem:[#allocation76_spill] sm:$0xff]  ;;  %v5450_v19 = vld [vmem:[#allocation63_spill] sm:$0xff] }
 0x205   : > { %v5452_v9 = vld [vmem:[#allocation80_spill] sm:$0xff] }
 0x207   : > { %1900 = vmatpush.bf16.msra.mxu0 %v5400_v6  ;;  %1926 = vmatpush.bf16.msra.mxu2 %v5401_v34  ;;  %v5455_v6 = vld [vmem:[#allocation68_spill] sm:$0xff]  ;;  %v5456_v34 = vld [vmem:[#allocation89_spill] sm:$0xff] }
 0x208   : > { %1962 = vmatpush.bf16.msrb.mxu1 %v5444_v56  ;;  %1988 = vmatpush.bf16.msrb.mxu3 %v5445_v3  ;;  %v5453_v56 = vld [vmem:[#allocation82_spill] sm:$0xff]  ;;  %v5454_v3 = vld [vmem:[#allocation67_spill] sm:$0xff] }
 0x20b   : > { %1901 = vmatpush.bf16.msra.mxu0 %v5448_v1  ;;  %1927 = vmatpush.bf16.msra.mxu2 %v5449_v4  ;;  %v5459_v1 = vld [vmem:[#allocation92_spill] sm:$0xff]  ;;  %v5460_v4 = vld [vmem:[#allocation71_spill] sm:$0xff] }
 0x20c   : > { %1963 = vmatpush.bf16.msrb.mxu1 %v5446_v51  ;;  %1989 = vmatpush.bf16.msrb.mxu3 %v5447_v55  ;;  %v5457_v51 = vld [vmem:[#allocation90_spill] sm:$0xff]  ;;  %v5458_v55 = vld [vmem:[#allocation91_spill] sm:$0xff] }
 0x20f   : > { %1902 = vmatpush.bf16.msra.mxu0 %v5452_v9  ;;  %1928 = vmatpush.bf16.msra.mxu2 %v5453_v56  ;;  %v5463_v9 = vld [vmem:[#allocation98_spill] sm:$0xff]  ;;  %v5464_v56 = vld [vmem:[#allocation77_spill] sm:$0xff] }
 0x210   : > { %1964 = vmatpush.bf16.msrb.mxu1 %v5450_v19  ;;  %1990 = vmatpush.bf16.msrb.mxu3 %v5451_v30  ;;  %v5461_v19 = vld [vmem:[#allocation73_spill] sm:$0xff]  ;;  %v5462_v30 = vld [vmem:[#allocation95_spill] sm:$0xff] }
 0x213   : > { %1903 = vmatpush.bf16.msra.mxu0 %v5456_v34  ;;  %1929 = vmatpush.bf16.msra.mxu2 %v5457_v51  ;;  %v5467_v34 = vld [vmem:[#allocation102_spill] sm:$0xff]  ;;  %v5468_v51 = vld [vmem:[#allocation85_spill] sm:$0xff] }
 0x214   : > { %1965 = vmatpush.bf16.msrb.mxu1 %v5454_v3  ;;  %1991 = vmatpush.bf16.msrb.mxu3 %v5455_v6  ;;  %v5465_v3 = vld [vmem:[#allocation78_spill] sm:$0xff]  ;;  %v5466_v6 = vld [vmem:[#allocation101_spill] sm:$0xff] }
 0x217   : > { %1948 = vmatpush.bf16.msrb.mxu0 %v5458_v55  ;;  %1974 = vmatpush.bf16.msrb.mxu2 %v5459_v1  ;;  %v5469_v55 = vld [vmem:[#allocation86_spill] sm:$0xff]  ;;  %v5470_v1 = vld [vmem:[#allocation104_spill] sm:$0xff] }
 0x218   : > { %1966 = vmatpush.bf16.msrb.mxu1 %v5460_v4  ;;  %1992 = vmatpush.bf16.msrb.mxu3 %v5461_v19  ;;  %v5471_v4 = vld [vmem:[#allocation106_spill] sm:$0xff]  ;;  %v5472_v19 = vld [vmem:[#allocation107_spill] sm:$0xff] }
 0x21b   : > { %1949 = vmatpush.bf16.msrb.mxu0 %v5462_v30  ;;  %1975 = vmatpush.bf16.msrb.mxu2 %v5463_v9  ;;  %v5473_v30 = vld [vmem:[#allocation108_spill] sm:$0xff]  ;;  %v5474_v9 = vld [vmem:[#allocation109_spill] sm:$0xff] }
 0x21c   : > { %1967 = vmatpush.bf16.msrb.mxu1 %v5464_v56  ;;  %1993 = vmatpush.bf16.msrb.mxu3 %v5465_v3  ;;  %v5475_v56 = vld [vmem:[#allocation110_spill] sm:$0xff]  ;;  %v5476_v3 = vld [vmem:[#allocation111_spill] sm:$0xff] }
 0x21f   : > { %1950 = vmatpush.bf16.msrb.mxu0 %v5466_v6  ;;  %1976 = vmatpush.bf16.msrb.mxu2 %v5467_v34  ;;  %v5477_v6 = vld [vmem:[#allocation112_spill] sm:$0xff]  ;;  %v5478_v34 = vld [vmem:[#allocation113_spill] sm:$0xff] }
 0x220   : > { %1968 = vmatpush.bf16.msrb.mxu1 %v5468_v51  ;;  %1994 = vmatpush.bf16.msrb.mxu3 %v5469_v55  ;;  %v5479_v51 = vld [vmem:[#allocation114_spill] sm:$0xff] }
 0x223   : > { %1951 = vmatpush.bf16.msrb.mxu0 %v5470_v1  ;;  %1977 = vmatpush.bf16.msrb.mxu2 %v5471_v4 }
 0x227   : > { %1952 = vmatpush.bf16.msrb.mxu0 %v5472_v19  ;;  %1978 = vmatpush.bf16.msrb.mxu2 %v5473_v30 }
 0x22b   : > { %1953 = vmatpush.bf16.msrb.mxu0 %v5474_v9  ;;  %1979 = vmatpush.bf16.msrb.mxu2 %v5475_v56 }
 0x22f   : > { %1954 = vmatpush.bf16.msrb.mxu0 %v5476_v3  ;;  %1980 = vmatpush.bf16.msrb.mxu2 %v5477_v6  ;;  %v5481_v3 = vld [vmem:[#allocation18_spill] sm:$0xff] }
 0x233   : > { %1955 = vmatpush.bf16.msrb.mxu0 %v5478_v34  ;;  %1981 = vmatpush.bf16.msrb.mxu2 %v5479_v51 }
 0x240   : > { %v1623_v55 = vpop.f32.mrf.mxu1 }
 0x246   : > { %v1649_v1 = vpop.f32.mrf.mxu3 }
 0x248   : > { %v1625_v22 = vpop.f32.mrf.mxu1 }
 0x24e   : > { %v1651_v4 = vpop.f32.mrf.mxu3 }
 0x250   : > { %v1675_v13 = vpop.f32.mrf.mxu1 }
 0x253   : > { %v1610_v19 = vpop.f32.mrf.mxu0 }
 0x254   : > { %v1611_v30 = vadd.f32 %v1610_v19, %v5480_v39 }
 0x256   : > { %v1624_v32 = vadd.f32 %v1623_v55, %v1611_v30  ;;  %v1701_v9 = vpop.f32.mrf.mxu3 }
 0x258   : > { %v2987_v40 = vmul.f32 -1.442695, %v1624_v32  ;;  %v1677_v56 = vpop.f32.mrf.mxu1 }
 0x259   : > { %v1636_v24 = vpop.f32.mrf.mxu2  ;;  %v5484_v56 = vld [vmem:[#allocation99_spill] sm:$0xff] }
 0x25a   : > { %3212 = vpow2.f32 %v2987_v40  ;;  %v1637_v6 = vadd.f32 %v1636_v24, %v5481_v3 }
 0x25b   : > { %v1612_v26 = vpop.f32.mrf.mxu0 }
 0x25c   : > { %v1650_v34 = vadd.f32 %v1649_v1, %v1637_v6  ;;  %v5483_v6 = vld [vmem:[#allocation22_spill] sm:$0xff] }
 0x25e   : > { %v2988_v17 = vmul.f32 -1.442695, %v1650_v34  ;;  %v1703_v51 = vpop.f32.mrf.mxu3 }
 0x260   : > { %v3213_v52 = vpop.eup %3212  ;;  %3214 = vpow2.f32 %v2988_v17 }
 0x261   : > { %v4813_v22 = vadd.f32 1.0, %v3213_v52  ;;  %v1638_v46 = vpop.f32.mrf.mxu2 }
 0x262   : > { %v1797_v4 = vpop.f32.mrf.mxu1 }
 0x263   : > { %v1828_v19 = vadd.f32 %v1797_v4, %v5482_v14  ;;  %3216 = vrcp.f32 %v4813_v22  ;;  %v1662_v32 = vpop.f32.mrf.mxu0  ;;  %vm1714_vm6 = vweird.f32 %v4813_v22 }
 0x265   : > { %v2991_v55 = vmul.f32 -1.442695, %v1828_v19  ;;  %v5485_v19 = vld [vmem:[#allocation20_spill] sm:$0xff] }
 0x266   : > { %v3215_v30 = vpop.eup %3214 }
 0x267   : > { %3218 = vpow2.f32 %v2991_v55  ;;  %v1727_v40 = vadd.f32 1.0, %v3215_v30  ;;  %v1663_v55 = vadd.f32 %v1662_v32, %v5485_v19 }
 0x268   : > { %v1823_v24 = vpop.f32.mrf.mxu3 }
 0x269   : > { %v3217_v26 = vpop.eup %3216  ;;  %3220 = vrcp.f32 %v1727_v40  ;;  %v1688_v34 = vpop.f32.mrf.mxu2  ;;  %v1830_v46 = vadd.f32 %v1823_v24, %v5484_v56  ;;  %v1676_v24 = vadd.f32 %v1675_v13, %v1663_v55  ;;  %v5486_v56 = vld [vmem:[#allocation87_spill] sm:$0xff]  ;;  %vm1733_vm7 = vweird.f32 %v1727_v40 }
 0x26a   : > { %v1799_v1 = vpop.f32.mrf.mxu1  ;;  %v1710_v17 = vmul.f32 %v3217_v26, %v4813_v22  ;;  %v1689_v52 = vadd.f32 %v1688_v34, %v5483_v6  ;;  %v1720_v34 = vand.u32 2147483648, %v4813_v22  ;;  %vm1715_vm4 = vweird.f32 %v3217_v26 }
 0x26b   : > { %v1664_v51 = vpop.f32.mrf.mxu0  ;;  %v2992_v5 = vmul.f32 -1.442695, %v1830_v46  ;;  %vm4828_vm8 = vmor %vm1714_vm6, %vm1715_vm4 }
 0x26c   : > { %v1711_v4 = vsub.f32 1.0, %v1710_v17  ;;  %v1702_v3 = vadd.f32 %v1701_v9, %v1689_v52  ;;  %v1739_v17 = vand.u32 2147483648, %v1727_v40  ;;  %v1721_v55 = vor.u32 1.1754944e-38, %v1720_v34 }
 0x26d   : > { %v3219_v14 = vpop.eup %3218 }
 0x26e   : > { %v4820_v39 = vadd.f32 1.0, %v3219_v14  ;;  %v2989_v30 = vmul.f32 -1.442695, %v1702_v3  ;;  %v1712_v12 = vmul.f32 %v3217_v26, %v1711_v4  ;;  %v1737_v3 = vand.u32 2147483647, %v1727_v40 }
 0x26f   : > { %v3221_v45 = vpop.eup %3220 }
 0x270   : > { %v1825_v1 = vpop.f32.mrf.mxu3  ;;  %v1729_v47 = vmul.f32 %v3221_v45, %v1727_v40  ;;  %3222 = vpow2.f32 %v2989_v30  ;;  %v1713_v9 = vadd.f32 %v3217_v26, %v1712_v12  ;;  %vm1734_vm5 = vweird.f32 %v3221_v45 }
 0x271   : > { %v1690_v41 = vpop.f32.mrf.mxu2  ;;  %3224 = vrcp.f32 %v4820_v39  ;;  %vm1735_vm9 = vmor %vm1733_vm7, %vm1734_vm5  ;;  %vm1738_vm10 = vcmp.eq.f32.partialorder %v1737_v3, 8.507059e+37  ;;  %vm1859_vm1 = vweird.f32 %v4820_v39 }
 0x272   : > { %v1730_v63 = vsub.f32 1.0, %v1729_v47  ;;  %3226 = vpow2.f32 %v2992_v5  ;;  %v1718_v41 = vand.u32 2147483647, %v4813_v22  ;;  %v1740_v5 = vor.u32 1.1754944e-38, %v1739_v17  ;;  %v5489_v17 = vld [vmem:[#allocation24_spill] sm:$0xff] }
 0x273   : > { %v1784_v52 = vpop.f32.mrf.mxu0  ;;  %3228 = vtanh.f32 %v1676_v24 }
 0x274   : > { %v1731_v32 = vmul.f32 %v3221_v45, %v1730_v63  ;;  %v1827_v46 = vadd.f32 %v1784_v52, %v5486_v56  ;;  %v1717_v63 = vsel %vm4828_vm8, %v3217_v26, %v1713_v9  ;;  %vm1719_vm11 = vcmp.eq.f32.partialorder %v1718_v41, 8.507059e+37 }
 0x275   : > { %v1722_v52 = vsel %vm1719_vm11, %v1721_v55, %v1717_v63 }
 0x276   : > { %v3223_v47 = vpop.eup %3222  ;;  %v1732_v51 = vadd.f32 %v3221_v45, %v1731_v32  ;;  %v2990_v12 = vmul.f32 -1.442695, %v1827_v46 }
 0x277   : > { %v1747_v14 = vadd.f32 1.0, %v3223_v47  ;;  %v4834_v4 = vpop.eup %3224 }
 0x278   : > { %v1736_v30 = vsel %vm1735_vm9, %v3221_v45, %v1732_v51  ;;  %3230 = vpow2.f32 %v2990_v12  ;;  %v3227_v22 = vpop.eup %3226  ;;  %v1855_v24 = vmul.f32 %v4834_v4, %v4820_v39  ;;  %vm1860_vm14 = vweird.f32 %v4834_v4 }
 0x279   : > { %v1741_v40 = vsel %vm1738_vm10, %v1740_v5, %v1736_v30  ;;  %3232 = vrcp.f32 %v1747_v14  ;;  %v1810_v1 = vpop.f32.mrf.mxu2  ;;  %v3229_v26 = vpop.eup %3228  ;;  %v4839_v9 = vadd.f32 1.0, %v3227_v22  ;;  %v1759_v63 = vand.u32 2147483648, %v1747_v14  ;;  %vm4855_vm2 = vmor %vm1859_vm1, %vm1860_vm14 }
 0x27a   : > { %v1763_v32 = vmul.f32 %v1741_v40, %v5489_v17  ;;  %v1764_v46 = vmul.f32 %v3229_v26, %v1722_v52  ;;  %v1856_v3 = vsub.f32 1.0, %v1855_v24  ;;  %v1757_v30 = vand.u32 2147483647, %v1747_v14  ;;  %v5490_v24 = vld [vmem:[#allocation96_spill] sm:$0xff] }
 0x27b   : > { %v1786_v56 = vpop.f32.mrf.mxu0  ;;  %3234 = vrcp.f32 %v4839_v9  ;;  %vm1753_vm13 = vweird.f32 %v1747_v14  ;;  %v1829_v17 = vadd.f32 %v1810_v1, %v5490_v24  ;;  %vm1879_vm9 = vweird.f32 %v4839_v9 }
 0x27c   : > { %v4841_v47 = vadd.f32 %v1764_v46, %v1763_v32  ;;  %v1857_v5 = vmul.f32 %v4834_v4, %v1856_v3  ;;  %v1760_v56 = vor.u32 1.1754944e-38, %v1759_v63  ;;  %vm1758_vm0 = vcmp.eq.f32.partialorder %v1757_v30, 8.507059e+37 }
 0x27d   : > { %v1865_v3 = vand.u32 2147483648, %v4820_v39 }
 0x27e   : > { %v3231_v34 = vpop.eup %3230  ;;  %v1858_v32 = vadd.f32 %v4834_v4, %v1857_v5 }
 0x27f   : > { %v3233_v45 = vpop.eup %3232  ;;  %v1834_v41 = vadd.f32 1.0, %v3231_v34  ;;  %v1866_v24 = vor.u32 1.1754944e-38, %v1865_v3 }
 0x280   : > { %v1749_v13 = vmul.f32 %v3233_v45, %v1747_v14  ;;  %vm1754_vm12 = vweird.f32 %v3233_v45 }
 0x281   : > { %3236 = vrcp.f32 %v1834_v41  ;;  %v1812_v51 = vpop.f32.mrf.mxu2  ;;  %v4846_v22 = vpop.eup %3234  ;;  %vm1755_vm15 = vmor %vm1753_vm13, %vm1754_vm12  ;;  %v1846_v63 = vand.u32 2147483648, %v1834_v41  ;;  %v1844_v30 = vand.u32 2147483647, %v1834_v41  ;;  %vm1840_vm4 = vweird.f32 %v1834_v41 }
 0x282   : > { %v1750_v12 = vsub.f32 1.0, %v1749_v13  ;;  %3238 = vtanh.f32 %v4841_v47  ;;  %v1875_v14 = vmul.f32 %v4846_v22, %v4839_v9  ;;  %vm1880_vm8 = vweird.f32 %v4846_v22 }
 0x283   : > { %3240 = vtanh.f32 %v1829_v17  ;;  %vm1845_vm7 = vcmp.eq.f32.partialorder %v1844_v30, 8.507059e+37  ;;  %vm1881_vm10 = vmor %vm1879_vm9, %vm1880_vm8  ;;  %v5531_v30 = vld [vmem:[#allocation90_spill] sm:$0xff] }
 0x284   : > { %v1751_v55 = vmul.f32 %v3233_v45, %v1750_v12  ;;  %v1863_v12 = vand.u32 2147483647, %v4820_v39  ;;  %v1847_v39 = vor.u32 1.1754944e-38, %v1846_v63  ;;  %v5528_v63 = vld [vmem:[#allocation67_spill] sm:$0xff] }
 0x286   : > { %v1752_v40 = vadd.f32 %v3233_v45, %v1751_v55  ;;  %vm1864_vm5 = vcmp.eq.f32.partialorder %v1863_v12, 8.507059e+37  ;;  %v5526_v12 = vld [vmem:[#allocation80_spill] sm:$0xff] }
 0x287   : > { %v3237_v52 = vpop.eup %3236 }
 0x288   : > { %v1836_v26 = vmul.f32 %v3237_v52, %v1834_v41  ;;  %v1756_v46 = vsel %vm1755_vm15, %v3233_v45, %v1752_v40  ;;  %v3239_v34 = vpop.eup %3238  ;;  %v1862_v45 = vsel %vm4855_vm2, %v4834_v4, %v1858_v32  ;;  %vm1841_vm3 = vweird.f32 %v3237_v52 }
 0x289   : > { %v1761_v13 = vsel %vm1758_vm0, %v1760_v56, %v1756_v46  ;;  %v1876_v56 = vsub.f32 1.0, %v1875_v14  ;;  %vm1842_vm6 = vmor %vm1840_vm4, %vm1841_vm3  ;;  %v3241_v17 = vpop.eup %3240 }
 0x28a   : > { %v1837_v1 = vsub.f32 1.0, %v1836_v26  ;;  %v1767_v5 = vmul.f32 %v3239_v34, %v1761_v13  ;;  %v1867_v26 = vsel %vm1864_vm5, %v1866_v24, %v1862_v45  ;;  %v5529_v45 = vld [vmem:[#allocation68_spill] sm:$0xff] }
 0x28b   : > { %v1877_v32 = vmul.f32 %v4846_v22, %v1876_v56  ;;  %v1889_v3 = vmul.f32 %v1867_v26, %v4708_v23  ;;  %v5533_v24 = vld [vmem:[#allocation92_spill] sm:$0xff]  ;;  %v5534_v56 = vld [vmem:[#allocation71_spill] sm:$0xff]  ;;  %v5537_v26 = vld [vmem:[#allocation98_spill] sm:$0xff] }
 0x28c   : > { %v1838_v55 = vmul.f32 %v3237_v52, %v1837_v1  ;;  %v1895_v40 = vpack.c.bf16 %v1767_v5, %v1767_v5  ;;  %v5527_v5 = vld [vmem:[#allocation82_spill] sm:$0xff] }
 0x28d   : > { %v1878_v13 = vadd.f32 %v4846_v22, %v1877_v32  ;;  %v5540_v32 = vld [vmem:[#allocation101_spill] sm:$0xff] }
 0x28e   : > { %v1839_v46 = vadd.f32 %v3237_v52, %v1838_v55  ;;  %1917 = vmatmul.bf16.vlgmr.msra.gmra.mxu1 %v1895_v40  ;;  %1943 = vmatmul.bf16.vlgmr.msra.gmra.mxu3 %v1895_v40  ;;  %v5530_v55 = vld [vmem:[#allocation89_spill] sm:$0xff] }
 0x28f   : > { %2083 = vmatpush.bf16.msra.mxu1 %v5421_v49  ;;  %2109 = vmatpush.bf16.msra.mxu3 %v5422_v61  ;;  %v1885_v49 = vand.u32 2147483648, %v4839_v9  ;;  %v1883_v61 = vand.u32 2147483647, %v4839_v9  ;;  %v1882_v23 = vsel %vm1881_vm10, %v4846_v22, %v1878_v13  ;;  %v5524_v9 = vld [vmem:[#allocation63_spill] sm:$0xff]  ;;  %v5525_v22 = vld [vmem:[#allocation64_spill] sm:$0xff] }
 0x290   : > { %v1843_v4 = vsel %vm1842_vm6, %v3237_v52, %v1839_v46  ;;  %v5535_v46 = vld [vmem:[#allocation73_spill] sm:$0xff]  ;;  %v5544_v13 = vld [vmem:[#allocation104_spill] sm:$0xff] }
 0x291   : > { %v1848_v34 = vsel %vm1845_vm7, %v1847_v39, %v1843_v4  ;;  %vm1884_vm11 = vcmp.eq.f32.partialorder %v1883_v61, 8.507059e+37  ;;  %v5536_v39 = vld [vmem:[#allocation95_spill] sm:$0xff]  ;;  %v5538_v4 = vld [vmem:[#allocation77_spill] sm:$0xff] }
 0x292   : > { %v1890_v14 = vmul.f32 %v3241_v17, %v1848_v34  ;;  %v5539_v17 = vld [vmem:[#allocation78_spill] sm:$0xff]  ;;  %v5546_v61 = vld [vmem:[#allocation107_spill] sm:$0xff] }
 0x293   : > { %2084 = vmatpush.bf16.msra.mxu1 %v5423_v44  ;;  %2110 = vmatpush.bf16.msra.mxu3 %v5424_v15  ;;  %v1886_v44 = vor.u32 1.1754944e-38, %v1885_v49  ;;  %v5541_v34 = vld [vmem:[#allocation102_spill] sm:$0xff] }
 0x294   : > { %v4869_v41 = vadd.f32 %v1890_v14, %v1889_v3  ;;  %v5542_v3 = vld [vmem:[#allocation85_spill] sm:$0xff]  ;;  %v5543_v14 = vld [vmem:[#allocation86_spill] sm:$0xff] }
 0x295   : > { %v1887_v52 = vsel %vm1884_vm11, %v1886_v44, %v1882_v23  ;;  %v5545_v49 = vld [vmem:[#allocation106_spill] sm:$0xff]  ;;  %v5547_v23 = vld [vmem:[#allocation108_spill] sm:$0xff]  ;;  %v5548_v44 = vld [vmem:[#allocation109_spill] sm:$0xff] }
 0x296   : > { %3242 = vtanh.f32 %v4869_v41 }
 0x297   : > { %2085 = vmatpush.bf16.msra.mxu1 %v5425_v18  ;;  %2111 = vmatpush.bf16.msra.mxu3 %v5426_v16  ;;  %v5506_v18 = vld [vmem:[#allocation47_spill] sm:$0xff]  ;;  %v5507_v16 = vld [vmem:[#allocation48_spill] sm:$0xff] }
 0x29b   : > { %2086 = vmatpush.bf16.msra.mxu1 %v5427_v0  ;;  %2112 = vmatpush.bf16.msra.mxu3 %v5428_v35  ;;  %v5508_v0 = vld [vmem:[#allocation61_spill] sm:$0xff]  ;;  %v5509_v35 = vld [vmem:[#allocation62_spill] sm:$0xff] }
 0x29c   : > { %v3243_v15 = vpop.eup %3242 }
 0x29d   : > { %v1893_v51 = vmul.f32 %v3243_v15, %v1887_v52  ;;  %v5549_v15 = vld [vmem:[#allocation110_spill] sm:$0xff]  ;;  %v5550_v52 = vld [vmem:[#allocation111_spill] sm:$0xff] }
 0x29e   : > { %1969 = vmatmul.bf16.vlgmr.msrb.gmra.mxu1 %v1895_v40  ;;  %1995 = vmatmul.bf16.vlgmr.msrb.gmra.mxu3 %v1895_v40  ;;  %v5532_v40 = vld [vmem:[#allocation91_spill] sm:$0xff] }
 0x29f   : > { %v1894_v1 = vpack.c.bf16 %v1893_v51, %v1893_v51  ;;  %2087 = vmatpush.bf16.msra.mxu1 %v5429_v31  ;;  %2113 = vmatpush.bf16.msra.mxu3 %v5430_v53  ;;  %v5510_v31 = vld [vmem:[#allocation49_spill] sm:$0xff]  ;;  %v5511_v53 = vld [vmem:[#allocation50_spill] sm:$0xff]  ;;  %v5551_v51 = vld [vmem:[#allocation112_spill] sm:$0xff] }
 0x2a1   : > { %1904 = vmatmul.bf16.vlgmr.msra.gmra.mxu0 %v1894_v1  ;;  %1930 = vmatmul.bf16.vlgmr.msra.gmra.mxu2 %v1894_v1 }
 0x2a2   : > { %2070 = vmatpush.bf16.msra.mxu0 %v3631_v38  ;;  %2096 = vmatpush.bf16.msra.mxu2 %v3659_v48  ;;  %v5493_v38 = vld [vmem:[#allocation42_spill] sm:$0xff]  ;;  %v5494_v48 = vld [vmem:[#allocation28_spill] sm:$0xff] }
 0x2a3   : > { %2088 = vmatpush.bf16.msra.mxu1 %v5431_v11  ;;  %2114 = vmatpush.bf16.msra.mxu3 %v5432_v25  ;;  %v5512_v11 = vld [vmem:[#allocation51_spill] sm:$0xff]  ;;  %v5513_v25 = vld [vmem:[#allocation52_spill] sm:$0xff] }
 0x2a6   : > { %2071 = vmatpush.bf16.msra.mxu0 %v3664_v50  ;;  %2097 = vmatpush.bf16.msra.mxu2 %v3694_v60  ;;  %v5495_v50 = vld [vmem:[#allocation30_spill] sm:$0xff]  ;;  %v5496_v60 = vld [vmem:[#allocation43_spill] sm:$0xff] }
 0x2a7   : > { %2089 = vmatpush.bf16.msra.mxu1 %v5433_v7  ;;  %2115 = vmatpush.bf16.msra.mxu3 %v5434_v21  ;;  %v5514_v7 = vld [vmem:[#allocation65_spill] sm:$0xff]  ;;  %v5515_v21 = vld [vmem:[#allocation66_spill] sm:$0xff] }
 0x2aa   : > { %2072 = vmatpush.bf16.msra.mxu0 %v3700_v62  ;;  %2098 = vmatpush.bf16.msra.mxu2 %v3730_v8  ;;  %v5497_v62 = vld [vmem:[#allocation44_spill] sm:$0xff] }
 0x2ab   : > { %2090 = vmatpush.bf16.msra.mxu1 %v5435_v2  ;;  %2116 = vmatpush.bf16.msra.mxu3 %v5436_v27  ;;  %v5498_v8 = vld [vmem:[#allocation32_spill] sm:$0xff]  ;;  %v5516_v2 = vld [vmem:[#allocation55_spill] sm:$0xff] }
 0x2ac   : > { %v5517_v27 = vld [vmem:[#allocation56_spill] sm:$0xff] }
 0x2ae   : > { %2073 = vmatpush.bf16.msra.mxu0 %v5374_v36  ;;  %2091 = vmatmul.bf16.vlgmr.msra.gmra.mxu1 %v1894_v1  ;;  %v5499_v36 = vld [vmem:[#allocation35_spill] sm:$0xff] }
 0x2af   : > { %2204 = vmatpush.bf16.msrb.mxu1 %v5437_v59  ;;  %2230 = vmatpush.bf16.msrb.mxu3 %v5438_v10  ;;  %v5518_v59 = vld [vmem:[#allocation69_spill] sm:$0xff]  ;;  %v5519_v10 = vld [vmem:[#allocation70_spill] sm:$0xff] }
 0x2b0   : > { %2099 = vmatpush.bf16.msra.mxu2 %v5375_v29  ;;  %2117 = vmatmul.bf16.vlgmr.msra.gmra.mxu3 %v1894_v1  ;;  %v5500_v29 = vld [vmem:[#allocation53_spill] sm:$0xff] }
 0x2b1   : > { %1956 = vmatmul.bf16.vlgmr.msrb.gmra.mxu0 %v1894_v1  ;;  %1982 = vmatmul.bf16.vlgmr.msrb.gmra.mxu2 %v1894_v1 }
 0x2b2   : > { %2074 = vmatpush.bf16.msra.mxu0 %v5378_v28  ;;  %v5501_v28 = vld [vmem:[#allocation54_spill] sm:$0xff] }
 0x2b3   : > { %2205 = vmatpush.bf16.msrb.mxu1 %v5439_v43  ;;  %2231 = vmatpush.bf16.msrb.mxu3 %v5440_v42  ;;  %v5520_v43 = vld [vmem:[#allocation59_spill] sm:$0xff]  ;;  %v5521_v42 = vld [vmem:[#allocation60_spill] sm:$0xff] }
 0x2b4   : > { %2100 = vmatpush.bf16.msra.mxu2 %v5379_v20  ;;  %v5502_v20 = vld [vmem:[#allocation45_spill] sm:$0xff] }
 0x2b6   : > { %2075 = vmatpush.bf16.msra.mxu0 %v5382_v57  ;;  %v5504_v57 = vld [vmem:[#allocation57_spill] sm:$0xff] }
 0x2b7   : > { %2206 = vmatpush.bf16.msrb.mxu1 %v5441_v54  ;;  %2232 = vmatpush.bf16.msrb.mxu3 %v5442_v37  ;;  %v5522_v54 = vld [vmem:[#allocation75_spill] sm:$0xff]  ;;  %v5523_v37 = vld [vmem:[#allocation76_spill] sm:$0xff] }
 0x2b8   : > { %2101 = vmatpush.bf16.msra.mxu2 %v5383_v33  ;;  %v5505_v33 = vld [vmem:[#allocation58_spill] sm:$0xff] }
 0x2ba   : > { %2076 = vmatpush.bf16.msra.mxu0 %v5494_v48 }
 0x2bb   : > { %2207 = vmatpush.bf16.msrb.mxu1 %v3971_v58  ;;  %2233 = vmatpush.bf16.msrb.mxu3 %v5493_v38  ;;  %v5503_v58 = vld [vmem:[#allocation46_spill] sm:$0xff] }
 0x2bc   : > { %2102 = vmatpush.bf16.msra.mxu2 %v5495_v50  ;;  %v5553_v38 = vld [vmem:[#allocation114_spill] sm:$0xff] }
 0x2be   : > { %2077 = vmatpush.bf16.msra.mxu0 %v5498_v8 }
 0x2bf   : > { %2208 = vmatpush.bf16.msrb.mxu1 %v5496_v60  ;;  %2234 = vmatpush.bf16.msrb.mxu3 %v5497_v62 }
 0x2c0   : > { %2103 = vmatpush.bf16.msra.mxu2 %v5499_v36 }
 0x2c1   : > { %2078 = vmatmul.bf16.vlgmr.msra.gmra.mxu0 %v1894_v1 }
 0x2c2   : > { %2191 = vmatpush.bf16.msrb.mxu0 %v5500_v29  ;;  %v5554_v29 = vld [vmem:[#allocation16_spill] sm:$0xff] }
 0x2c3   : > { %2209 = vmatpush.bf16.msrb.mxu1 %v5502_v20  ;;  %2235 = vmatpush.bf16.msrb.mxu3 %v5503_v58 }
 0x2c4   : > { %2217 = vmatpush.bf16.msrb.mxu2 %v5501_v28 }
 0x2c5   : > { %2104 = vmatmul.bf16.vlgmr.msra.gmra.mxu2 %v1894_v1  ;;  %v5552_v1 = vld [vmem:[#allocation113_spill] sm:$0xff] }
 0x2c6   : > { %2192 = vmatpush.bf16.msrb.mxu0 %v5504_v57 }
 0x2c7   : > { %2210 = vmatpush.bf16.msrb.mxu1 %v5506_v18  ;;  %2236 = vmatpush.bf16.msrb.mxu3 %v5507_v16  ;;  %v5555_v16 = vld [vmem:[#allocation18_spill] sm:$0xff] }
 0x2c8   : > { %2218 = vmatpush.bf16.msrb.mxu2 %v5505_v33 }
 0x2ca   : > { %2193 = vmatpush.bf16.msrb.mxu0 %v5508_v0 }
 0x2cb   : > { %2211 = vmatpush.bf16.msrb.mxu1 %v5510_v31  ;;  %2237 = vmatpush.bf16.msrb.mxu3 %v5511_v53 }
 0x2cc   : > { %2219 = vmatpush.bf16.msrb.mxu2 %v5509_v35 }
 0x2ce   : > { %2194 = vmatpush.bf16.msrb.mxu0 %v5514_v7  ;;  %v5557_v7 = vld [vmem:[#allocation100_spill] sm:$0xff] }
 0x2cf   : > { %2256 = vmatpush.bf16.msra.mxu1 %v5512_v11  ;;  %2282 = vmatpush.bf16.msra.mxu3 %v5513_v25  ;;  %v5556_v25 = vld [vmem:[#allocation83_spill] sm:$0xff] }
 0x2d0   : > { %2220 = vmatpush.bf16.msrb.mxu2 %v5515_v21  ;;  %v528_v21 = vadd.f32 %v5557_v7, %v5556_v25 }
 0x2d2   : > { %2195 = vmatpush.bf16.msrb.mxu0 %v5518_v59 }
 0x2d3   : > { %2257 = vmatpush.bf16.msra.mxu1 %v5516_v2  ;;  %2283 = vmatpush.bf16.msra.mxu3 %v5517_v27 }
 0x2d4   : > { %2221 = vmatpush.bf16.msrb.mxu2 %v5519_v10 }
 0x2d6   : > { %2196 = vmatpush.bf16.msrb.mxu0 %v5522_v54 }
 0x2d7   : > { %2258 = vmatpush.bf16.msra.mxu1 %v5520_v43  ;;  %2284 = vmatpush.bf16.msra.mxu3 %v5521_v42 }
 0x2d8   : > { %2222 = vmatpush.bf16.msrb.mxu2 %v5523_v37 }
 0x2da   : > { %2197 = vmatpush.bf16.msrb.mxu0 %v5526_v12  ;;  %v5558_v12 = vld [vmem:[#allocation94_spill] sm:$0xff] }
 0x2db   : > { %2259 = vmatpush.bf16.msra.mxu1 %v5524_v9  ;;  %2285 = vmatpush.bf16.msra.mxu3 %v5525_v22 }
 0x2dc   : > { %2223 = vmatpush.bf16.msrb.mxu2 %v5527_v5  ;;  %v5559_v5 = vld [vmem:[#allocation105_spill] sm:$0xff] }
 0x2de   : > { %2198 = vmatpush.bf16.msrb.mxu0 %v5530_v55 }
 0x2df   : > { %2260 = vmatpush.bf16.msra.mxu1 %v5528_v63  ;;  %2286 = vmatpush.bf16.msra.mxu3 %v5529_v45  ;;  %v566_v63 = vadd.f32 %v5559_v5, %v5558_v12 }
 0x2e0   : > { %2224 = vmatpush.bf16.msrb.mxu2 %v5531_v30 }
 0x2e2   : > { %2243 = vmatpush.bf16.msra.mxu0 %v5532_v40 }
 0x2e3   : > { %2261 = vmatpush.bf16.msra.mxu1 %v5534_v56  ;;  %2287 = vmatpush.bf16.msra.mxu3 %v5535_v46 }
 0x2e4   : > { %2269 = vmatpush.bf16.msra.mxu2 %v5533_v24 }
 0x2e6   : > { %2244 = vmatpush.bf16.msra.mxu0 %v5536_v39 }
 0x2e7   : > { %2262 = vmatpush.bf16.msra.mxu1 %v5538_v4  ;;  %2288 = vmatpush.bf16.msra.mxu3 %v5539_v17 }
 0x2e8   : > { %2270 = vmatpush.bf16.msra.mxu2 %v5537_v26 }
 0x2ea   : > { %2245 = vmatpush.bf16.msra.mxu0 %v5540_v32 }
 0x2eb   : > { %2263 = vmatpush.bf16.msra.mxu1 %v5542_v3  ;;  %2289 = vmatpush.bf16.msra.mxu3 %v5543_v14 }
 0x2ec   : > { %2271 = vmatpush.bf16.msra.mxu2 %v5541_v34 }
 0x2ee   : > { %2246 = vmatpush.bf16.msra.mxu0 %v5544_v13 }
 0x2f0   : > { %2272 = vmatpush.bf16.msra.mxu2 %v5545_v49 }
 0x2f2   : > { %2247 = vmatpush.bf16.msra.mxu0 %v5546_v61 }
 0x2f4   : > { %2273 = vmatpush.bf16.msra.mxu2 %v5547_v23 }
 0x2f6   : > { %2248 = vmatpush.bf16.msra.mxu0 %v5548_v44  ;;  %v5560_v44 = vld [vmem:[#allocation79_spill] sm:$0xff] }
 0x2f8   : > { %2274 = vmatpush.bf16.msra.mxu2 %v5549_v15  ;;  %v5561_v15 = vld [vmem:[#allocation97_spill] sm:$0xff] }
 0x2fa   : > { %2249 = vmatpush.bf16.msra.mxu0 %v5550_v52  ;;  %v509_v52 = vadd.f32 %v5561_v15, %v5560_v44 }
 0x2fc   : > { %2275 = vmatpush.bf16.msra.mxu2 %v5551_v51 }
 0x2fe   : > { %2250 = vmatpush.bf16.msra.mxu0 %v5552_v1 }
 0x300   : > { %2276 = vmatpush.bf16.msra.mxu2 %v5553_v38 }
 0x30b   : > { %v1918_v48 = vpop.f32.mrf.mxu1 }
 0x311   : > { %v1944_v50 = vpop.f32.mrf.mxu3 }
 0x313   : > { %v1920_v60 = vpop.f32.mrf.mxu1 }
 0x319   : > { %v1946_v62 = vpop.f32.mrf.mxu3 }
 0x31b   : > { %v1970_v8 = vpop.f32.mrf.mxu1 }
 0x31e   : > { %v1905_v36 = vpop.f32.mrf.mxu0 }
 0x31f   : > { %v1906_v28 = vadd.f32 %v1905_v36, %v5554_v29 }
 0x321   : > { %v1919_v20 = vadd.f32 %v1918_v48, %v1906_v28  ;;  %v1996_v58 = vpop.f32.mrf.mxu3 }
 0x323   : > { %v2993_v57 = vmul.f32 -1.442695, %v1919_v20  ;;  %v1972_v33 = vpop.f32.mrf.mxu1 }
 0x324   : > { %v1931_v18 = vpop.f32.mrf.mxu2 }
 0x325   : > { %3244 = vpow2.f32 %v2993_v57  ;;  %v1932_v0 = vadd.f32 %v1931_v18, %v5555_v16 }
 0x326   : > { %v1907_v35 = vpop.f32.mrf.mxu0 }
 0x327   : > { %v1945_v31 = vadd.f32 %v1944_v50, %v1932_v0 }
 0x329   : > { %v2994_v53 = vmul.f32 -1.442695, %v1945_v31  ;;  %v1998_v11 = vpop.f32.mrf.mxu3 }
 0x32b   : > { %v3245_v2 = vpop.eup %3244  ;;  %3246 = vpow2.f32 %v2994_v53  ;;  %v2092_v27 = vpop.f32.mrf.mxu1 }
 0x32c   : > { %v4974_v59 = vadd.f32 1.0, %v3245_v2  ;;  %v2123_v10 = vadd.f32 %v2092_v27, %v528_v21  ;;  %v1933_v43 = vpop.f32.mrf.mxu2 }
 0x32e   : > { %3248 = vrcp.f32 %v4974_v59  ;;  %v2997_v42 = vmul.f32 -1.442695, %v2123_v10  ;;  %v1957_v54 = vpop.f32.mrf.mxu0  ;;  %vm2009_vm14 = vweird.f32 %v4974_v59  ;;  %v2015_v28 = vand.u32 2147483648, %v4974_v59 }
 0x32f   : > { %v1958_v17 = vadd.f32 %v1957_v54, %v5485_v19 }
 0x330   : > { %3250 = vpow2.f32 %v2997_v42  ;;  %v2016_v25 = vor.u32 1.1754944e-38, %v2015_v28 }
 0x331   : > { %v3247_v37 = vpop.eup %3246  ;;  %v1971_v1 = vadd.f32 %v1970_v8, %v1958_v17  ;;  %v2013_v8 = vand.u32 2147483647, %v4974_v59 }
 0x332   : > { %v2022_v9 = vadd.f32 1.0, %v3247_v37 }
 0x333   : > { %v2118_v22 = vpop.f32.mrf.mxu3  ;;  %v2094_v45 = vpop.f32.mrf.mxu1  ;;  %vm2014_vm3 = vcmp.eq.f32.partialorder %v2013_v8, 8.507059e+37 }
 0x334   : > { %v3249_v55 = vpop.eup %3248  ;;  %3252 = vrcp.f32 %v2022_v9  ;;  %v1983_v30 = vpop.f32.mrf.mxu2  ;;  %v2125_v24 = vadd.f32 %v2118_v22, %v566_v63  ;;  %v2034_v38 = vand.u32 2147483648, %v2022_v9  ;;  %v2032_v48 = vand.u32 2147483647, %v2022_v9 }
 0x335   : > { %v2005_v40 = vmul.f32 %v3249_v55, %v4974_v59  ;;  %v1984_v56 = vadd.f32 %v1983_v30, %v5483_v6  ;;  %vm2010_vm12 = vweird.f32 %v3249_v55  ;;  %vm2028_vm15 = vweird.f32 %v2022_v9 }
 0x336   : > { %v1959_v46 = vpop.f32.mrf.mxu0  ;;  %v3251_v39 = vpop.eup %3250  ;;  %v2998_v32 = vmul.f32 -1.442695, %v2125_v24  ;;  %vm4989_vm0 = vmor %vm2009_vm14, %vm2010_vm12  ;;  %v2035_v18 = vor.u32 1.1754944e-38, %v2034_v38  ;;  %vm2033_vm2 = vcmp.eq.f32.partialorder %v2032_v48, 8.507059e+37 }
 0x337   : > { %v2006_v26 = vsub.f32 1.0, %v2005_v40  ;;  %v1997_v4 = vadd.f32 %v1996_v58, %v1984_v56  ;;  %v4982_v3 = vadd.f32 1.0, %v3251_v39  ;;  %v5564_v56 = vld [vmem:[#allocation93_spill] sm:$0xff]  ;;  %v5565_v46 = vld [vmem:[#allocation103_spill] sm:$0xff] }
 0x338   : > { %v547_v39 = vadd.f32 %v5565_v46, %v5564_v56 }
 0x339   : > { %v2995_v14 = vmul.f32 -1.442695, %v1997_v4  ;;  %v2007_v61 = vmul.f32 %v3249_v55, %v2006_v26  ;;  %vm2154_vm9 = vweird.f32 %v4982_v3 }
 0x33a   : > { %v3253_v34 = vpop.eup %3252 }
 0x33b   : > { %v2120_v13 = vpop.f32.mrf.mxu3  ;;  %v2024_v49 = vmul.f32 %v3253_v34, %v2022_v9  ;;  %3254 = vpow2.f32 %v2995_v14  ;;  %vm2029_vm13 = vweird.f32 %v3253_v34  ;;  %v2008_v62 = vadd.f32 %v3249_v55, %v2007_v61 }
 0x33c   : > { %v1985_v23 = vpop.f32.mrf.mxu2  ;;  %3256 = vpow2.f32 %v2998_v32  ;;  %vm2030_vm1 = vmor %vm2028_vm15, %vm2029_vm13 }
 0x33d   : > { %v2025_v51 = vsub.f32 1.0, %v2024_v49  ;;  %3258 = vrcp.f32 %v4982_v3  ;;  %v2012_v35 = vsel %vm4989_vm0, %v3249_v55, %v2008_v62  ;;  %v2160_v23 = vand.u32 2147483648, %v4982_v3 }
 0x33e   : > { %v2079_v50 = vpop.f32.mrf.mxu0  ;;  %3260 = vtanh.f32 %v1971_v1  ;;  %v2017_v2 = vsel %vm2014_vm3, %v2016_v25, %v2012_v35  ;;  %v2158_v1 = vand.u32 2147483647, %v4982_v3 }
 0x33f   : > { %v2026_v60 = vmul.f32 %v3253_v34, %v2025_v51  ;;  %v2122_v36 = vadd.f32 %v2079_v50, %v509_v52  ;;  %v2161_v28 = vor.u32 1.1754944e-38, %v2160_v23 }
 0x340   : > { %vm2159_vm13 = vcmp.eq.f32.partialorder %v2158_v1, 8.507059e+37 }
 0x341   : > { %v2027_v58 = vadd.f32 %v3253_v34, %v2026_v60  ;;  %v2996_v57 = vmul.f32 -1.442695, %v2122_v36  ;;  %v3255_v33 = vpop.eup %3254 }
 0x342   : > { %v3257_v0 = vpop.eup %3256  ;;  %v2042_v53 = vadd.f32 1.0, %v3255_v33 }
 0x343   : > { %v2031_v31 = vsel %vm2030_vm1, %v3253_v34, %v2027_v58  ;;  %v4996_v11 = vpop.eup %3258  ;;  %3262 = vpow2.f32 %v2996_v57  ;;  %v5001_v42 = vadd.f32 1.0, %v3257_v0 }
 0x344   : > { %v2036_v7 = vsel %vm2033_vm2, %v2035_v18, %v2031_v31  ;;  %3264 = vrcp.f32 %v2042_v53  ;;  %v2150_v59 = vmul.f32 %v4996_v11, %v4982_v3  ;;  %v3261_v43 = vpop.eup %3260  ;;  %v2052_v24 = vand.u32 2147483647, %v2042_v53 }
 0x345   : > { %v2058_v10 = vmul.f32 %v2036_v7, %v4841_v47  ;;  %v2059_v54 = vmul.f32 %v3261_v43, %v2017_v2  ;;  %3266 = vrcp.f32 %v5001_v42  ;;  %v2054_v47 = vand.u32 2147483648, %v2042_v53 }
 0x346   : > { %v2081_v27 = vpop.f32.mrf.mxu0  ;;  %v2151_v22 = vsub.f32 1.0, %v2150_v59  ;;  %vm2048_vm5 = vweird.f32 %v2042_v53  ;;  %vm2155_vm6 = vweird.f32 %v4996_v11  ;;  %vm2053_vm8 = vcmp.eq.f32.partialorder %v2052_v24, 8.507059e+37 }
 0x347   : > { %v5003_v12 = vadd.f32 %v2059_v54, %v2058_v10  ;;  %v2055_v14 = vor.u32 1.1754944e-38, %v2054_v47  ;;  %vm5015_vm10 = vmor %vm2154_vm9, %vm2155_vm6  ;;  %v2180_v25 = vand.u32 2147483648, %v5001_v42  ;;  %vm2174_vm1 = vweird.f32 %v5001_v42 }
 0x348   : > { %v2105_v21 = vpop.f32.mrf.mxu2  ;;  %v2152_v30 = vmul.f32 %v4996_v11, %v2151_v22  ;;  %v2178_v7 = vand.u32 2147483647, %v5001_v42 }
 0x349   : > { %v3263_v37 = vpop.eup %3262  ;;  %v2124_v32 = vadd.f32 %v2105_v21, %v547_v39  ;;  %v2181_v2 = vor.u32 1.1754944e-38, %v2180_v25 }
 0x34a   : > { %v3265_v9 = vpop.eup %3264  ;;  %v2129_v5 = vadd.f32 1.0, %v3263_v37  ;;  %v2153_v34 = vadd.f32 %v4996_v11, %v2152_v30  ;;  %vm2179_vm3 = vcmp.eq.f32.partialorder %v2178_v7, 8.507059e+37 }
 0x34b   : > { %v2044_v63 = vmul.f32 %v3265_v9, %v2042_v53  ;;  %vm2049_vm4 = vweird.f32 %v3265_v9  ;;  %v3267_v26 = vpop.eup %3266 }
 0x34c   : > { %3268 = vrcp.f32 %v2129_v5  ;;  %vm2050_vm7 = vmor %vm2048_vm5, %vm2049_vm4  ;;  %v2170_v44 = vmul.f32 %v3267_v26, %v5001_v42  ;;  %v2141_v48 = vand.u32 2147483648, %v2129_v5  ;;  %v2157_v50 = vsel %vm5015_vm10, %v4996_v11, %v2153_v34 }
 0x34d   : > { %v2045_v55 = vsub.f32 1.0, %v2044_v63  ;;  %3270 = vtanh.f32 %v5003_v12  ;;  %v2139_v62 = vand.u32 2147483647, %v2129_v5  ;;  %vm2135_vm12 = vweird.f32 %v2129_v5 }
 0x34e   : > { %3272 = vtanh.f32 %v2124_v32  ;;  %v2171_v20 = vsub.f32 1.0, %v2170_v44  ;;  %v2142_v3 = vor.u32 1.1754944e-38, %v2141_v48  ;;  %v2162_v58 = vsel %vm2159_vm13, %v2161_v28, %v2157_v50 }
 0x34f   : > { %v2046_v40 = vmul.f32 %v3265_v9, %v2045_v55  ;;  %vm2140_vm15 = vcmp.eq.f32.partialorder %v2139_v62, 8.507059e+37  ;;  %v2184_v35 = vmul.f32 %v2162_v58, %v4869_v41  ;;  %vm2175_vm0 = vweird.f32 %v3267_v26 }
 0x350   : > { %v2107_v45 = vpop.f32.mrf.mxu2  ;;  %v2172_v18 = vmul.f32 %v3267_v26, %v2171_v20  ;;  %vm2176_vm2 = vmor %vm2174_vm1, %vm2175_vm0 }
 0x351   : > { %v2047_v4 = vadd.f32 %v3265_v9, %v2046_v40 }
 0x352   : > { %v3269_v17 = vpop.eup %3268  ;;  %v2173_v11 = vadd.f32 %v3267_v26, %v2172_v18 }
 0x353   : > { %v2131_v13 = vmul.f32 %v3269_v17, %v2129_v5  ;;  %v2051_v49 = vsel %vm2050_vm7, %v3265_v9, %v2047_v4  ;;  %v3271_v61 = vpop.eup %3270  ;;  %vm2136_vm11 = vweird.f32 %v3269_v17 }
 0x354   : > { %v2056_v15 = vsel %vm2053_vm8, %v2055_v14, %v2051_v49  ;;  %vm2137_vm14 = vmor %vm2135_vm12, %vm2136_vm11  ;;  %v3273_v33 = vpop.eup %3272  ;;  %v2177_v21 = vsel %vm2176_vm2, %v3267_v26, %v2173_v11 }
 0x355   : > { %v2132_v51 = vsub.f32 1.0, %v2131_v13  ;;  %v2062_v38 = vmul.f32 %v3271_v61, %v2056_v15  ;;  %v2182_v27 = vsel %vm2179_vm3, %v2181_v2, %v2177_v21 }
 0x357   : > { %v2133_v60 = vmul.f32 %v3269_v17, %v2132_v51  ;;  %v2190_v36 = vpack.c.bf16 %v2062_v38, %v2062_v38 }
 0x359   : > { %v2134_v8 = vadd.f32 %v3269_v17, %v2133_v60  ;;  %2212 = vmatmul.bf16.vlgmr.msrb.gmra.mxu1 %v2190_v36  ;;  %2238 = vmatmul.bf16.vlgmr.msrb.gmra.mxu3 %v2190_v36 }
 0x35b   : > { %v2138_v57 = vsel %vm2137_vm14, %v3269_v17, %v2134_v8 }
 0x35c   : > { %v2143_v0 = vsel %vm2140_vm15, %v2142_v3, %v2138_v57 }
 0x35d   : > { %v2185_v31 = vmul.f32 %v3273_v33, %v2143_v0 }
 0x35f   : > { %v5024_v53 = vadd.f32 %v2185_v31, %v2184_v35 }
 0x361   : > { %3274 = vtanh.f32 %v5024_v53  ;;  %2359 = vst [vmem:[#allocation3] sm:$0xff] %v5024_v53 }
 0x367   : > { %v3275_v41 = vpop.eup %3274 }
 0x368   : > { %v5031_v59 = vmul.f32 %v3275_v41, %v2182_v27 }
 0x369   : > { %2264 = vmatmul.bf16.vlgmr.msra.gmra.mxu1 %v2190_v36  ;;  %2290 = vmatmul.bf16.vlgmr.msra.gmra.mxu3 %v2190_v36 }
 0x36a   : > { %v2189_v10 = vpack.c.bf16 %v5031_v59, %v5031_v59  ;;  %2358 = vst [vmem:[#allocation3 + $0x10] sm:$0xff] %v5031_v59 }
 0x36c   : > { %2199 = vmatmul.bf16.vlgmr.msrb.gmra.mxu0 %v2189_v10  ;;  %2225 = vmatmul.bf16.vlgmr.msrb.gmra.mxu2 %v2189_v10 }
 0x37c   : > { %2251 = vmatmul.bf16.vlgmr.msra.gmra.mxu0 %v2189_v10  ;;  %2277 = vmatmul.bf16.vlgmr.msra.gmra.mxu2 %v2189_v10 }
 0x3d6   : > { %v2213_v43 = vpop.f32.mrf.mxu1 }
 0x3dc   : > { %v2239_v42 = vpop.f32.mrf.mxu3 }
 0x3de   : > { %v2215_v54 = vpop.f32.mrf.mxu1 }
 0x3e4   : > { %v2241_v37 = vpop.f32.mrf.mxu3 }
 0x3e6   : > { %v2265_v9 = vpop.f32.mrf.mxu1 }
 0x3e9   : > { %v2200_v22 = vpop.f32.mrf.mxu0 }
 0x3ea   : > { %v2201_v5 = vadd.f32 %v2200_v22, %v5554_v29 }
 0x3ec   : > { %v2214_v63 = vadd.f32 %v2213_v43, %v2201_v5  ;;  %v2291_v45 = vpop.f32.mrf.mxu3 }
 0x3ee   : > { %v2999_v55 = vmul.f32 -1.442695, %v2214_v63  ;;  %v2267_v30 = vpop.f32.mrf.mxu1 }
 0x3ef   : > { %v2226_v47 = vpop.f32.mrf.mxu2 }
 0x3f0   : > { %3276 = vpow2.f32 %v2999_v55  ;;  %v2227_v40 = vadd.f32 %v2226_v47, %v5555_v16 }
 0x3f1   : > { %v2202_v24 = vpop.f32.mrf.mxu0 }
 0x3f2   : > { %v2240_v56 = vadd.f32 %v2239_v42, %v2227_v40 }
 0x3f4   : > { %v3000_v46 = vmul.f32 -1.442695, %v2240_v56  ;;  %v2293_v39 = vpop.f32.mrf.mxu3 }
 0x3f6   : > { %v3277_v26 = vpop.eup %3276  ;;  %3278 = vpow2.f32 %v3000_v46 }
 0x3f7   : > { %v2298_v4 = vadd.f32 1.0, %v3277_v26  ;;  %v2228_v17 = vpop.f32.mrf.mxu2 }
 0x3f9   : > { %3280 = vrcp.f32 %v2298_v4  ;;  %v2252_v32 = vpop.f32.mrf.mxu0  ;;  %v2310_v60 = vand.u32 2147483648, %v2298_v4  ;;  %vm2304_vm5 = vweird.f32 %v2298_v4  ;;  %v2308_v28 = vand.u32 2147483647, %v2298_v4 }
 0x3fa   : > { %v2253_v16 = vadd.f32 %v2252_v32, %v5485_v19 }
 0x3fb   : > { %v2311_v3 = vor.u32 1.1754944e-38, %v2310_v60  ;;  %vm2309_vm9 = vcmp.eq.f32.partialorder %v2308_v28, 8.507059e+37 }
 0x3fc   : > { %v3279_v34 = vpop.eup %3278  ;;  %v2266_v38 = vadd.f32 %v2265_v9, %v2253_v16 }
 0x3fd   : > { %v2317_v29 = vadd.f32 1.0, %v3279_v34 }
 0x3ff   : > { %v3281_v14 = vpop.eup %3280  ;;  %3282 = vrcp.f32 %v2317_v29  ;;  %v2278_v13 = vpop.f32.mrf.mxu2  ;;  %v2329_v20 = vand.u32 2147483648, %v2317_v29  ;;  %v2327_v8 = vand.u32 2147483647, %v2317_v29  ;;  %vm2323_vm8 = vweird.f32 %v2317_v29 }
 0x400   : > { %v2300_v49 = vmul.f32 %v3281_v14, %v2298_v4  ;;  %v2279_v61 = vadd.f32 %v2278_v13, %v5483_v6  ;;  %vm2305_vm4 = vweird.f32 %v3281_v14 }
 0x401   : > { %v2254_v23 = vpop.f32.mrf.mxu0  ;;  %vm2306_vm6 = vmor %vm2304_vm5, %vm2305_vm4  ;;  %v2330_v33 = vor.u32 1.1754944e-38, %v2329_v20  ;;  %vm2328_vm11 = vcmp.eq.f32.partialorder %v2327_v8, 8.507059e+37 }
 0x402   : > { %v2301_v44 = vsub.f32 1.0, %v2300_v49  ;;  %v2292_v15 = vadd.f32 %v2291_v45, %v2279_v61 }
 0x404   : > { %v2302_v52 = vmul.f32 %v3281_v14, %v2301_v44  ;;  %v3001_v51 = vmul.f32 -1.442695, %v2292_v15 }
 0x405   : > { %v3283_v1 = vpop.eup %3282 }
 0x406   : > { %v2319_v48 = vmul.f32 %v3283_v1, %v2317_v29  ;;  %v2303_v50 = vadd.f32 %v3281_v14, %v2302_v52  ;;  %3284 = vpow2.f32 %v3001_v51  ;;  %vm2324_vm7 = vweird.f32 %v3283_v1 }
 0x407   : > { %v2280_v62 = vpop.f32.mrf.mxu2  ;;  %3286 = vtanh.f32 %v2266_v38  ;;  %vm2325_vm10 = vmor %vm2323_vm8, %vm2324_vm7 }
 0x408   : > { %v2320_v36 = vsub.f32 1.0, %v2319_v48  ;;  %v2307_v19 = vsel %vm2306_vm6, %v3281_v14, %v2303_v50 }
 0x409   : > { %v2312_v18 = vsel %vm2309_vm9, %v2311_v3, %v2307_v19 }
 0x40a   : > { %v2321_v6 = vmul.f32 %v3283_v1, %v2320_v36 }
 0x40c   : > { %v3285_v58 = vpop.eup %3284  ;;  %v2322_v57 = vadd.f32 %v3283_v1, %v2321_v6 }
 0x40d   : > { %v2337_v0 = vadd.f32 1.0, %v3285_v58  ;;  %v3287_v31 = vpop.eup %3286 }
 0x40e   : > { %v2326_v35 = vsel %vm2325_vm10, %v3283_v1, %v2322_v57  ;;  %v2354_v7 = vmul.f32 %v3287_v31, %v2312_v18 }
 0x40f   : > { %v2331_v11 = vsel %vm2328_vm11, %v2330_v33, %v2326_v35  ;;  %3288 = vrcp.f32 %v2337_v0  ;;  %v2349_v10 = vand.u32 2147483648, %v2337_v0  ;;  %v2347_v42 = vand.u32 2147483647, %v2337_v0 }
 0x410   : > { %v2353_v25 = vmul.f32 %v2331_v11, %v5003_v12  ;;  %vm2343_vm13 = vweird.f32 %v2337_v0 }
 0x411   : > { %v2350_v37 = vor.u32 1.1754944e-38, %v2349_v10  ;;  %vm2348_vm15 = vcmp.eq.f32.partialorder %v2347_v42, 8.507059e+37 }
 0x412   : > { %v2355_v21 = vadd.f32 %v2354_v7, %v2353_v25 }
 0x414   : > { %2361 = vst [vmem:[#allocation3 + $0x8] sm:$0xff] %v2355_v21  ;;  %3290 = vtanh.f32 %v2355_v21 }
 0x415   : > { %v3289_v2 = vpop.eup %3288 }
 0x416   : > { %v2339_v41 = vmul.f32 %v3289_v2, %v2337_v0  ;;  %vm2344_vm12 = vweird.f32 %v3289_v2 }
 0x417   : > { %vm2345_vm14 = vmor %vm2343_vm13, %vm2344_vm12 }
 0x418   : > { %v2340_v27 = vsub.f32 1.0, %v2339_v41 }
 0x41a   : > { %v2341_v43 = vmul.f32 %v3289_v2, %v2340_v27  ;;  %v3291_v22 = vpop.eup %3290 }
 0x41c   : > { %v2342_v54 = vadd.f32 %v3289_v2, %v2341_v43 }
 0x41e   : > { %v2346_v9 = vsel %vm2345_vm14, %v3289_v2, %v2342_v54  ;;  %2365 = sbr.rel (%p3002_p5) target bundleno = 1063 (0x427), region = 52 }
 0x41f   : > { %v2351_v5 = vsel %vm2348_vm15, %v2350_v37, %v2346_v9 }
 0x420   : > { %v2357_v12 = vmul.f32 %v3291_v22, %v2351_v5 }
 0x422   : > { %2360 = vst [vmem:[#allocation3 + $0x18] sm:$0xff] %v2357_v12 }
 0x423   : > { %2366 = vst [vmem:[#allocation4] sm:$0xff] %v5031_v59 }
 0x424   : > { %2368 = vst [vmem:[#allocation4 + $0x8] sm:$0xff] %v2357_v12 }
 0x425   : > { %2369 = vst [vmem:[#allocation6] sm:$0xff] %v5024_v53 }
 0x426   : > { %2371 = vst [vmem:[#allocation6 + $0x8] sm:$0xff] %v2355_v21 }
 0x427 PF: > { %p3147_p6 = scmp.eq.s32.totalorder %s3415_s25, 1  ;;  %s3365_s9 = smov [#allocation4]  }
 0x428   : > { %s2377_s10 = sshll.u32 %s3365_s9, 4  ;;  %s2379_s13 = sshll.u32 %s5072_s6, 4  ;;  %s2378_s10 = int_to_ptr.vmem [resolvable:$true] %s2377_s10  ;;  %s2380_s13 = int_to_ptr.hbm [resolvable:$true] %s2379_s13 }
 0x429   : > { %s3366_s30 = smov 128   ;;  %s3367_s14 = smov 8  }
 0x42a   : > { %3140 = dma.vmem_to_hbm [thread:$0]  (%p3147_p6), %s2378_s10, 256, %s2380_s13, [#allocation5], %s3366_s30, %s3366_s30, %s3367_s14  }
 0x42b   : > { %s2393_s17 = sshll.u32 %s5073_s7, 4  ;;  %s3368_s18 = smov [#allocation6]   ;;  %s2394_s17 = int_to_ptr.hbm [resolvable:$true] %s2393_s17 }
 0x42c   : > { %s2391_s19 = sshll.u32 %s3368_s18, 4  ;;  %s2392_s19 = int_to_ptr.vmem [resolvable:$true] %s2391_s19 }
 0x42d   : > { %3142 = dma.vmem_to_hbm [thread:$0]  (%p3147_p6), %s2392_s19, 256, %s2394_s17, [#allocation7], %s3366_s30, %s3366_s30, %s3367_s14  }
 0x42e   : > { %3353 = dma.done.wait (%p3147_p6), [#allocation5], 256  }
 0x42f   : > { %3355 = vsyncadd (%p3147_p6), [#allocation5], 4294967040 }
 0x430   : > { %3357 = dma.done.wait (%p3147_p6), [#allocation7], 256  }
 0x431   : > { %3359 = vsyncadd (%p3147_p6), [#allocation7], 4294967040 }
 0x432 PF: > { %s20_s24 = sadd.s32 1, %s3362_s24  }
 0x433   : > { %p17_p7 = scmp.ge.s32.totalorder %s20_s24, 4  }
 0x435   :  { %19 = sbr.rel (!%p17_p7) target bundleno = 2 (0x2), region = 96 }
 0x43a   :  { %2415 = vsyncpa [#allocation5], 1 }
 0x43b   :  { %2417 = vsyncpa [#allocation5 + $0x1], 1 }
 0x43c   :  { %2418 = vsyncpa [#allocation7], 1 }

</bundles_post_ra>
